<compile_context>
chip_gen: v7x
topology: tpu7x:2x2x1
jax: 0.10.0
libtpu: 0.0.40
codegen_flags: <defaults>
</compile_context>

<pallas_src>
import math
import functools

import jax
import jax.numpy as jnp
from jax import lax
from jax.experimental import pallas as pl
from jax.experimental.pallas import tpu as pltpu

MXU_DTYPE = jnp.bfloat16   # MXU operand dtype & HBM weight storage dtype
ACT_DTYPE = jnp.bfloat16   # inter-kernel activation handoff dtype
LN_EPS = 1e-5


# --------------------------- hardware-aware helpers --------------------------- #

@functools.lru_cache(maxsize=None)
def _vmem_limit_bytes():
    """Explicit per-kernel VMEM budget: 3/4 of physical VMEM, capped at 96 MiB.
    (v7x: 64 MiB physical -> 48 MiB; v5e/v6e: 128 MiB -> 96 MiB.)"""
    try:
        cap = int(pltpu.get_tpu_info().vmem_capacity_bytes)
    except Exception:
        cap = 64 * 1024 * 1024
    return min((cap * 3) // 4, 96 * 1024 * 1024)


@functools.lru_cache(maxsize=None)
def _cparams(n_axes):
    return pltpu.CompilerParams(
        dimension_semantics=("parallel",) * n_axes,
        vmem_limit_bytes=_vmem_limit_bytes())


def _const_spec(block_shape, index_map):
    """BlockSpec for operands whose index_map is constant across the grid
    (weights / biases / gamma / beta / PE): single-buffered so they don't get
    double-buffered in VMEM."""
    try:
        return pl.BlockSpec(block_shape, index_map, pipeline_mode=pl.Buffered(1))
    except Exception:          # older jax without pipeline_mode / Buffered
        return pl.BlockSpec(block_shape, index_map)


def _row_tile(M, bytes_per_row=0, fixed_bytes=0):
    """Largest row tile dividing M that fits the per-generation VMEM budget."""
    budget = max(_vmem_limit_bytes() // 2, 4 * 1024 * 1024)
    fallback = M
    for tm in (512, 256, 128, 64, 32, 16, 8):
        if M % tm == 0:
            fallback = tm
            if fixed_bytes + tm * bytes_per_row <= budget:
                return tm
    return fallback


def _q_tile(Lq):
    """Query tile for attention (capped at 256 per the perf review)."""
    for tq in (256, 128, 64, 32, 16, 8):
        if Lq % tq == 0:
            return tq
    return Lq


# ------------------------------ kernel helpers ------------------------------ #

def _layernorm_math(x, g, b, eps):
    # biased variance + eps inside rsqrt, matching torch.nn.LayerNorm (f32 math)
    mu = jnp.mean(x, axis=-1, keepdims=True)
    var = jnp.mean((x - mu) ** 2, axis=-1, keepdims=True)
    return (x - mu) * lax.rsqrt(var + eps) * g + b


# -------------------------------- Pallas kernels ----------------------------- #

def _encode_pe_kernel(x_ref, w_ref, b_ref, pe_ref, o_ref):
    # x: (L, Din) f32, w: (Din, D) bf16, b: (1, D) f32, pe: (L, D) f32 -> (L, D) bf16
    y = jnp.dot(x_ref[...].astype(MXU_DTYPE), w_ref[...],
                preferred_element_type=jnp.float32)
    o_ref[...] = (y + b_ref[...] + pe_ref[...]).astype(o_ref.dtype)


def _attn_ln_kernel(*refs, nhead, scale, eps, has_mask):
    """Fused MHA block: QKV proj + per-head SDPA + single output projection +
    residual + LayerNorm.  Per-head outputs go into a bf16 VMEM scratch lane
    slice so the output projection is one K=D MXU matmul.

    Block shapes (batch dim squeezed by the grid):
      xq: (tq, D) bf16, xkv: (Lk, D) bf16, wq: (D, D) bf16, bq: (1, D) f32,
      wkv: (D, 2D) bf16, bkv: (1, 2D) f32, wo: (D, D) bf16, bo: (1, D) f32,
      g/beta: (1, D) f32, [mask: (tq, Lk) bf16], o: (tq, D) bf16,
      heads scratch: (tq, D) bf16.
    """
    it = iter(refs)
    xq_ref, xkv_ref = next(it), next(it)
    wq_ref, bq_ref = next(it), next(it)
    wkv_ref, bkv_ref = next(it), next(it)
    wo_ref, bo_ref = next(it), next(it)
    g_ref, beta_ref = next(it), next(it)
    mask_ref = next(it) if has_mask else None
    o_ref = next(it)
    heads_ref = next(it)

    D = wo_ref.shape[0]
    Dh = D // nhead

    xq = xq_ref[...]                                        # (tq, D) bf16
    xkv = xkv_ref[...]                                      # (Lk, D) bf16

    # projections: bf16 x bf16 -> f32 accumulation on the MXU
    q = jnp.dot(xq, wq_ref[...], preferred_element_type=jnp.float32) + bq_ref[...]
    kv = jnp.dot(xkv, wkv_ref[...], preferred_element_type=jnp.float32) + bkv_ref[...]
    qb = (q * scale).astype(MXU_DTYPE)                      # pre-scale q (torch conv.)
    kb = kv[:, 0:D].astype(MXU_DTYPE)
    vb = kv[:, D:2 * D].astype(MXU_DTYPE)

    if has_mask:
        mask = mask_ref[...].astype(jnp.float32)            # hoisted out of head loop

    for h in range(nhead):
        lo, hi = h * Dh, (h + 1) * Dh
        s = lax.dot_general(qb[:, lo:hi], kb[:, lo:hi],
                            (((1,), (1,)), ((), ())),
                            preferred_element_type=jnp.float32)   # (tq, Lk) f32
        if has_mask:
            s = s + mask
        m = jnp.max(s, axis=-1, keepdims=True)
        p = jnp.exp(s - m)                                   # f32 stable softmax
        denom = jnp.maximum(jnp.sum(p, axis=-1, keepdims=True), 1e-20)
        oh = jnp.dot(p.astype(MXU_DTYPE), vb[:, lo:hi],
                     preferred_element_type=jnp.float32)
        oh = oh * pl.reciprocal(denom, approx=True)
        heads_ref[:, lo:hi] = oh.astype(MXU_DTYPE)           # store bounds live range

    # single K=D output projection over all heads
    attn = jnp.dot(heads_ref[...], wo_ref[...],
                   preferred_element_type=jnp.float32) + bo_ref[...]
    y = xq.astype(jnp.float32) + attn
    o_ref[...] = _layernorm_math(y, g_ref[...], beta_ref[...], eps).astype(o_ref.dtype)


def _ffn_ln_kernel(x_ref, w1_ref, b1_ref, w2_ref, b2_ref, g_ref, beta_ref,
                   o_ref, *, eps):
    # x: (tm, D) bf16 -> LayerNorm(x + relu(x@w1+b1)@w2 + b2), output bf16
    x = x_ref[...]
    h = jnp.maximum(jnp.dot(x, w1_ref[...],
                            preferred_element_type=jnp.float32) + b1_ref[...], 0.0)
    y = x.astype(jnp.float32) + jnp.dot(h.astype(MXU_DTYPE), w2_ref[...],
                                        preferred_element_type=jnp.float32) + b2_ref[...]
    o_ref[...] = _layernorm_math(y, g_ref[...], beta_ref[...], eps).astype(o_ref.dtype)


def _layernorm_kernel(x_ref, g_ref, b_ref, o_ref, *, eps):
    o_ref[...] = _layernorm_math(x_ref[...].astype(jnp.float32),
                                 g_ref[...], b_ref[...], eps).astype(o_ref.dtype)


def _head_mlp_kernel(x_ref, w1_ref, b1_ref, w2_ref, b2_ref, o_ref):
    # fused output head: relu(x@w1+b1)@w2+b2; output lane-padded f32
    h = jnp.maximum(jnp.dot(x_ref[...], w1_ref[...],
                            preferred_element_type=jnp.float32) + b1_ref[...], 0.0)
    o_ref[...] = jnp.dot(h.astype(MXU_DTYPE), w2_ref[...],
                         preferred_element_type=jnp.float32) + b2_ref[...]


# ------------------------------- kernel wrappers ----------------------------- #

def encode_with_pe(x_seq_first, w, b, pe):
    """Input encoder + positional encoding: out[b, l] = x[l, b] @ w + b + pe[l]."""
    L, B, Din = x_seq_first.shape
    D = w.shape[-1]
    # small host-side layout swap of the raw input (feature dim is tiny)
    x_b = jnp.transpose(x_seq_first, (1, 0, 2))
    return pl.pallas_call(
        _encode_pe_kernel,
        out_shape=jax.ShapeDtypeStruct((B, L, D), ACT_DTYPE),
        grid=(B,),
        in_specs=[
            pl.BlockSpec((None, L, Din), lambda i: (i, 0, 0)),
            _const_spec((Din, D), lambda i: (0, 0)),
            _const_spec((1, D), lambda i: (0, 0)),
            _const_spec((L, D), lambda i: (0, 0)),
        ],
        out_specs=pl.BlockSpec((None, L, D), lambda i: (i, 0, 0)),
        compiler_params=_cparams(1),
    )(x_b, w, b.reshape(1, D), pe)


def fused_attention_block(xq, xkv, p, nhead, mask):
    """LayerNorm(xq + MultiHeadAttention(q=xq, k=xkv, v=xkv)).

    xq: (B, Lq, D) bf16; xkv: (B, Lk, D) bf16 (pass xq for self-attention);
    mask: additive (Lq, Lk) bf16 mask or None.
    """
    B, Lq, D = xq.shape
    Lk = xkv.shape[1]
    has_mask = mask is not None
    scale = 1.0 / math.sqrt(D // nhead)
    tq = _q_tile(Lq)

    inputs = [xq, xkv,
              p["wq"], p["bq"].reshape(1, D),
              p["wkv"], p["bkv"].reshape(1, 2 * D),
              p["wo"], p["bo"].reshape(1, D),
              p["g"].reshape(1, D), p["b"].reshape(1, D)]
    in_specs = [
        pl.BlockSpec((None, tq, D), lambda b, q: (b, q, 0)),
        pl.BlockSpec((None, Lk, D), lambda b, q: (b, 0, 0)),
        _const_spec((D, D), lambda b, q: (0, 0)),
        _const_spec((1, D), lambda b, q: (0, 0)),
        _const_spec((D, 2 * D), lambda b, q: (0, 0)),
        _const_spec((1, 2 * D), lambda b, q: (0, 0)),
        _const_spec((D, D), lambda b, q: (0, 0)),
        _const_spec((1, D), lambda b, q: (0, 0)),
        _const_spec((1, D), lambda b, q: (0, 0)),
        _const_spec((1, D), lambda b, q: (0, 0)),
    ]
    if has_mask:
        inputs.append(mask)
        in_specs.append(pl.BlockSpec((tq, Lk), lambda b, q: (q, 0)))

    kernel = functools.partial(_attn_ln_kernel, nhead=nhead, scale=scale,
                               eps=LN_EPS, has_mask=has_mask)
    return pl.pallas_call(
        kernel,
        out_shape=jax.ShapeDtypeStruct((B, Lq, D), ACT_DTYPE),
        grid=(B, Lq // tq),
        in_specs=in_specs,
        out_specs=pl.BlockSpec((None, tq, D), lambda b, q: (b, q, 0)),
        scratch_shapes=[pltpu.VMEM((tq, D), MXU_DTYPE)],
        compiler_params=_cparams(2),
    )(*inputs)


def ffn_layernorm(x, p):
    """LayerNorm(x + relu(x@w1+b1)@w2+b2), fused.  x: (B, L, D) bf16."""
    B, L, D = x.shape
    F = p["w1"].shape[-1]
    M = B * L
    x2 = x.reshape(M, D)
    bytes_per_row = 24 * D + 6 * F                  # bf16 in/out bufs + f32 temps
    fixed_bytes = 4 * D * F + 16 * (D + F)          # bf16 weights (single-buffered)
    tm = _row_tile(M, bytes_per_row, fixed_bytes)
    out = pl.pallas_call(
        functools.partial(_ffn_ln_kernel, eps=LN_EPS),
        out_shape=jax.ShapeDtypeStruct((M, D), ACT_DTYPE),
        grid=(M // tm,),
        in_specs=[
            pl.BlockSpec((tm, D), lambda i: (i, 0)),
            _const_spec((D, F), lambda i: (0, 0)),
            _const_spec((1, F), lambda i: (0, 0)),
            _const_spec((F, D), lambda i: (0, 0)),
            _const_spec((1, D), lambda i: (0, 0)),
            _const_spec((1, D), lambda i: (0, 0)),
            _const_spec((1, D), lambda i: (0, 0)),
        ],
        out_specs=pl.BlockSpec((tm, D), lambda i: (i, 0)),
        compiler_params=_cparams(1),
    )(x2, p["w1"], p["b1"].reshape(1, F), p["w2"], p["b2"].reshape(1, D),
      p["g"].reshape(1, D), p["b"].reshape(1, D))
    return out.reshape(B, L, D)


def layernorm(x, gamma, beta):
    """Plain LayerNorm (no residual / no materialized zeros).  x: (B, L, D)."""
    B, L, D = x.shape
    M = B * L
    x2 = x.reshape(M, D)
    tm = _row_tile(M, 24 * D, 16 * D)
    out = pl.pallas_call(
        functools.partial(_layernorm_kernel, eps=LN_EPS),
        out_shape=jax.ShapeDtypeStruct((M, D), ACT_DTYPE),
        grid=(M // tm,),
        in_specs=[
            pl.BlockSpec((tm, D), lambda i: (i, 0)),
            _const_spec((1, D), lambda i: (0, 0)),
            _const_spec((1, D), lambda i: (0, 0)),
        ],
        out_specs=pl.BlockSpec((tm, D), lambda i: (i, 0)),
        compiler_params=_cparams(1),
    )(x2, gamma.reshape(1, D), beta.reshape(1, D))
    return out.reshape(B, L, D)


def head_mlp(x, w1, b1, w2, b2):
    """Fused output head: relu(x@w1+b1)@w2+b2.  x: (B, L, D) bf16 -> (B, L, N) f32.
    The output feature dim is zero-padded to a 128-lane multiple inside the kernel
    so stores are lane-dense, then sliced back here."""
    B, L, D = x.shape
    F = w1.shape[-1]
    N = w2.shape[-1]
    Np = max(128, ((N + 127) // 128) * 128)
    if Np != N:
        w2 = jnp.pad(w2, ((0, 0), (0, Np - N)))
        b2 = jnp.pad(b2, ((0, Np - N),))
    M = B * L
    x2 = x.reshape(M, D)
    bytes_per_row = 4 * D + 6 * F + 8 * Np
    fixed_bytes = 2 * D * F + 2 * F * Np
    tm = _row_tile(M, bytes_per_row, fixed_bytes)
    out = pl.pallas_call(
        _head_mlp_kernel,
        out_shape=jax.ShapeDtypeStruct((M, Np), jnp.float32),
        grid=(M // tm,),
        in_specs=[
            pl.BlockSpec((tm, D), lambda i: (i, 0)),
            _const_spec((D, F), lambda i: (0, 0)),
            _const_spec((1, F), lambda i: (0, 0)),
            _const_spec((F, Np), lambda i: (0, 0)),
            _const_spec((1, Np), lambda i: (0, 0)),
        ],
        out_specs=pl.BlockSpec((tm, Np), lambda i: (i, 0)),
        compiler_params=_cparams(1),
    )(x2, w1, b1.reshape(1, F), w2, b2.reshape(1, Np))
    return out[:, :N].reshape(B, L, N)


# --------------------------------- model glue -------------------------------- #

def positional_encoding_table(max_len, d_model):
    position = jnp.arange(max_len, dtype=jnp.float32)[:, None]
    div_term = jnp.exp(jnp.arange(0, d_model, 2, dtype=jnp.float32)
                       * (-math.log(10000.0) / d_model))
    pe = jnp.zeros((max_len, d_model), jnp.float32)
    pe = pe.at[:, 0::2].set(jnp.sin(position * div_term))
    pe = pe.at[:, 1::2].set(jnp.cos(position * div_term))
    return pe                                  # (max_len, d_model)


@functools.partial(jax.jit, static_argnames=("nhead",))
def seq2seq_transformer_forward(params, src, trg, src_mask, tgt_mask, *, nhead):
    """src: (S, B, src_dim), trg: (T, B, trg_dim); masks are additive float.
    Returns (T, B, trg_dim), matching the PyTorch module (batch_first=False)."""
    S, T = src.shape[0], trg.shape[0]
    pe = params["pe"]
    src_mask_b = None if src_mask is None else src_mask.astype(MXU_DTYPE)
    tgt_mask_b = None if tgt_mask is None else tgt_mask.astype(MXU_DTYPE)

    # input encoders + positional encoding (dropout = identity in eval mode)
    x = encode_with_pe(src, params["src_enc_w"], params["src_enc_b"], pe[:S])  # (B,S,D)
    y = encode_with_pe(trg, params["trg_enc_w"], params["trg_enc_b"], pe[:T])  # (B,T,D)

    # transformer encoder (post-norm layers + final LayerNorm, as nn.Transformer)
    for lp in params["enc_layers"]:
        x = fused_attention_block(x, x, lp["attn"], nhead, src_mask_b)
        x = ffn_layernorm(x, lp["ffn"])
    memory = layernorm(x, params["enc_norm"]["g"], params["enc_norm"]["b"])

    # transformer decoder
    for lp in params["dec_layers"]:
        y = fused_attention_block(y, y, lp["self_attn"], nhead, tgt_mask_b)
        y = fused_attention_block(y, memory, lp["cross_attn"], nhead, None)
        y = ffn_layernorm(y, lp["ffn"])
    y = layernorm(y, params["dec_norm"]["g"], params["dec_norm"]["b"])

    # output head (relu-linear -> linear, fused, lane-padded output)
    out = head_mlp(y, params["out1_w"], params["out1_b"],
                   params["out2_w"], params["out2_b"])
    return jnp.transpose(out, (1, 0, 2))       # back to seq-first (T, B, trg_dim)


# ------------------------------- parameter init ------------------------------ #

def init_params(key, src_dim, trg_dim, nhead, n_enc, n_dec, d_model, dim_ff,
                max_len=64):
    keys = iter(jax.random.split(key, 1024))

    def dense(fan_in, fan_out):
        k1, k2 = jax.random.split(next(keys))
        bound = 1.0 / math.sqrt(fan_in)
        w = jax.random.uniform(k1, (fan_in, fan_out), jnp.float32, -bound, bound)
        b = jax.random.uniform(k2, (fan_out,), jnp.float32, -bound, bound)
        return w.astype(MXU_DTYPE), b          # weights bf16 in HBM, biases f32

    ones = jnp.ones((d_model,), jnp.float32)
    zeros = jnp.zeros((d_model,), jnp.float32)

    def attn():
        wq, bq = dense(d_model, d_model)
        wkv, bkv = dense(d_model, 2 * d_model)  # fused K|V in-projection
        wo, bo = dense(d_model, d_model)
        return dict(wq=wq, bq=bq, wkv=wkv, bkv=bkv, wo=wo, bo=bo, g=ones, b=zeros)

    def ffn():
        w1, b1 = dense(d_model, dim_ff)
        w2, b2 = dense(dim_ff, d_model)
        return dict(w1=w1, b1=b1, w2=w2, b2=b2, g=ones, b=zeros)

    params = {}
    params["src_enc_w"], params["src_enc_b"] = dense(src_dim, d_model)
    params["trg_enc_w"], params["trg_enc_b"] = dense(trg_dim, d_model)
    params["enc_layers"] = [dict(attn=attn(), ffn=ffn()) for _ in range(n_enc)]
    params["enc_norm"] = dict(g=ones, b=zeros)
    params["dec_layers"] = [dict(self_attn=attn(), cross_attn=attn(), ffn=ffn())
                            for _ in range(n_dec)]
    params["dec_norm"] = dict(g=ones, b=zeros)
    params["out1_w"], params["out1_b"] = dense(d_model, dim_ff)
    params["out2_w"], params["out2_b"] = dense(dim_ff, trg_dim)
    params["pe"] = positional_encoding_table(max_len, d_model)
    return params


# ------------------------------------ main ------------------------------------ #

if __name__ == "__main__":
    key = jax.random.PRNGKey(0)

    # small, lane-aligned demo shapes (d_model / dim_ff multiples of 128, Dh=64)
    S, T, B = 16, 16, 2
    SRC_DIM, TRG_DIM = 6, 5
    NHEAD, D_MODEL, DIM_FF = 2, 128, 256
    N_ENC, N_DEC = 2, 2

    kp, ksrc, ktrg = jax.random.split(key, 3)
    params = init_params(kp, SRC_DIM, TRG_DIM, NHEAD, N_ENC, N_DEC, D_MODEL, DIM_FF)

    src = jax.random.normal(ksrc, (S, B, SRC_DIM), jnp.float32)
    trg = jax.random.normal(ktrg, (T, B, TRG_DIM), jnp.float32)

    # additive float masks (nn.Transformer convention): zeros = attend,
    # large-negative = blocked (causal mask for the decoder self-attention).
    src_mask = jnp.zeros((S, S), jnp.float32)
    tgt_mask = jnp.where(
        jnp.arange(T)[:, None] >= jnp.arange(T)[None, :], 0.0, -1e9
    ).astype(jnp.float32)

    out = seq2seq_transformer_forward(params, src, trg, src_mask, tgt_mask,
                                      nhead=NHEAD)
    out = jax.block_until_ready(out)

    assert out.shape == (T, B, TRG_DIM), out.shape
    assert bool(jnp.all(jnp.isfinite(out)))
    print("KERNEL_OK")
</pallas_src>

<mosaic_0001>
module attributes {stable_mosaic.version = 11 : i64} {
  func.func @_encode_pe_kernel(%arg0: i32, %arg1: memref<1x16x6xf32, #tpu.memory_space<vmem>>, %arg2: memref<6x128xbf16, #tpu.memory_space<vmem>>, %arg3: memref<1x128xf32, #tpu.memory_space<vmem>>, %arg4: memref<16x128xf32, #tpu.memory_space<vmem>>, %arg5: memref<1x16x128xbf16, #tpu.memory_space<vmem>>) attributes {dimension_semantics = [#tpu.dimension_semantics<parallel>], iteration_bounds = array<i64: 2>, scalar_prefetch = 0 : i64, scratch_operands = 0 : i64, tpu.core_type = #tpu.core_type<tc>, window_params = [{transform_indices = @transform_0, window_bounds = array<i64: 1, 16, 6>}, {pipeline_mode = #tpu.pipeline_mode<synchronous>, transform_indices = @transform_1, window_bounds = array<i64: 6, 128>}, {pipeline_mode = #tpu.pipeline_mode<synchronous>, transform_indices = @transform_2, window_bounds = array<i64: 1, 128>}, {pipeline_mode = #tpu.pipeline_mode<synchronous>, transform_indices = @transform_3, window_bounds = array<i64: 16, 128>}, {transform_indices = @transform_4, window_bounds = array<i64: 1, 16, 128>}]} {
    %c0 = arith.constant 0 : index
    %c0_0 = arith.constant 0 : index
    %c0_1 = arith.constant 0 : index
    %0 = vector.load %arg1[%c0, %c0_0, %c0_1] : memref<1x16x6xf32, #tpu.memory_space<vmem>>, vector<1x16x6xf32>
    %1 = vector.shape_cast %0 : vector<1x16x6xf32> to vector<16x6xf32>
    %2 = arith.truncf %1 : vector<16x6xf32> to vector<16x6xbf16>
    %c0_2 = arith.constant 0 : index
    %c0_3 = arith.constant 0 : index
    %3 = vector.load %arg2[%c0_2, %c0_3] : memref<6x128xbf16, #tpu.memory_space<vmem>>, vector<6x128xbf16>
    %cst = arith.constant dense<0.000000e+00> : vector<16x128xf32>
    %4 = tpu.matmul %2, %3, %cst {dimension_numbers = #tpu.dot_dimension_numbers<[1], [0], [0], [1], [0, 0, 1, 1], [], []>} : vector<16x6xbf16>, vector<6x128xbf16>, vector<16x128xf32> -> vector<16x128xf32>
    %c0_4 = arith.constant 0 : index
    %c0_5 = arith.constant 0 : index
    %5 = vector.load %arg3[%c0_4, %c0_5] : memref<1x128xf32, #tpu.memory_space<vmem>>, vector<1x128xf32>
    %6 = vector.broadcast %5 : vector<1x128xf32> to vector<16x128xf32>
    %7 = arith.addf %4, %6 : vector<16x128xf32>
    %c0_6 = arith.constant 0 : index
    %c0_7 = arith.constant 0 : index
    %8 = vector.load %arg4[%c0_6, %c0_7] : memref<16x128xf32, #tpu.memory_space<vmem>>, vector<16x128xf32>
    %9 = arith.addf %7, %8 : vector<16x128xf32>
    %10 = arith.truncf %9 : vector<16x128xf32> to vector<16x128xbf16>
    %c0_8 = arith.constant 0 : index
    %c0_9 = arith.constant 0 : index
    %c0_10 = arith.constant 0 : index
    %11 = vector.load %arg5[%c0_8, %c0_9, %c0_10] : memref<1x16x128xbf16, #tpu.memory_space<vmem>>, vector<1x16x128xbf16>
    %12 = vector.shape_cast %11 : vector<1x16x128xbf16> to vector<16x128xbf16>
    %13 = vector.shape_cast %10 : vector<16x128xbf16> to vector<1x16x128xbf16>
    tpu.vector_store %arg5[%c0_8, %c0_9, %c0_10], %13 {strides = array<i32>} : memref<1x16x128xbf16, #tpu.memory_space<vmem>>, vector<1x16x128xbf16>,
    return
  }
  func.func @transform_0(%arg0: i32) -> (i32, i32, i32) {
    %c0_i32 = arith.constant 0 : i32
    %c0_i32_0 = arith.constant 0 : i32
    %c0_i32_1 = arith.constant 0 : i32
    return %arg0, %c0_i32, %c0_i32_0 : i32, i32, i32
  }
  func.func @transform_1(%arg0: i32) -> (i32, i32) {
    %c0_i32 = arith.constant 0 : i32
    %c0_i32_0 = arith.constant 0 : i32
    %c0_i32_1 = arith.constant 0 : i32
    return %c0_i32, %c0_i32_0 : i32, i32
  }
  func.func @transform_2(%arg0: i32) -> (i32, i32) {
    %c0_i32 = arith.constant 0 : i32
    %c0_i32_0 = arith.constant 0 : i32
    %c0_i32_1 = arith.constant 0 : i32
    return %c0_i32, %c0_i32_0 : i32, i32
  }
  func.func @transform_3(%arg0: i32) -> (i32, i32) {
    %c0_i32 = arith.constant 0 : i32
    %c0_i32_0 = arith.constant 0 : i32
    %c0_i32_1 = arith.constant 0 : i32
    return %c0_i32, %c0_i32_0 : i32, i32
  }
  func.func @transform_4(%arg0: i32) -> (i32, i32, i32) {
    %c0_i32 = arith.constant 0 : i32
    %c0_i32_0 = arith.constant 0 : i32
    %c0_i32_1 = arith.constant 0 : i32
    return %arg0, %c0_i32, %c0_i32_0 : i32, i32, i32
  }
}

module attributes {stable_mosaic.version = 11 : i64} {
  func.func @_attn_ln_kernel(%arg0: i32, %arg1: i32, %arg2: memref<1x16x128xbf16, #tpu.memory_space<vmem>>, %arg3: memref<1x16x128xbf16, #tpu.memory_space<vmem>>, %arg4: memref<128x128xbf16, #tpu.memory_space<vmem>>, %arg5: memref<1x128xf32, #tpu.memory_space<vmem>>, %arg6: memref<128x256xbf16, #tpu.memory_space<vmem>>, %arg7: memref<1x256xf32, #tpu.memory_space<vmem>>, %arg8: memref<128x128xbf16, #tpu.memory_space<vmem>>, %arg9: memref<1x128xf32, #tpu.memory_space<vmem>>, %arg10: memref<1x128xf32, #tpu.memory_space<vmem>>, %arg11: memref<1x128xf32, #tpu.memory_space<vmem>>, %arg12: memref<16x16xbf16, #tpu.memory_space<vmem>>, %arg13: memref<1x16x128xbf16, #tpu.memory_space<vmem>>, %arg14: memref<16x128xbf16, #tpu.memory_space<vmem>>) attributes {dimension_semantics = [#tpu.dimension_semantics<parallel>, #tpu.dimension_semantics<parallel>], iteration_bounds = array<i64: 2, 1>, scalar_prefetch = 0 : i64, scratch_operands = 1 : i64, tpu.core_type = #tpu.core_type<tc>, window_params = [{transform_indices = @transform_0, window_bounds = array<i64: 1, 16, 128>}, {transform_indices = @transform_1, window_bounds = array<i64: 1, 16, 128>}, {pipeline_mode = #tpu.pipeline_mode<synchronous>, transform_indices = @transform_2, window_bounds = array<i64: 128, 128>}, {pipeline_mode = #tpu.pipeline_mode<synchronous>, transform_indices = @transform_3, window_bounds = array<i64: 1, 128>}, {pipeline_mode = #tpu.pipeline_mode<synchronous>, transform_indices = @transform_4, window_bounds = array<i64: 128, 256>}, {pipeline_mode = #tpu.pipeline_mode<synchronous>, transform_indices = @transform_5, window_bounds = array<i64: 1, 256>}, {pipeline_mode = #tpu.pipeline_mode<synchronous>, transform_indices = @transform_6, window_bounds = array<i64: 128, 128>}, {pipeline_mode = #tpu.pipeline_mode<synchronous>, transform_indices = @transform_7, window_bounds = array<i64: 1, 128>}, {pipeline_mode = #tpu.pipeline_mode<synchronous>, transform_indices = @transform_8, window_bounds = array<i64: 1, 128>}, {pipeline_mode = #tpu.pipeline_mode<synchronous>, transform_indices = @transform_9, window_bounds = array<i64: 1, 128>}, {transform_indices = @transform_10, window_bounds = array<i64: 16, 16>}, {transform_indices = @transform_11, window_bounds = array<i64: 1, 16, 128>}]} {
    %c0 = arith.constant 0 : index
    %c0_0 = arith.constant 0 : index
    %c0_1 = arith.constant 0 : index
    %0 = vector.load %arg2[%c0, %c0_0, %c0_1] : memref<1x16x128xbf16, #tpu.memory_space<vmem>>, vector<1x16x128xbf16>
    %1 = vector.shape_cast %0 : vector<1x16x128xbf16> to vector<16x128xbf16>
    %c0_2 = arith.constant 0 : index
    %c0_3 = arith.constant 0 : index
    %c0_4 = arith.constant 0 : index
    %2 = vector.load %arg3[%c0_2, %c0_3, %c0_4] : memref<1x16x128xbf16, #tpu.memory_space<vmem>>, vector<1x16x128xbf16>
    %3 = vector.shape_cast %2 : vector<1x16x128xbf16> to vector<16x128xbf16>
    %c0_5 = arith.constant 0 : index
    %c0_6 = arith.constant 0 : index
    %4 = vector.load %arg4[%c0_5, %c0_6] : memref<128x128xbf16, #tpu.memory_space<vmem>>, vector<128x128xbf16>
    %cst = arith.constant dense<0.000000e+00> : vector<16x128xf32>
    %5 = tpu.matmul %1, %4, %cst {dimension_numbers = #tpu.dot_dimension_numbers<[1], [0], [0], [1], [0, 0, 1, 1], [], []>} : vector<16x128xbf16>, vector<128x128xbf16>, vector<16x128xf32> -> vector<16x128xf32>
    %c0_7 = arith.constant 0 : index
    %c0_8 = arith.constant 0 : index
    %6 = vector.load %arg5[%c0_7, %c0_8] : memref<1x128xf32, #tpu.memory_space<vmem>>, vector<1x128xf32>
    %7 = vector.broadcast %6 : vector<1x128xf32> to vector<16x128xf32>
    %8 = arith.addf %5, %7 : vector<16x128xf32>
    %c0_9 = arith.constant 0 : index
    %c0_10 = arith.constant 0 : index
    %9 = vector.load %arg6[%c0_9, %c0_10] : memref<128x256xbf16, #tpu.memory_space<vmem>>, vector<128x256xbf16>
    %cst_11 = arith.constant dense<0.000000e+00> : vector<16x256xf32>
    %10 = tpu.matmul %3, %9, %cst_11 {dimension_numbers = #tpu.dot_dimension_numbers<[1], [0], [0], [1], [0, 0, 1, 1], [], []>} : vector<16x128xbf16>, vector<128x256xbf16>, vector<16x256xf32> -> vector<16x256xf32>
    %c0_12 = arith.constant 0 : index
    %c0_13 = arith.constant 0 : index
    %11 = vector.load %arg7[%c0_12, %c0_13] : memref<1x256xf32, #tpu.memory_space<vmem>>, vector<1x256xf32>
    %12 = vector.broadcast %11 : vector<1x256xf32> to vector<16x256xf32>
    %13 = arith.addf %10, %12 : vector<16x256xf32>
    %cst_14 = arith.constant 1.250000e-01 : f32
    %14 = vector.broadcast %cst_14 : f32 to vector<16x128xf32>
    %15 = arith.mulf %8, %14 : vector<16x128xf32>
    %16 = arith.truncf %15 : vector<16x128xf32> to vector<16x128xbf16>
    %17 = vector.extract_strided_slice %13 {offsets = [0, 0], sizes = [16, 128], strides = [1, 1]} : vector<16x256xf32> to vector<16x128xf32>
    %18 = arith.truncf %17 : vector<16x128xf32> to vector<16x128xbf16>
    %19 = vector.extract_strided_slice %13 {offsets = [0, 128], sizes = [16, 128], strides = [1, 1]} : vector<16x256xf32> to vector<16x128xf32>
    %20 = arith.truncf %19 : vector<16x128xf32> to vector<16x128xbf16>
    %c0_15 = arith.constant 0 : index
    %c0_16 = arith.constant 0 : index
    %21 = vector.load %arg12[%c0_15, %c0_16] : memref<16x16xbf16, #tpu.memory_space<vmem>>, vector<16x16xbf16>
    %22 = arith.extf %21 : vector<16x16xbf16> to vector<16x16xf32>
    %23 = vector.extract_strided_slice %16 {offsets = [0, 0], sizes = [16, 64], strides = [1, 1]} : vector<16x128xbf16> to vector<16x64xbf16>
    %24 = vector.extract_strided_slice %18 {offsets = [0, 0], sizes = [16, 64], strides = [1, 1]} : vector<16x128xbf16> to vector<16x64xbf16>
    %cst_17 = arith.constant dense<0.000000e+00> : vector<16x16xf32>
    %25 = tpu.matmul %23, %24, %cst_17 {dimension_numbers = #tpu.dot_dimension_numbers<[1], [1], [0], [0], [0, 0, 1, 0], [], []>} : vector<16x64xbf16>, vector<16x64xbf16>, vector<16x16xf32> -> vector<16x16xf32>
    %26 = arith.addf %25, %22 : vector<16x16xf32>
    %cst_18 = arith.constant dense<0xFF800000> : vector<16xf32>
    %27 = vector.multi_reduction <maximumf>, %26, %cst_18 [1] : vector<16x16xf32> to vector<16xf32>
    %28 = vector.shape_cast %27 : vector<16xf32> to vector<16x1xf32>
    %29 = vector.broadcast %28 : vector<16x1xf32> to vector<16x16xf32>
    %30 = arith.subf %26, %29 : vector<16x16xf32>
    %31 = math.exp %30 : vector<16x16xf32>
    %cst_19 = arith.constant dense<0.000000e+00> : vector<16xf32>
    %32 = vector.multi_reduction <add>, %31, %cst_19 [1] : vector<16x16xf32> to vector<16xf32>
    %33 = vector.shape_cast %32 : vector<16xf32> to vector<16x1xf32>
    %cst_20 = arith.constant 9.99999968E-21 : f32
    %34 = vector.broadcast %cst_20 : f32 to vector<16x1xf32>
    %35 = arith.maximumf %33, %34 : vector<16x1xf32>
    %36 = arith.truncf %31 : vector<16x16xf32> to vector<16x16xbf16>
    %37 = vector.extract_strided_slice %20 {offsets = [0, 0], sizes = [16, 64], strides = [1, 1]} : vector<16x128xbf16> to vector<16x64xbf16>
    %cst_21 = arith.constant dense<0.000000e+00> : vector<16x64xf32>
    %38 = tpu.matmul %36, %37, %cst_21 {dimension_numbers = #tpu.dot_dimension_numbers<[1], [0], [0], [1], [0, 0, 1, 1], [], []>} : vector<16x16xbf16>, vector<16x64xbf16>, vector<16x64xf32> -> vector<16x64xf32>
    %39 = tpu.reciprocal %35 {approx = true} : vector<16x1xf32> -> vector<16x1xf32>
    %40 = vector.broadcast %39 : vector<16x1xf32> to vector<16x64xf32>
    %41 = arith.mulf %38, %40 : vector<16x64xf32>
    %42 = arith.truncf %41 : vector<16x64xf32> to vector<16x64xbf16>
    %c0_22 = arith.constant 0 : index
    %c0_23 = arith.constant 0 : index
    %43 = vector.load %arg14[%c0_22, %c0_23] : memref<16x128xbf16, #tpu.memory_space<vmem>>, vector<16x64xbf16>
    tpu.vector_store %arg14[%c0_22, %c0_23], %42 {strides = array<i32>} : memref<16x128xbf16, #tpu.memory_space<vmem>>, vector<16x64xbf16>,
    %44 = vector.extract_strided_slice %16 {offsets = [0, 64], sizes = [16, 64], strides = [1, 1]} : vector<16x128xbf16> to vector<16x64xbf16>
    %45 = vector.extract_strided_slice %18 {offsets = [0, 64], sizes = [16, 64], strides = [1, 1]} : vector<16x128xbf16> to vector<16x64xbf16>
    %cst_24 = arith.constant dense<0.000000e+00> : vector<16x16xf32>
    %46 = tpu.matmul %44, %45, %cst_24 {dimension_numbers = #tpu.dot_dimension_numbers<[1], [1], [0], [0], [0, 0, 1, 0], [], []>} : vector<16x64xbf16>, vector<16x64xbf16>, vector<16x16xf32> -> vector<16x16xf32>
    %47 = arith.addf %46, %22 : vector<16x16xf32>
    %cst_25 = arith.constant dense<0xFF800000> : vector<16xf32>
    %48 = vector.multi_reduction <maximumf>, %47, %cst_25 [1] : vector<16x16xf32> to vector<16xf32>
    %49 = vector.shape_cast %48 : vector<16xf32> to vector<16x1xf32>
    %50 = vector.broadcast %49 : vector<16x1xf32> to vector<16x16xf32>
    %51 = arith.subf %47, %50 : vector<16x16xf32>
    %52 = math.exp %51 : vector<16x16xf32>
    %cst_26 = arith.constant dense<0.000000e+00> : vector<16xf32>
    %53 = vector.multi_reduction <add>, %52, %cst_26 [1] : vector<16x16xf32> to vector<16xf32>
    %54 = vector.shape_cast %53 : vector<16xf32> to vector<16x1xf32>
    %cst_27 = arith.constant 9.99999968E-21 : f32
    %55 = vector.broadcast %cst_27 : f32 to vector<16x1xf32>
    %56 = arith.maximumf %54, %55 : vector<16x1xf32>
    %57 = arith.truncf %52 : vector<16x16xf32> to vector<16x16xbf16>
    %58 = vector.extract_strided_slice %20 {offsets = [0, 64], sizes = [16, 64], strides = [1, 1]} : vector<16x128xbf16> to vector<16x64xbf16>
    %cst_28 = arith.constant dense<0.000000e+00> : vector<16x64xf32>
    %59 = tpu.matmul %57, %58, %cst_28 {dimension_numbers = #tpu.dot_dimension_numbers<[1], [0], [0], [1], [0, 0, 1, 1], [], []>} : vector<16x16xbf16>, vector<16x64xbf16>, vector<16x64xf32> -> vector<16x64xf32>
    %60 = tpu.reciprocal %56 {approx = true} : vector<16x1xf32> -> vector<16x1xf32>
    %61 = vector.broadcast %60 : vector<16x1xf32> to vector<16x64xf32>
    %62 = arith.mulf %59, %61 : vector<16x64xf32>
    %63 = arith.truncf %62 : vector<16x64xf32> to vector<16x64xbf16>
    %c0_29 = arith.constant 0 : index
    %c64 = arith.constant 64 : index
    %64 = vector.load %arg14[%c0_29, %c64] : memref<16x128xbf16, #tpu.memory_space<vmem>>, vector<16x64xbf16>
    tpu.vector_store %arg14[%c0_29, %c64], %63 {strides = array<i32>} : memref<16x128xbf16, #tpu.memory_space<vmem>>, vector<16x64xbf16>,
    %c0_30 = arith.constant 0 : index
    %c0_31 = arith.constant 0 : index
    %65 = vector.load %arg14[%c0_30, %c0_31] : memref<16x128xbf16, #tpu.memory_space<vmem>>, vector<16x128xbf16>
    %c0_32 = arith.constant 0 : index
    %c0_33 = arith.constant 0 : index
    %66 = vector.load %arg8[%c0_32, %c0_33] : memref<128x128xbf16, #tpu.memory_space<vmem>>, vector<128x128xbf16>
    %cst_34 = arith.constant dense<0.000000e+00> : vector<16x128xf32>
    %67 = tpu.matmul %65, %66, %cst_34 {dimension_numbers = #tpu.dot_dimension_numbers<[1], [0], [0], [1], [0, 0, 1, 1], [], []>} : vector<16x128xbf16>, vector<128x128xbf16>, vector<16x128xf32> -> vector<16x128xf32>
    %c0_35 = arith.constant 0 : index
    %c0_36 = arith.constant 0 : index
    %68 = vector.load %arg9[%c0_35, %c0_36] : memref<1x128xf32, #tpu.memory_space<vmem>>, vector<1x128xf32>
    %69 = vector.broadcast %68 : vector<1x128xf32> to vector<16x128xf32>
    %70 = arith.addf %67, %69 : vector<16x128xf32>
    %71 = arith.extf %1 : vector<16x128xbf16> to vector<16x128xf32>
    %72 = arith.addf %71, %70 : vector<16x128xf32>
    %c0_37 = arith.constant 0 : index
    %c0_38 = arith.constant 0 : index
    %73 = vector.load %arg10[%c0_37, %c0_38] : memref<1x128xf32, #tpu.memory_space<vmem>>, vector<1x128xf32>
    %c0_39 = arith.constant 0 : index
    %c0_40 = arith.constant 0 : index
    %74 = vector.load %arg11[%c0_39, %c0_40] : memref<1x128xf32, #tpu.memory_space<vmem>>, vector<1x128xf32>
    %cst_41 = arith.constant dense<0.000000e+00> : vector<16xf32>
    %75 = vector.multi_reduction <add>, %72, %cst_41 [1] : vector<16x128xf32> to vector<16xf32>
    %76 = vector.shape_cast %75 : vector<16xf32> to vector<16x1xf32>
    %cst_42 = arith.constant 1.280000e+02 : f32
    %77 = vector.broadcast %cst_42 : f32 to vector<16x1xf32>
    %78 = arith.divf %76, %77 : vector<16x1xf32>
    %79 = vector.broadcast %78 : vector<16x1xf32> to vector<16x128xf32>
    %80 = arith.subf %72, %79 : vector<16x128xf32>
    %81 = arith.mulf %80, %80 : vector<16x128xf32>
    %cst_43 = arith.constant dense<0.000000e+00> : vector<16xf32>
    %82 = vector.multi_reduction <add>, %81, %cst_43 [1] : vector<16x128xf32> to vector<16xf32>
    %83 = vector.shape_cast %82 : vector<16xf32> to vector<16x1xf32>
    %cst_44 = arith.constant 1.280000e+02 : f32
    %84 = vector.broadcast %cst_44 : f32 to vector<16x1xf32>
    %85 = arith.divf %83, %84 : vector<16x1xf32>
    %86 = vector.broadcast %78 : vector<16x1xf32> to vector<16x128xf32>
    %87 = arith.subf %72, %86 : vector<16x128xf32>
    %cst_45 = arith.constant 9.99999974E-6 : f32
    %88 = vector.broadcast %cst_45 : f32 to vector<16x1xf32>
    %89 = arith.addf %85, %88 : vector<16x1xf32>
    %90 = math.rsqrt %89 : vector<16x1xf32>
    %91 = vector.broadcast %90 : vector<16x1xf32> to vector<16x128xf32>
    %92 = arith.mulf %87, %91 : vector<16x128xf32>
    %93 = vector.broadcast %73 : vector<1x128xf32> to vector<16x128xf32>
    %94 = arith.mulf %92, %93 : vector<16x128xf32>
    %95 = vector.broadcast %74 : vector<1x128xf32> to vector<16x128xf32>
    %96 = arith.addf %94, %95 : vector<16x128xf32>
    %97 = arith.truncf %96 : vector<16x128xf32> to vector<16x128xbf16>
    %c0_46 = arith.constant 0 : index
    %c0_47 = arith.constant 0 : index
    %c0_48 = arith.constant 0 : index
    %98 = vector.load %arg13[%c0_46, %c0_47, %c0_48] : memref<1x16x128xbf16, #tpu.memory_space<vmem>>, vector<1x16x128xbf16>
    %99 = vector.shape_cast %98 : vector<1x16x128xbf16> to vector<16x128xbf16>
    %100 = vector.shape_cast %97 : vector<16x128xbf16> to vector<1x16x128xbf16>
    tpu.vector_store %arg13[%c0_46, %c0_47, %c0_48], %100 {strides = array<i32>} : memref<1x16x128xbf16, #tpu.memory_space<vmem>>, vector<1x16x128xbf16>,
    return
  }
  func.func @transform_0(%arg0: i32, %arg1: i32) -> (i32, i32, i32) {
    %c0_i32 = arith.constant 0 : i32
    %c0_i32_0 = arith.constant 0 : i32
    return %arg0, %arg1, %c0_i32 : i32, i32, i32
  }
  func.func @transform_1(%arg0: i32, %arg1: i32) -> (i32, i32, i32) {
    %c0_i32 = arith.constant 0 : i32
    %c0_i32_0 = arith.constant 0 : i32
    %c0_i32_1 = arith.constant 0 : i32
    return %arg0, %c0_i32, %c0_i32_0 : i32, i32, i32
  }
  func.func @transform_2(%arg0: i32, %arg1: i32) -> (i32, i32) {
    %c0_i32 = arith.constant 0 : i32
    %c0_i32_0 = arith.constant 0 : i32
    %c0_i32_1 = arith.constant 0 : i32
    return %c0_i32, %c0_i32_0 : i32, i32
  }
  func.func @transform_3(%arg0: i32, %arg1: i32) -> (i32, i32) {
    %c0_i32 = arith.constant 0 : i32
    %c0_i32_0 = arith.constant 0 : i32
    %c0_i32_1 = arith.constant 0 : i32
    return %c0_i32, %c0_i32_0 : i32, i32
  }
  func.func @transform_4(%arg0: i32, %arg1: i32) -> (i32, i32) {
    %c0_i32 = arith.constant 0 : i32
    %c0_i32_0 = arith.constant 0 : i32
    %c0_i32_1 = arith.constant 0 : i32
    return %c0_i32, %c0_i32_0 : i32, i32
  }
  func.func @transform_5(%arg0: i32, %arg1: i32) -> (i32, i32) {
    %c0_i32 = arith.constant 0 : i32
    %c0_i32_0 = arith.constant 0 : i32
    %c0_i32_1 = arith.constant 0 : i32
    return %c0_i32, %c0_i32_0 : i32, i32
  }
  func.func @transform_6(%arg0: i32, %arg1: i32) -> (i32, i32) {
    %c0_i32 = arith.constant 0 : i32
    %c0_i32_0 = arith.constant 0 : i32
    %c0_i32_1 = arith.constant 0 : i32
    return %c0_i32, %c0_i32_0 : i32, i32
  }
  func.func @transform_7(%arg0: i32, %arg1: i32) -> (i32, i32) {
    %c0_i32 = arith.constant 0 : i32
    %c0_i32_0 = arith.constant 0 : i32
    %c0_i32_1 = arith.constant 0 : i32
    return %c0_i32, %c0_i32_0 : i32, i32
  }
  func.func @transform_8(%arg0: i32, %arg1: i32) -> (i32, i32) {
    %c0_i32 = arith.constant 0 : i32
    %c0_i32_0 = arith.constant 0 : i32
    %c0_i32_1 = arith.constant 0 : i32
    return %c0_i32, %c0_i32_0 : i32, i32
  }
  func.func @transform_9(%arg0: i32, %arg1: i32) -> (i32, i32) {
    %c0_i32 = arith.constant 0 : i32
    %c0_i32_0 = arith.constant 0 : i32
    %c0_i32_1 = arith.constant 0 : i32
    return %c0_i32, %c0_i32_0 : i32, i32
  }
  func.func @transform_10(%arg0: i32, %arg1: i32) -> (i32, i32) {
    %c0_i32 = arith.constant 0 : i32
    %c0_i32_0 = arith.constant 0 : i32
    return %arg1, %c0_i32 : i32, i32
  }
  func.func @transform_11(%arg0: i32, %arg1: i32) -> (i32, i32, i32) {
    %c0_i32 = arith.constant 0 : i32
    %c0_i32_0 = arith.constant 0 : i32
    return %arg0, %arg1, %c0_i32 : i32, i32, i32
  }
}

module attributes {stable_mosaic.version = 11 : i64} {
  func.func @_layernorm_kernel(%arg0: i32, %arg1: memref<32x128xbf16, #tpu.memory_space<vmem>>, %arg2: memref<1x128xf32, #tpu.memory_space<vmem>>, %arg3: memref<1x128xf32, #tpu.memory_space<vmem>>, %arg4: memref<32x128xbf16, #tpu.memory_space<vmem>>) attributes {dimension_semantics = [#tpu.dimension_semantics<parallel>], iteration_bounds = array<i64: 1>, scalar_prefetch = 0 : i64, scratch_operands = 0 : i64, tpu.core_type = #tpu.core_type<tc>, window_params = [{transform_indices = @transform_0, window_bounds = array<i64: 32, 128>}, {pipeline_mode = #tpu.pipeline_mode<synchronous>, transform_indices = @transform_1, window_bounds = array<i64: 1, 128>}, {pipeline_mode = #tpu.pipeline_mode<synchronous>, transform_indices = @transform_2, window_bounds = array<i64: 1, 128>}, {transform_indices = @transform_3, window_bounds = array<i64: 32, 128>}]} {
    %c0 = arith.constant 0 : index
    %c0_0 = arith.constant 0 : index
    %0 = vector.load %arg1[%c0, %c0_0] : memref<32x128xbf16, #tpu.memory_space<vmem>>, vector<32x128xbf16>
    %1 = arith.extf %0 : vector<32x128xbf16> to vector<32x128xf32>
    %c0_1 = arith.constant 0 : index
    %c0_2 = arith.constant 0 : index
    %2 = vector.load %arg2[%c0_1, %c0_2] : memref<1x128xf32, #tpu.memory_space<vmem>>, vector<1x128xf32>
    %c0_3 = arith.constant 0 : index
    %c0_4 = arith.constant 0 : index
    %3 = vector.load %arg3[%c0_3, %c0_4] : memref<1x128xf32, #tpu.memory_space<vmem>>, vector<1x128xf32>
    %cst = arith.constant dense<0.000000e+00> : vector<32xf32>
    %4 = vector.multi_reduction <add>, %1, %cst [1] : vector<32x128xf32> to vector<32xf32>
    %5 = vector.shape_cast %4 : vector<32xf32> to vector<32x1xf32>
    %cst_5 = arith.constant 1.280000e+02 : f32
    %6 = vector.broadcast %cst_5 : f32 to vector<32x1xf32>
    %7 = arith.divf %5, %6 : vector<32x1xf32>
    %8 = vector.broadcast %7 : vector<32x1xf32> to vector<32x128xf32>
    %9 = arith.subf %1, %8 : vector<32x128xf32>
    %10 = arith.mulf %9, %9 : vector<32x128xf32>
    %cst_6 = arith.constant dense<0.000000e+00> : vector<32xf32>
    %11 = vector.multi_reduction <add>, %10, %cst_6 [1] : vector<32x128xf32> to vector<32xf32>
    %12 = vector.shape_cast %11 : vector<32xf32> to vector<32x1xf32>
    %cst_7 = arith.constant 1.280000e+02 : f32
    %13 = vector.broadcast %cst_7 : f32 to vector<32x1xf32>
    %14 = arith.divf %12, %13 : vector<32x1xf32>
    %15 = vector.broadcast %7 : vector<32x1xf32> to vector<32x128xf32>
    %16 = arith.subf %1, %15 : vector<32x128xf32>
    %cst_8 = arith.constant 9.99999974E-6 : f32
    %17 = vector.broadcast %cst_8 : f32 to vector<32x1xf32>
    %18 = arith.addf %14, %17 : vector<32x1xf32>
    %19 = math.rsqrt %18 : vector<32x1xf32>
    %20 = vector.broadcast %19 : vector<32x1xf32> to vector<32x128xf32>
    %21 = arith.mulf %16, %20 : vector<32x128xf32>
    %22 = vector.broadcast %2 : vector<1x128xf32> to vector<32x128xf32>
    %23 = arith.mulf %21, %22 : vector<32x128xf32>
    %24 = vector.broadcast %3 : vector<1x128xf32> to vector<32x128xf32>
    %25 = arith.addf %23, %24 : vector<32x128xf32>
    %26 = arith.truncf %25 : vector<32x128xf32> to vector<32x128xbf16>
    %c0_9 = arith.constant 0 : index
    %c0_10 = arith.constant 0 : index
    %27 = vector.load %arg4[%c0_9, %c0_10] : memref<32x128xbf16, #tpu.memory_space<vmem>>, vector<32x128xbf16>
    tpu.vector_store %arg4[%c0_9, %c0_10], %26 {strides = array<i32>} : memref<32x128xbf16, #tpu.memory_space<vmem>>, vector<32x128xbf16>,
    return
  }
  func.func @transform_0(%arg0: i32) -> (i32, i32) {
    %c0_i32 = arith.constant 0 : i32
    %c0_i32_0 = arith.constant 0 : i32
    return %arg0, %c0_i32 : i32, i32
  }
  func.func @transform_1(%arg0: i32) -> (i32, i32) {
    %c0_i32 = arith.constant 0 : i32
    %c0_i32_0 = arith.constant 0 : i32
    %c0_i32_1 = arith.constant 0 : i32
    return %c0_i32, %c0_i32_0 : i32, i32
  }
  func.func @transform_2(%arg0: i32) -> (i32, i32) {
    %c0_i32 = arith.constant 0 : i32
    %c0_i32_0 = arith.constant 0 : i32
    %c0_i32_1 = arith.constant 0 : i32
    return %c0_i32, %c0_i32_0 : i32, i32
  }
  func.func @transform_3(%arg0: i32) -> (i32, i32) {
    %c0_i32 = arith.constant 0 : i32
    %c0_i32_0 = arith.constant 0 : i32
    return %arg0, %c0_i32 : i32, i32
  }
}

module attributes {stable_mosaic.version = 11 : i64} {
  func.func @_ffn_ln_kernel(%arg0: i32, %arg1: memref<32x128xbf16, #tpu.memory_space<vmem>>, %arg2: memref<128x256xbf16, #tpu.memory_space<vmem>>, %arg3: memref<1x256xf32, #tpu.memory_space<vmem>>, %arg4: memref<256x128xbf16, #tpu.memory_space<vmem>>, %arg5: memref<1x128xf32, #tpu.memory_space<vmem>>, %arg6: memref<1x128xf32, #tpu.memory_space<vmem>>, %arg7: memref<1x128xf32, #tpu.memory_space<vmem>>, %arg8: memref<32x128xbf16, #tpu.memory_space<vmem>>) attributes {dimension_semantics = [#tpu.dimension_semantics<parallel>], iteration_bounds = array<i64: 1>, scalar_prefetch = 0 : i64, scratch_operands = 0 : i64, tpu.core_type = #tpu.core_type<tc>, window_params = [{transform_indices = @transform_0, window_bounds = array<i64: 32, 128>}, {pipeline_mode = #tpu.pipeline_mode<synchronous>, transform_indices = @transform_1, window_bounds = array<i64: 128, 256>}, {pipeline_mode = #tpu.pipeline_mode<synchronous>, transform_indices = @transform_2, window_bounds = array<i64: 1, 256>}, {pipeline_mode = #tpu.pipeline_mode<synchronous>, transform_indices = @transform_3, window_bounds = array<i64: 256, 128>}, {pipeline_mode = #tpu.pipeline_mode<synchronous>, transform_indices = @transform_4, window_bounds = array<i64: 1, 128>}, {pipeline_mode = #tpu.pipeline_mode<synchronous>, transform_indices = @transform_5, window_bounds = array<i64: 1, 128>}, {pipeline_mode = #tpu.pipeline_mode<synchronous>, transform_indices = @transform_6, window_bounds = array<i64: 1, 128>}, {transform_indices = @transform_7, window_bounds = array<i64: 32, 128>}]} {
    %c0 = arith.constant 0 : index
    %c0_0 = arith.constant 0 : index
    %0 = vector.load %arg1[%c0, %c0_0] : memref<32x128xbf16, #tpu.memory_space<vmem>>, vector<32x128xbf16>
    %c0_1 = arith.constant 0 : index
    %c0_2 = arith.constant 0 : index
    %1 = vector.load %arg2[%c0_1, %c0_2] : memref<128x256xbf16, #tpu.memory_space<vmem>>, vector<128x256xbf16>
    %cst = arith.constant dense<0.000000e+00> : vector<32x256xf32>
    %2 = tpu.matmul %0, %1, %cst {dimension_numbers = #tpu.dot_dimension_numbers<[1], [0], [0], [1], [0, 0, 1, 1], [], []>} : vector<32x128xbf16>, vector<128x256xbf16>, vector<32x256xf32> -> vector<32x256xf32>
    %c0_3 = arith.constant 0 : index
    %c0_4 = arith.constant 0 : index
    %3 = vector.load %arg3[%c0_3, %c0_4] : memref<1x256xf32, #tpu.memory_space<vmem>>, vector<1x256xf32>
    %4 = vector.broadcast %3 : vector<1x256xf32> to vector<32x256xf32>
    %5 = arith.addf %2, %4 : vector<32x256xf32>
    %cst_5 = arith.constant 0.000000e+00 : f32
    %6 = vector.broadcast %cst_5 : f32 to vector<32x256xf32>
    %7 = arith.maximumf %5, %6 : vector<32x256xf32>
    %8 = arith.extf %0 : vector<32x128xbf16> to vector<32x128xf32>
    %9 = arith.truncf %7 : vector<32x256xf32> to vector<32x256xbf16>
    %c0_6 = arith.constant 0 : index
    %c0_7 = arith.constant 0 : index
    %10 = vector.load %arg4[%c0_6, %c0_7] : memref<256x128xbf16, #tpu.memory_space<vmem>>, vector<256x128xbf16>
    %cst_8 = arith.constant dense<0.000000e+00> : vector<32x128xf32>
    %11 = tpu.matmul %9, %10, %cst_8 {dimension_numbers = #tpu.dot_dimension_numbers<[1], [0], [0], [1], [0, 0, 1, 1], [], []>} : vector<32x256xbf16>, vector<256x128xbf16>, vector<32x128xf32> -> vector<32x128xf32>
    %12 = arith.addf %8, %11 : vector<32x128xf32>
    %c0_9 = arith.constant 0 : index
    %c0_10 = arith.constant 0 : index
    %13 = vector.load %arg5[%c0_9, %c0_10] : memref<1x128xf32, #tpu.memory_space<vmem>>, vector<1x128xf32>
    %14 = vector.broadcast %13 : vector<1x128xf32> to vector<32x128xf32>
    %15 = arith.addf %12, %14 : vector<32x128xf32>
    %c0_11 = arith.constant 0 : index
    %c0_12 = arith.constant 0 : index
    %16 = vector.load %arg6[%c0_11, %c0_12] : memref<1x128xf32, #tpu.memory_space<vmem>>, vector<1x128xf32>
    %c0_13 = arith.constant 0 : index
    %c0_14 = arith.constant 0 : index
    %17 = vector.load %arg7[%c0_13, %c0_14] : memref<1x128xf32, #tpu.memory_space<vmem>>, vector<1x128xf32>
    %cst_15 = arith.constant dense<0.000000e+00> : vector<32xf32>
    %18 = vector.multi_reduction <add>, %15, %cst_15 [1] : vector<32x128xf32> to vector<32xf32>
    %19 = vector.shape_cast %18 : vector<32xf32> to vector<32x1xf32>
    %cst_16 = arith.constant 1.280000e+02 : f32
    %20 = vector.broadcast %cst_16 : f32 to vector<32x1xf32>
    %21 = arith.divf %19, %20 : vector<32x1xf32>
    %22 = vector.broadcast %21 : vector<32x1xf32> to vector<32x128xf32>
    %23 = arith.subf %15, %22 : vector<32x128xf32>
    %24 = arith.mulf %23, %23 : vector<32x128xf32>
    %cst_17 = arith.constant dense<0.000000e+00> : vector<32xf32>
    %25 = vector.multi_reduction <add>, %24, %cst_17 [1] : vector<32x128xf32> to vector<32xf32>
    %26 = vector.shape_cast %25 : vector<32xf32> to vector<32x1xf32>
    %cst_18 = arith.constant 1.280000e+02 : f32
    %27 = vector.broadcast %cst_18 : f32 to vector<32x1xf32>
    %28 = arith.divf %26, %27 : vector<32x1xf32>
    %29 = vector.broadcast %21 : vector<32x1xf32> to vector<32x128xf32>
    %30 = arith.subf %15, %29 : vector<32x128xf32>
    %cst_19 = arith.constant 9.99999974E-6 : f32
    %31 = vector.broadcast %cst_19 : f32 to vector<32x1xf32>
    %32 = arith.addf %28, %31 : vector<32x1xf32>
    %33 = math.rsqrt %32 : vector<32x1xf32>
    %34 = vector.broadcast %33 : vector<32x1xf32> to vector<32x128xf32>
    %35 = arith.mulf %30, %34 : vector<32x128xf32>
    %36 = vector.broadcast %16 : vector<1x128xf32> to vector<32x128xf32>
    %37 = arith.mulf %35, %36 : vector<32x128xf32>
    %38 = vector.broadcast %17 : vector<1x128xf32> to vector<32x128xf32>
    %39 = arith.addf %37, %38 : vector<32x128xf32>
    %40 = arith.truncf %39 : vector<32x128xf32> to vector<32x128xbf16>
    %c0_20 = arith.constant 0 : index
    %c0_21 = arith.constant 0 : index
    %41 = vector.load %arg8[%c0_20, %c0_21] : memref<32x128xbf16, #tpu.memory_space<vmem>>, vector<32x128xbf16>
    tpu.vector_store %arg8[%c0_20, %c0_21], %40 {strides = array<i32>} : memref<32x128xbf16, #tpu.memory_space<vmem>>, vector<32x128xbf16>,
    return
  }
  func.func @transform_0(%arg0: i32) -> (i32, i32) {
    %c0_i32 = arith.constant 0 : i32
    %c0_i32_0 = arith.constant 0 : i32
    return %arg0, %c0_i32 : i32, i32
  }
  func.func @transform_1(%arg0: i32) -> (i32, i32) {
    %c0_i32 = arith.constant 0 : i32
    %c0_i32_0 = arith.constant 0 : i32
    %c0_i32_1 = arith.constant 0 : i32
    return %c0_i32, %c0_i32_0 : i32, i32
  }
  func.func @transform_2(%arg0: i32) -> (i32, i32) {
    %c0_i32 = arith.constant 0 : i32
    %c0_i32_0 = arith.constant 0 : i32
    %c0_i32_1 = arith.constant 0 : i32
    return %c0_i32, %c0_i32_0 : i32, i32
  }
  func.func @transform_3(%arg0: i32) -> (i32, i32) {
    %c0_i32 = arith.constant 0 : i32
    %c0_i32_0 = arith.constant 0 : i32
    %c0_i32_1 = arith.constant 0 : i32
    return %c0_i32, %c0_i32_0 : i32, i32
  }
  func.func @transform_4(%arg0: i32) -> (i32, i32) {
    %c0_i32 = arith.constant 0 : i32
    %c0_i32_0 = arith.constant 0 : i32
    %c0_i32_1 = arith.constant 0 : i32
    return %c0_i32, %c0_i32_0 : i32, i32
  }
  func.func @transform_5(%arg0: i32) -> (i32, i32) {
    %c0_i32 = arith.constant 0 : i32
    %c0_i32_0 = arith.constant 0 : i32
    %c0_i32_1 = arith.constant 0 : i32
    return %c0_i32, %c0_i32_0 : i32, i32
  }
  func.func @transform_6(%arg0: i32) -> (i32, i32) {
    %c0_i32 = arith.constant 0 : i32
    %c0_i32_0 = arith.constant 0 : i32
    %c0_i32_1 = arith.constant 0 : i32
    return %c0_i32, %c0_i32_0 : i32, i32
  }
  func.func @transform_7(%arg0: i32) -> (i32, i32) {
    %c0_i32 = arith.constant 0 : i32
    %c0_i32_0 = arith.constant 0 : i32
    return %arg0, %c0_i32 : i32, i32
  }
}

module attributes {stable_mosaic.version = 11 : i64} {
  func.func @_encode_pe_kernel(%arg0: i32, %arg1: memref<1x16x5xf32, #tpu.memory_space<vmem>>, %arg2: memref<5x128xbf16, #tpu.memory_space<vmem>>, %arg3: memref<1x128xf32, #tpu.memory_space<vmem>>, %arg4: memref<16x128xf32, #tpu.memory_space<vmem>>, %arg5: memref<1x16x128xbf16, #tpu.memory_space<vmem>>) attributes {dimension_semantics = [#tpu.dimension_semantics<parallel>], iteration_bounds = array<i64: 2>, scalar_prefetch = 0 : i64, scratch_operands = 0 : i64, tpu.core_type = #tpu.core_type<tc>, window_params = [{transform_indices = @transform_0, window_bounds = array<i64: 1, 16, 5>}, {pipeline_mode = #tpu.pipeline_mode<synchronous>, transform_indices = @transform_1, window_bounds = array<i64: 5, 128>}, {pipeline_mode = #tpu.pipeline_mode<synchronous>, transform_indices = @transform_2, window_bounds = array<i64: 1, 128>}, {pipeline_mode = #tpu.pipeline_mode<synchronous>, transform_indices = @transform_3, window_bounds = array<i64: 16, 128>}, {transform_indices = @transform_4, window_bounds = array<i64: 1, 16, 128>}]} {
    %c0 = arith.constant 0 : index
    %c0_0 = arith.constant 0 : index
    %c0_1 = arith.constant 0 : index
    %0 = vector.load %arg1[%c0, %c0_0, %c0_1] : memref<1x16x5xf32, #tpu.memory_space<vmem>>, vector<1x16x5xf32>
    %1 = vector.shape_cast %0 : vector<1x16x5xf32> to vector<16x5xf32>
    %2 = arith.truncf %1 : vector<16x5xf32> to vector<16x5xbf16>
    %c0_2 = arith.constant 0 : index
    %c0_3 = arith.constant 0 : index
    %3 = vector.load %arg2[%c0_2, %c0_3] : memref<5x128xbf16, #tpu.memory_space<vmem>>, vector<5x128xbf16>
    %cst = arith.constant dense<0.000000e+00> : vector<16x128xf32>
    %4 = tpu.matmul %2, %3, %cst {dimension_numbers = #tpu.dot_dimension_numbers<[1], [0], [0], [1], [0, 0, 1, 1], [], []>} : vector<16x5xbf16>, vector<5x128xbf16>, vector<16x128xf32> -> vector<16x128xf32>
    %c0_4 = arith.constant 0 : index
    %c0_5 = arith.constant 0 : index
    %5 = vector.load %arg3[%c0_4, %c0_5] : memref<1x128xf32, #tpu.memory_space<vmem>>, vector<1x128xf32>
    %6 = vector.broadcast %5 : vector<1x128xf32> to vector<16x128xf32>
    %7 = arith.addf %4, %6 : vector<16x128xf32>
    %c0_6 = arith.constant 0 : index
    %c0_7 = arith.constant 0 : index
    %8 = vector.load %arg4[%c0_6, %c0_7] : memref<16x128xf32, #tpu.memory_space<vmem>>, vector<16x128xf32>
    %9 = arith.addf %7, %8 : vector<16x128xf32>
    %10 = arith.truncf %9 : vector<16x128xf32> to vector<16x128xbf16>
    %c0_8 = arith.constant 0 : index
    %c0_9 = arith.constant 0 : index
    %c0_10 = arith.constant 0 : index
    %11 = vector.load %arg5[%c0_8, %c0_9, %c0_10] : memref<1x16x128xbf16, #tpu.memory_space<vmem>>, vector<1x16x128xbf16>
    %12 = vector.shape_cast %11 : vector<1x16x128xbf16> to vector<16x128xbf16>
    %13 = vector.shape_cast %10 : vector<16x128xbf16> to vector<1x16x128xbf16>
    tpu.vector_store %arg5[%c0_8, %c0_9, %c0_10], %13 {strides = array<i32>} : memref<1x16x128xbf16, #tpu.memory_space<vmem>>, vector<1x16x128xbf16>,
    return
  }
  func.func @transform_0(%arg0: i32) -> (i32, i32, i32) {
    %c0_i32 = arith.constant 0 : i32
    %c0_i32_0 = arith.constant 0 : i32
    %c0_i32_1 = arith.constant 0 : i32
    return %arg0, %c0_i32, %c0_i32_0 : i32, i32, i32
  }
  func.func @transform_1(%arg0: i32) -> (i32, i32) {
    %c0_i32 = arith.constant 0 : i32
    %c0_i32_0 = arith.constant 0 : i32
    %c0_i32_1 = arith.constant 0 : i32
    return %c0_i32, %c0_i32_0 : i32, i32
  }
  func.func @transform_2(%arg0: i32) -> (i32, i32) {
    %c0_i32 = arith.constant 0 : i32
    %c0_i32_0 = arith.constant 0 : i32
    %c0_i32_1 = arith.constant 0 : i32
    return %c0_i32, %c0_i32_0 : i32, i32
  }
  func.func @transform_3(%arg0: i32) -> (i32, i32) {
    %c0_i32 = arith.constant 0 : i32
    %c0_i32_0 = arith.constant 0 : i32
    %c0_i32_1 = arith.constant 0 : i32
    return %c0_i32, %c0_i32_0 : i32, i32
  }
  func.func @transform_4(%arg0: i32) -> (i32, i32, i32) {
    %c0_i32 = arith.constant 0 : i32
    %c0_i32_0 = arith.constant 0 : i32
    %c0_i32_1 = arith.constant 0 : i32
    return %arg0, %c0_i32, %c0_i32_0 : i32, i32, i32
  }
}

module attributes {stable_mosaic.version = 11 : i64} {
  func.func @_attn_ln_kernel(%arg0: i32, %arg1: i32, %arg2: memref<1x16x128xbf16, #tpu.memory_space<vmem>>, %arg3: memref<1x16x128xbf16, #tpu.memory_space<vmem>>, %arg4: memref<128x128xbf16, #tpu.memory_space<vmem>>, %arg5: memref<1x128xf32, #tpu.memory_space<vmem>>, %arg6: memref<128x256xbf16, #tpu.memory_space<vmem>>, %arg7: memref<1x256xf32, #tpu.memory_space<vmem>>, %arg8: memref<128x128xbf16, #tpu.memory_space<vmem>>, %arg9: memref<1x128xf32, #tpu.memory_space<vmem>>, %arg10: memref<1x128xf32, #tpu.memory_space<vmem>>, %arg11: memref<1x128xf32, #tpu.memory_space<vmem>>, %arg12: memref<1x16x128xbf16, #tpu.memory_space<vmem>>, %arg13: memref<16x128xbf16, #tpu.memory_space<vmem>>) attributes {dimension_semantics = [#tpu.dimension_semantics<parallel>, #tpu.dimension_semantics<parallel>], iteration_bounds = array<i64: 2, 1>, scalar_prefetch = 0 : i64, scratch_operands = 1 : i64, tpu.core_type = #tpu.core_type<tc>, window_params = [{transform_indices = @transform_0, window_bounds = array<i64: 1, 16, 128>}, {transform_indices = @transform_1, window_bounds = array<i64: 1, 16, 128>}, {pipeline_mode = #tpu.pipeline_mode<synchronous>, transform_indices = @transform_2, window_bounds = array<i64: 128, 128>}, {pipeline_mode = #tpu.pipeline_mode<synchronous>, transform_indices = @transform_3, window_bounds = array<i64: 1, 128>}, {pipeline_mode = #tpu.pipeline_mode<synchronous>, transform_indices = @transform_4, window_bounds = array<i64: 128, 256>}, {pipeline_mode = #tpu.pipeline_mode<synchronous>, transform_indices = @transform_5, window_bounds = array<i64: 1, 256>}, {pipeline_mode = #tpu.pipeline_mode<synchronous>, transform_indices = @transform_6, window_bounds = array<i64: 128, 128>}, {pipeline_mode = #tpu.pipeline_mode<synchronous>, transform_indices = @transform_7, window_bounds = array<i64: 1, 128>}, {pipeline_mode = #tpu.pipeline_mode<synchronous>, transform_indices = @transform_8, window_bounds = array<i64: 1, 128>}, {pipeline_mode = #tpu.pipeline_mode<synchronous>, transform_indices = @transform_9, window_bounds = array<i64: 1, 128>}, {transform_indices = @transform_10, window_bounds = array<i64: 1, 16, 128>}]} {
    %c0 = arith.constant 0 : index
    %c0_0 = arith.constant 0 : index
    %c0_1 = arith.constant 0 : index
    %0 = vector.load %arg2[%c0, %c0_0, %c0_1] : memref<1x16x128xbf16, #tpu.memory_space<vmem>>, vector<1x16x128xbf16>
    %1 = vector.shape_cast %0 : vector<1x16x128xbf16> to vector<16x128xbf16>
    %c0_2 = arith.constant 0 : index
    %c0_3 = arith.constant 0 : index
    %c0_4 = arith.constant 0 : index
    %2 = vector.load %arg3[%c0_2, %c0_3, %c0_4] : memref<1x16x128xbf16, #tpu.memory_space<vmem>>, vector<1x16x128xbf16>
    %3 = vector.shape_cast %2 : vector<1x16x128xbf16> to vector<16x128xbf16>
    %c0_5 = arith.constant 0 : index
    %c0_6 = arith.constant 0 : index
    %4 = vector.load %arg4[%c0_5, %c0_6] : memref<128x128xbf16, #tpu.memory_space<vmem>>, vector<128x128xbf16>
    %cst = arith.constant dense<0.000000e+00> : vector<16x128xf32>
    %5 = tpu.matmul %1, %4, %cst {dimension_numbers = #tpu.dot_dimension_numbers<[1], [0], [0], [1], [0, 0, 1, 1], [], []>} : vector<16x128xbf16>, vector<128x128xbf16>, vector<16x128xf32> -> vector<16x128xf32>
    %c0_7 = arith.constant 0 : index
    %c0_8 = arith.constant 0 : index
    %6 = vector.load %arg5[%c0_7, %c0_8] : memref<1x128xf32, #tpu.memory_space<vmem>>, vector<1x128xf32>
    %7 = vector.broadcast %6 : vector<1x128xf32> to vector<16x128xf32>
    %8 = arith.addf %5, %7 : vector<16x128xf32>
    %c0_9 = arith.constant 0 : index
    %c0_10 = arith.constant 0 : index
    %9 = vector.load %arg6[%c0_9, %c0_10] : memref<128x256xbf16, #tpu.memory_space<vmem>>, vector<128x256xbf16>
    %cst_11 = arith.constant dense<0.000000e+00> : vector<16x256xf32>
    %10 = tpu.matmul %3, %9, %cst_11 {dimension_numbers = #tpu.dot_dimension_numbers<[1], [0], [0], [1], [0, 0, 1, 1], [], []>} : vector<16x128xbf16>, vector<128x256xbf16>, vector<16x256xf32> -> vector<16x256xf32>
    %c0_12 = arith.constant 0 : index
    %c0_13 = arith.constant 0 : index
    %11 = vector.load %arg7[%c0_12, %c0_13] : memref<1x256xf32, #tpu.memory_space<vmem>>, vector<1x256xf32>
    %12 = vector.broadcast %11 : vector<1x256xf32> to vector<16x256xf32>
    %13 = arith.addf %10, %12 : vector<16x256xf32>
    %cst_14 = arith.constant 1.250000e-01 : f32
    %14 = vector.broadcast %cst_14 : f32 to vector<16x128xf32>
    %15 = arith.mulf %8, %14 : vector<16x128xf32>
    %16 = arith.truncf %15 : vector<16x128xf32> to vector<16x128xbf16>
    %17 = vector.extract_strided_slice %13 {offsets = [0, 0], sizes = [16, 128], strides = [1, 1]} : vector<16x256xf32> to vector<16x128xf32>
    %18 = arith.truncf %17 : vector<16x128xf32> to vector<16x128xbf16>
    %19 = vector.extract_strided_slice %13 {offsets = [0, 128], sizes = [16, 128], strides = [1, 1]} : vector<16x256xf32> to vector<16x128xf32>
    %20 = arith.truncf %19 : vector<16x128xf32> to vector<16x128xbf16>
    %21 = vector.extract_strided_slice %16 {offsets = [0, 0], sizes = [16, 64], strides = [1, 1]} : vector<16x128xbf16> to vector<16x64xbf16>
    %22 = vector.extract_strided_slice %18 {offsets = [0, 0], sizes = [16, 64], strides = [1, 1]} : vector<16x128xbf16> to vector<16x64xbf16>
    %cst_15 = arith.constant dense<0.000000e+00> : vector<16x16xf32>
    %23 = tpu.matmul %21, %22, %cst_15 {dimension_numbers = #tpu.dot_dimension_numbers<[1], [1], [0], [0], [0, 0, 1, 0], [], []>} : vector<16x64xbf16>, vector<16x64xbf16>, vector<16x16xf32> -> vector<16x16xf32>
    %cst_16 = arith.constant dense<0xFF800000> : vector<16xf32>
    %24 = vector.multi_reduction <maximumf>, %23, %cst_16 [1] : vector<16x16xf32> to vector<16xf32>
    %25 = vector.shape_cast %24 : vector<16xf32> to vector<16x1xf32>
    %26 = vector.broadcast %25 : vector<16x1xf32> to vector<16x16xf32>
    %27 = arith.subf %23, %26 : vector<16x16xf32>
    %28 = math.exp %27 : vector<16x16xf32>
    %cst_17 = arith.constant dense<0.000000e+00> : vector<16xf32>
    %29 = vector.multi_reduction <add>, %28, %cst_17 [1] : vector<16x16xf32> to vector<16xf32>
    %30 = vector.shape_cast %29 : vector<16xf32> to vector<16x1xf32>
    %cst_18 = arith.constant 9.99999968E-21 : f32
    %31 = vector.broadcast %cst_18 : f32 to vector<16x1xf32>
    %32 = arith.maximumf %30, %31 : vector<16x1xf32>
    %33 = arith.truncf %28 : vector<16x16xf32> to vector<16x16xbf16>
    %34 = vector.extract_strided_slice %20 {offsets = [0, 0], sizes = [16, 64], strides = [1, 1]} : vector<16x128xbf16> to vector<16x64xbf16>
    %cst_19 = arith.constant dense<0.000000e+00> : vector<16x64xf32>
    %35 = tpu.matmul %33, %34, %cst_19 {dimension_numbers = #tpu.dot_dimension_numbers<[1], [0], [0], [1], [0, 0, 1, 1], [], []>} : vector<16x16xbf16>, vector<16x64xbf16>, vector<16x64xf32> -> vector<16x64xf32>
    %36 = tpu.reciprocal %32 {approx = true} : vector<16x1xf32> -> vector<16x1xf32>
    %37 = vector.broadcast %36 : vector<16x1xf32> to vector<16x64xf32>
    %38 = arith.mulf %35, %37 : vector<16x64xf32>
    %39 = arith.truncf %38 : vector<16x64xf32> to vector<16x64xbf16>
    %c0_20 = arith.constant 0 : index
    %c0_21 = arith.constant 0 : index
    %40 = vector.load %arg13[%c0_20, %c0_21] : memref<16x128xbf16, #tpu.memory_space<vmem>>, vector<16x64xbf16>
    tpu.vector_store %arg13[%c0_20, %c0_21], %39 {strides = array<i32>} : memref<16x128xbf16, #tpu.memory_space<vmem>>, vector<16x64xbf16>,
    %41 = vector.extract_strided_slice %16 {offsets = [0, 64], sizes = [16, 64], strides = [1, 1]} : vector<16x128xbf16> to vector<16x64xbf16>
    %42 = vector.extract_strided_slice %18 {offsets = [0, 64], sizes = [16, 64], strides = [1, 1]} : vector<16x128xbf16> to vector<16x64xbf16>
    %cst_22 = arith.constant dense<0.000000e+00> : vector<16x16xf32>
    %43 = tpu.matmul %41, %42, %cst_22 {dimension_numbers = #tpu.dot_dimension_numbers<[1], [1], [0], [0], [0, 0, 1, 0], [], []>} : vector<16x64xbf16>, vector<16x64xbf16>, vector<16x16xf32> -> vector<16x16xf32>
    %cst_23 = arith.constant dense<0xFF800000> : vector<16xf32>
    %44 = vector.multi_reduction <maximumf>, %43, %cst_23 [1] : vector<16x16xf32> to vector<16xf32>
    %45 = vector.shape_cast %44 : vector<16xf32> to vector<16x1xf32>
    %46 = vector.broadcast %45 : vector<16x1xf32> to vector<16x16xf32>
    %47 = arith.subf %43, %46 : vector<16x16xf32>
    %48 = math.exp %47 : vector<16x16xf32>
    %cst_24 = arith.constant dense<0.000000e+00> : vector<16xf32>
    %49 = vector.multi_reduction <add>, %48, %cst_24 [1] : vector<16x16xf32> to vector<16xf32>
    %50 = vector.shape_cast %49 : vector<16xf32> to vector<16x1xf32>
    %cst_25 = arith.constant 9.99999968E-21 : f32
    %51 = vector.broadcast %cst_25 : f32 to vector<16x1xf32>
    %52 = arith.maximumf %50, %51 : vector<16x1xf32>
    %53 = arith.truncf %48 : vector<16x16xf32> to vector<16x16xbf16>
    %54 = vector.extract_strided_slice %20 {offsets = [0, 64], sizes = [16, 64], strides = [1, 1]} : vector<16x128xbf16> to vector<16x64xbf16>
    %cst_26 = arith.constant dense<0.000000e+00> : vector<16x64xf32>
    %55 = tpu.matmul %53, %54, %cst_26 {dimension_numbers = #tpu.dot_dimension_numbers<[1], [0], [0], [1], [0, 0, 1, 1], [], []>} : vector<16x16xbf16>, vector<16x64xbf16>, vector<16x64xf32> -> vector<16x64xf32>
    %56 = tpu.reciprocal %52 {approx = true} : vector<16x1xf32> -> vector<16x1xf32>
    %57 = vector.broadcast %56 : vector<16x1xf32> to vector<16x64xf32>
    %58 = arith.mulf %55, %57 : vector<16x64xf32>
    %59 = arith.truncf %58 : vector<16x64xf32> to vector<16x64xbf16>
    %c0_27 = arith.constant 0 : index
    %c64 = arith.constant 64 : index
    %60 = vector.load %arg13[%c0_27, %c64] : memref<16x128xbf16, #tpu.memory_space<vmem>>, vector<16x64xbf16>
    tpu.vector_store %arg13[%c0_27, %c64], %59 {strides = array<i32>} : memref<16x128xbf16, #tpu.memory_space<vmem>>, vector<16x64xbf16>,
    %c0_28 = arith.constant 0 : index
    %c0_29 = arith.constant 0 : index
    %61 = vector.load %arg13[%c0_28, %c0_29] : memref<16x128xbf16, #tpu.memory_space<vmem>>, vector<16x128xbf16>
    %c0_30 = arith.constant 0 : index
    %c0_31 = arith.constant 0 : index
    %62 = vector.load %arg8[%c0_30, %c0_31] : memref<128x128xbf16, #tpu.memory_space<vmem>>, vector<128x128xbf16>
    %cst_32 = arith.constant dense<0.000000e+00> : vector<16x128xf32>
    %63 = tpu.matmul %61, %62, %cst_32 {dimension_numbers = #tpu.dot_dimension_numbers<[1], [0], [0], [1], [0, 0, 1, 1], [], []>} : vector<16x128xbf16>, vector<128x128xbf16>, vector<16x128xf32> -> vector<16x128xf32>
    %c0_33 = arith.constant 0 : index
    %c0_34 = arith.constant 0 : index
    %64 = vector.load %arg9[%c0_33, %c0_34] : memref<1x128xf32, #tpu.memory_space<vmem>>, vector<1x128xf32>
    %65 = vector.broadcast %64 : vector<1x128xf32> to vector<16x128xf32>
    %66 = arith.addf %63, %65 : vector<16x128xf32>
    %67 = arith.extf %1 : vector<16x128xbf16> to vector<16x128xf32>
    %68 = arith.addf %67, %66 : vector<16x128xf32>
    %c0_35 = arith.constant 0 : index
    %c0_36 = arith.constant 0 : index
    %69 = vector.load %arg10[%c0_35, %c0_36] : memref<1x128xf32, #tpu.memory_space<vmem>>, vector<1x128xf32>
    %c0_37 = arith.constant 0 : index
    %c0_38 = arith.constant 0 : index
    %70 = vector.load %arg11[%c0_37, %c0_38] : memref<1x128xf32, #tpu.memory_space<vmem>>, vector<1x128xf32>
    %cst_39 = arith.constant dense<0.000000e+00> : vector<16xf32>
    %71 = vector.multi_reduction <add>, %68, %cst_39 [1] : vector<16x128xf32> to vector<16xf32>
    %72 = vector.shape_cast %71 : vector<16xf32> to vector<16x1xf32>
    %cst_40 = arith.constant 1.280000e+02 : f32
    %73 = vector.broadcast %cst_40 : f32 to vector<16x1xf32>
    %74 = arith.divf %72, %73 : vector<16x1xf32>
    %75 = vector.broadcast %74 : vector<16x1xf32> to vector<16x128xf32>
    %76 = arith.subf %68, %75 : vector<16x128xf32>
    %77 = arith.mulf %76, %76 : vector<16x128xf32>
    %cst_41 = arith.constant dense<0.000000e+00> : vector<16xf32>
    %78 = vector.multi_reduction <add>, %77, %cst_41 [1] : vector<16x128xf32> to vector<16xf32>
    %79 = vector.shape_cast %78 : vector<16xf32> to vector<16x1xf32>
    %cst_42 = arith.constant 1.280000e+02 : f32
    %80 = vector.broadcast %cst_42 : f32 to vector<16x1xf32>
    %81 = arith.divf %79, %80 : vector<16x1xf32>
    %82 = vector.broadcast %74 : vector<16x1xf32> to vector<16x128xf32>
    %83 = arith.subf %68, %82 : vector<16x128xf32>
    %cst_43 = arith.constant 9.99999974E-6 : f32
    %84 = vector.broadcast %cst_43 : f32 to vector<16x1xf32>
    %85 = arith.addf %81, %84 : vector<16x1xf32>
    %86 = math.rsqrt %85 : vector<16x1xf32>
    %87 = vector.broadcast %86 : vector<16x1xf32> to vector<16x128xf32>
    %88 = arith.mulf %83, %87 : vector<16x128xf32>
    %89 = vector.broadcast %69 : vector<1x128xf32> to vector<16x128xf32>
    %90 = arith.mulf %88, %89 : vector<16x128xf32>
    %91 = vector.broadcast %70 : vector<1x128xf32> to vector<16x128xf32>
    %92 = arith.addf %90, %91 : vector<16x128xf32>
    %93 = arith.truncf %92 : vector<16x128xf32> to vector<16x128xbf16>
    %c0_44 = arith.constant 0 : index
    %c0_45 = arith.constant 0 : index
    %c0_46 = arith.constant 0 : index
    %94 = vector.load %arg12[%c0_44, %c0_45, %c0_46] : memref<1x16x128xbf16, #tpu.memory_space<vmem>>, vector<1x16x128xbf16>
    %95 = vector.shape_cast %94 : vector<1x16x128xbf16> to vector<16x128xbf16>
    %96 = vector.shape_cast %93 : vector<16x128xbf16> to vector<1x16x128xbf16>
    tpu.vector_store %arg12[%c0_44, %c0_45, %c0_46], %96 {strides = array<i32>} : memref<1x16x128xbf16, #tpu.memory_space<vmem>>, vector<1x16x128xbf16>,
    return
  }
  func.func @transform_0(%arg0: i32, %arg1: i32) -> (i32, i32, i32) {
    %c0_i32 = arith.constant 0 : i32
    %c0_i32_0 = arith.constant 0 : i32
    return %arg0, %arg1, %c0_i32 : i32, i32, i32
  }
  func.func @transform_1(%arg0: i32, %arg1: i32) -> (i32, i32, i32) {
    %c0_i32 = arith.constant 0 : i32
    %c0_i32_0 = arith.constant 0 : i32
    %c0_i32_1 = arith.constant 0 : i32
    return %arg0, %c0_i32, %c0_i32_0 : i32, i32, i32
  }
  func.func @transform_2(%arg0: i32, %arg1: i32) -> (i32, i32) {
    %c0_i32 = arith.constant 0 : i32
    %c0_i32_0 = arith.constant 0 : i32
    %c0_i32_1 = arith.constant 0 : i32
    return %c0_i32, %c0_i32_0 : i32, i32
  }
  func.func @transform_3(%arg0: i32, %arg1: i32) -> (i32, i32) {
    %c0_i32 = arith.constant 0 : i32
    %c0_i32_0 = arith.constant 0 : i32
    %c0_i32_1 = arith.constant 0 : i32
    return %c0_i32, %c0_i32_0 : i32, i32
  }
  func.func @transform_4(%arg0: i32, %arg1: i32) -> (i32, i32) {
    %c0_i32 = arith.constant 0 : i32
    %c0_i32_0 = arith.constant 0 : i32
    %c0_i32_1 = arith.constant 0 : i32
    return %c0_i32, %c0_i32_0 : i32, i32
  }
  func.func @transform_5(%arg0: i32, %arg1: i32) -> (i32, i32) {
    %c0_i32 = arith.constant 0 : i32
    %c0_i32_0 = arith.constant 0 : i32
    %c0_i32_1 = arith.constant 0 : i32
    return %c0_i32, %c0_i32_0 : i32, i32
  }
  func.func @transform_6(%arg0: i32, %arg1: i32) -> (i32, i32) {
    %c0_i32 = arith.constant 0 : i32
    %c0_i32_0 = arith.constant 0 : i32
    %c0_i32_1 = arith.constant 0 : i32
    return %c0_i32, %c0_i32_0 : i32, i32
  }
  func.func @transform_7(%arg0: i32, %arg1: i32) -> (i32, i32) {
    %c0_i32 = arith.constant 0 : i32
    %c0_i32_0 = arith.constant 0 : i32
    %c0_i32_1 = arith.constant 0 : i32
    return %c0_i32, %c0_i32_0 : i32, i32
  }
  func.func @transform_8(%arg0: i32, %arg1: i32) -> (i32, i32) {
    %c0_i32 = arith.constant 0 : i32
    %c0_i32_0 = arith.constant 0 : i32
    %c0_i32_1 = arith.constant 0 : i32
    return %c0_i32, %c0_i32_0 : i32, i32
  }
  func.func @transform_9(%arg0: i32, %arg1: i32) -> (i32, i32) {
    %c0_i32 = arith.constant 0 : i32
    %c0_i32_0 = arith.constant 0 : i32
    %c0_i32_1 = arith.constant 0 : i32
    return %c0_i32, %c0_i32_0 : i32, i32
  }
  func.func @transform_10(%arg0: i32, %arg1: i32) -> (i32, i32, i32) {
    %c0_i32 = arith.constant 0 : i32
    %c0_i32_0 = arith.constant 0 : i32
    return %arg0, %arg1, %c0_i32 : i32, i32, i32
  }
}

module attributes {stable_mosaic.version = 11 : i64} {
  func.func @_head_mlp_kernel(%arg0: i32, %arg1: memref<32x128xbf16, #tpu.memory_space<vmem>>, %arg2: memref<128x256xbf16, #tpu.memory_space<vmem>>, %arg3: memref<1x256xf32, #tpu.memory_space<vmem>>, %arg4: memref<256x128xbf16, #tpu.memory_space<vmem>>, %arg5: memref<1x128xf32, #tpu.memory_space<vmem>>, %arg6: memref<32x128xf32, #tpu.memory_space<vmem>>) attributes {dimension_semantics = [#tpu.dimension_semantics<parallel>], iteration_bounds = array<i64: 1>, scalar_prefetch = 0 : i64, scratch_operands = 0 : i64, tpu.core_type = #tpu.core_type<tc>, window_params = [{transform_indices = @transform_0, window_bounds = array<i64: 32, 128>}, {pipeline_mode = #tpu.pipeline_mode<synchronous>, transform_indices = @transform_1, window_bounds = array<i64: 128, 256>}, {pipeline_mode = #tpu.pipeline_mode<synchronous>, transform_indices = @transform_2, window_bounds = array<i64: 1, 256>}, {pipeline_mode = #tpu.pipeline_mode<synchronous>, transform_indices = @transform_3, window_bounds = array<i64: 256, 128>}, {pipeline_mode = #tpu.pipeline_mode<synchronous>, transform_indices = @transform_4, window_bounds = array<i64: 1, 128>}, {transform_indices = @transform_5, window_bounds = array<i64: 32, 128>}]} {
    %c0 = arith.constant 0 : index
    %c0_0 = arith.constant 0 : index
    %0 = vector.load %arg1[%c0, %c0_0] : memref<32x128xbf16, #tpu.memory_space<vmem>>, vector<32x128xbf16>
    %c0_1 = arith.constant 0 : index
    %c0_2 = arith.constant 0 : index
    %1 = vector.load %arg2[%c0_1, %c0_2] : memref<128x256xbf16, #tpu.memory_space<vmem>>, vector<128x256xbf16>
    %cst = arith.constant dense<0.000000e+00> : vector<32x256xf32>
    %2 = tpu.matmul %0, %1, %cst {dimension_numbers = #tpu.dot_dimension_numbers<[1], [0], [0], [1], [0, 0, 1, 1], [], []>} : vector<32x128xbf16>, vector<128x256xbf16>, vector<32x256xf32> -> vector<32x256xf32>
    %c0_3 = arith.constant 0 : index
    %c0_4 = arith.constant 0 : index
    %3 = vector.load %arg3[%c0_3, %c0_4] : memref<1x256xf32, #tpu.memory_space<vmem>>, vector<1x256xf32>
    %4 = vector.broadcast %3 : vector<1x256xf32> to vector<32x256xf32>
    %5 = arith.addf %2, %4 : vector<32x256xf32>
    %cst_5 = arith.constant 0.000000e+00 : f32
    %6 = vector.broadcast %cst_5 : f32 to vector<32x256xf32>
    %7 = arith.maximumf %5, %6 : vector<32x256xf32>
    %8 = arith.truncf %7 : vector<32x256xf32> to vector<32x256xbf16>
    %c0_6 = arith.constant 0 : index
    %c0_7 = arith.constant 0 : index
    %9 = vector.load %arg4[%c0_6, %c0_7] : memref<256x128xbf16, #tpu.memory_space<vmem>>, vector<256x128xbf16>
    %cst_8 = arith.constant dense<0.000000e+00> : vector<32x128xf32>
    %10 = tpu.matmul %8, %9, %cst_8 {dimension_numbers = #tpu.dot_dimension_numbers<[1], [0], [0], [1], [0, 0, 1, 1], [], []>} : vector<32x256xbf16>, vector<256x128xbf16>, vector<32x128xf32> -> vector<32x128xf32>
    %c0_9 = arith.constant 0 : index
    %c0_10 = arith.constant 0 : index
    %11 = vector.load %arg5[%c0_9, %c0_10] : memref<1x128xf32, #tpu.memory_space<vmem>>, vector<1x128xf32>
    %12 = vector.broadcast %11 : vector<1x128xf32> to vector<32x128xf32>
    %13 = arith.addf %10, %12 : vector<32x128xf32>
    %c0_11 = arith.constant 0 : index
    %c0_12 = arith.constant 0 : index
    %14 = vector.load %arg6[%c0_11, %c0_12] : memref<32x128xf32, #tpu.memory_space<vmem>>, vector<32x128xf32>
    tpu.vector_store %arg6[%c0_11, %c0_12], %13 {strides = array<i32>} : memref<32x128xf32, #tpu.memory_space<vmem>>, vector<32x128xf32>,
    return
  }
  func.func @transform_0(%arg0: i32) -> (i32, i32) {
    %c0_i32 = arith.constant 0 : i32
    %c0_i32_0 = arith.constant 0 : i32
    return %arg0, %c0_i32 : i32, i32
  }
  func.func @transform_1(%arg0: i32) -> (i32, i32) {
    %c0_i32 = arith.constant 0 : i32
    %c0_i32_0 = arith.constant 0 : i32
    %c0_i32_1 = arith.constant 0 : i32
    return %c0_i32, %c0_i32_0 : i32, i32
  }
  func.func @transform_2(%arg0: i32) -> (i32, i32) {
    %c0_i32 = arith.constant 0 : i32
    %c0_i32_0 = arith.constant 0 : i32
    %c0_i32_1 = arith.constant 0 : i32
    return %c0_i32, %c0_i32_0 : i32, i32
  }
  func.func @transform_3(%arg0: i32) -> (i32, i32) {
    %c0_i32 = arith.constant 0 : i32
    %c0_i32_0 = arith.constant 0 : i32
    %c0_i32_1 = arith.constant 0 : i32
    return %c0_i32, %c0_i32_0 : i32, i32
  }
  func.func @transform_4(%arg0: i32) -> (i32, i32) {
    %c0_i32 = arith.constant 0 : i32
    %c0_i32_0 = arith.constant 0 : i32
    %c0_i32_1 = arith.constant 0 : i32
    return %c0_i32, %c0_i32_0 : i32, i32
  }
  func.func @transform_5(%arg0: i32) -> (i32, i32) {
    %c0_i32 = arith.constant 0 : i32
    %c0_i32_0 = arith.constant 0 : i32
    return %arg0, %c0_i32 : i32, i32
  }
}

</mosaic_0001>

<bundles_post_ra>
// kernel: seq2seq_transformer_forward.15
= control target key start
LH: loop header
LB: loop body
LE: loop exit
PB: predicated region body
PF: predicated region fallthrough
CT: control target
= control target key end

     0   :  { %s405_s15 = smov 0   ;;  %s434_s0 = inlined_call_operand.vmem [shape: f32[2,16,6], index: 0, kind: input, shape index: {}]   ;;  %s435_s1 = inlined_call_operand.vmem [shape: bf16[6,128], index: 1, kind: input, shape index: {}]   ;;  %s436_s2 = inlined_call_operand.vmem [shape: f32[1,128], index: 2, kind: input, shape index: {}]   ;;  %s437_s3 = inlined_call_operand.vmem [shape: f32[16,128], index: 3, kind: input, shape index: {}]   ;;  %s438_s4 = inlined_call_operand.vmem [shape: bf16[2,16,128], index: 4, kind: output, shape index: {}]  }
   0x1 LB: > { %s328_s16 = sadd.s32 4294967295, %s376_s15   ;;  %p332_p0 = scmp.ge.s32.totalorder %s376_s15, 1  ;;  %s376_s15 = sphi %s405_s15, %s14_s15  }
   0x2   : > { %p162_p1 = scmp.lt.s32.totalorder %s376_s15, 3 }
   0x4   : > { %p163_p2 = pnand %p332_p0, %p162_p1 }
   0x5   : > { %v202_v0 = vld [vmem:[%s435_s1] sm:$0x7] (!%p163_p2)  ;;  %vm214_vm0 = vcmask (!%p163_p2), 1042432   ;;  %p188_p3 = scmp.lt.s32.totalorder (!%p163_p2), %s328_s16, 1  ;;  %v378_v1 = vmov (!%p163_p2), 0.0   ;;  %vm379_vm1 = vmmov (!%p163_p2), 0  }
   0x6   : > { %166 = sbr.rel (%p163_p2) target bundleno = 240 (0xf0), region = 36  ;;  %354 = vmatprep.subr.bf16.mxu0 (!%p163_p2), %v378_v1  ;;  %v216_v2 = vsel (!%p163_p2), %vm214_vm0, %v202_v0, 0  ;;  %356 = vmatprep.mubr.msk.bf16.mxu0 (!%p163_p2), %vm379_vm1, %v378_v1  ;;  %vm210_vm2 = vcmask (!%p163_p2), 48128   ;;  %v337_v6 = vld [vmem:[%s436_s2] ss:$0 sm:$0xff] (!%p163_p2)  ;;  %v260_v12 = vld [vmem:[%s437_s3 + $0x8] sm:$0xff] (!%p163_p2) }
   0x7   : > { %355 = vmatpush3.bf16.msra.mxu0 (!%p163_p2), %v216_v2  ;;  %v259_v10 = vld [vmem:[%s437_s3] sm:$0xff] (!%p163_p2) }
   0xd   : > { %s440_s16 = smov (!%p188_p3, %s328_s16), 1 }
   0xe   : > { %s343_s19 = sshll.u32 %s440_s16, 4  ;;  %s344_s29 = sshll.u32 %s440_s16, 3 }
   0xf   : > { %s192_s22 = scalar_lea.vmem %s434_s0, %s343_s19  ;;  %s197_s6 = scalar_lea.vmem %s438_s4, %s344_s29 }
  0x10   : > { %v199_v3 = vld [vmem:[%s192_s22] sm:$0xff]  ;;  %v200_v4 = vld [vmem:[%s192_s22 + $0x8] sm:$0xff] }
  0x11   : > { %v201_v5 = vpack.c.bf16 %v200_v4, %v199_v3 }
  0x13   : > { %357 = vmatmul.mubr.msk.bf16.vlgmr.msra.gmra.mrb[0].mxu0 %vm210_vm2, %v201_v5 }
  0xe6   : > { %v252_v7 = vpop.f32.mrb[0].mxu0 }
  0xe7   : > { %v253_v8 = vadd.f32 %v337_v6, %v252_v7  ;;  %v358_v9 = vpop.f32.mrb[1].mxu0 }
  0xe8   : > { %v255_v11 = vpop.f32.mrb[2].mxu0 }
  0xe9   : > { %v256_v13 = vadd.f32 %v337_v6, %v255_v11  ;;  %v359_v14 = vpop.f32.mrb[3].mxu0  ;;  %v261_v15 = vadd.f32 %v259_v10, %v253_v8 }
  0xeb   : > { %v262_v16 = vadd.f32 %v260_v12, %v256_v13 }
  0xed   : > { %v350_v17 = vpack.c.bf16 %v262_v16, %v261_v15 }
  0xef   : > { %351 = vst [vmem:[%s197_s6] sm:$0xff] %v350_v17  }
  0xf0 PF: > { %s14_s15 = sadd.s32 1, %s376_s15  }
  0xf1   : > { %p11_p4 = scmp.ge.s32.totalorder %s14_s15, 4  }
  0xf3   :  { %13 = sbr.rel (!%p11_p4) target bundleno = 1 (0x1), region = 66 }

// kernel: seq2seq_transformer_forward.21
= control target key start
LH: loop header
LB: loop body
LE: loop exit
PB: predicated region body
PF: predicated region fallthrough
CT: control target
= control target key end

     0   :  { %s189_s0 = inlined_call_operand.vmem [shape: bf16[32,128], index: 0, kind: input, shape index: {}]   ;;  %s190_s1 = inlined_call_operand.vmem [shape: f32[1,128], index: 1, kind: input, shape index: {}]   ;;  %s191_s2 = inlined_call_operand.vmem [shape: f32[1,128], index: 2, kind: input, shape index: {}]   ;;  %s192_s3 = inlined_call_operand.vmem [shape: bf16[32,128], index: 3, kind: output, shape index: {}]  }
   0x1   :  { %v124_v0 = vld [vmem:[%s189_s0] sm:$0xff]   ;;  %v141_v1 = vld [vmem:[%s189_s0 + $0x8] sm:$0xff]  }
   0x2   :  { %v125_v2 = vunpack.c.l.bf16 %v124_v0  ;;  %v129_v3 = vunpack.c.l.bf16 %v141_v1  ;;  %v126_v4 = vunpack.c.h.bf16 %v124_v0  ;;  %v130_v5 = vunpack.c.h.bf16 %v141_v1  ;;  %v113_v36 = vld [vmem:[%s190_s1] ss:$0 sm:$0xff] }
   0x3   :  { %v114_v41 = vld [vmem:[%s191_s2] ss:$0 sm:$0xff] }
   0x4   :  { %24 = vadd.xlane.f32.xlu0 %v125_v2  ;;  %28 = vadd.xlane.f32.xlu1 %v129_v3 }
   0x8   :  { %26 = vadd.xlane.f32.xlu0 %v126_v4  ;;  %30 = vadd.xlane.f32.xlu1 %v130_v5 }
  0x91   :  { %v25_v6 = vpop.xlane.xlu0 %24  ;;  %v29_v7 = vpop.xlane.xlu1 %28 }
  0x92   :  { %v33_v8 = vmul.f32 0.0078125, %v25_v6  ;;  %v35_v9 = vmul.f32 0.0078125, %v29_v7 }
  0x94   :  { %v37_v10 = vsub.f32 %v125_v2, %v33_v8  ;;  %v39_v11 = vsub.f32 %v129_v3, %v35_v9 }
  0x95   :  { %v27_v12 = vpop.xlane.xlu0 %26  ;;  %v31_v13 = vpop.xlane.xlu1 %30 }
  0x96   :  { %v34_v14 = vmul.f32 0.0078125, %v27_v12  ;;  %v41_v15 = vmul.f32 %v37_v10, %v37_v10  ;;  %v36_v16 = vmul.f32 0.0078125, %v31_v13  ;;  %v43_v19 = vmul.f32 %v39_v11, %v39_v11 }
  0x98   :  { %v38_v17 = vsub.f32 %v126_v4, %v34_v14  ;;  %45 = vadd.xlane.f32.xlu0 %v41_v15  ;;  %v40_v18 = vsub.f32 %v130_v5, %v36_v16 }
  0x9a   :  { %v42_v20 = vmul.f32 %v38_v17, %v38_v17  ;;  %v44_v21 = vmul.f32 %v40_v18, %v40_v18 }
  0x9c   :  { %49 = vadd.xlane.f32.xlu0 %v43_v19  ;;  %47 = vadd.xlane.f32.xlu1 %v42_v20 }
  0xa0   :  { %51 = vadd.xlane.f32.xlu1 %v44_v21 }
 0x125   :  { %v46_v22 = vpop.xlane.xlu0 %45 }
 0x126   :  { %v53_v23 = vmul.f32 0.0078125, %v46_v22 }
 0x128   :  { %v57_v24 = vadd.f32 1e-05, %v53_v23 }
 0x129   :  { %v48_v25 = vpop.xlane.xlu1 %47  ;;  %v50_v26 = vpop.xlane.xlu0 %49 }
 0x12a   :  { %143 = vrsqrt.f32 %v57_v24  ;;  %v54_v27 = vmul.f32 0.0078125, %v48_v25  ;;  %v55_v28 = vmul.f32 0.0078125, %v50_v26 }
 0x12c   :  { %v58_v29 = vadd.f32 1e-05, %v54_v27  ;;  %v59_v30 = vadd.f32 1e-05, %v55_v28 }
 0x12d   :  { %v52_v31 = vpop.xlane.xlu1 %51 }
 0x12e   :  { %145 = vrsqrt.f32 %v58_v29  ;;  %v56_v32 = vmul.f32 0.0078125, %v52_v31 }
 0x12f   :  { %147 = vrsqrt.f32 %v59_v30 }
 0x130   :  { %v60_v33 = vadd.f32 1e-05, %v56_v32 }
 0x132   :  { %149 = vrsqrt.f32 %v60_v33 }
 0x134   :  { %v144_v34 = vpop.eup %143 }
 0x135   :  { %v65_v35 = vmul.f32 %v144_v34, %v37_v10 }
 0x137   :  { %v75_v39 = vmul.f32 %v113_v36, %v65_v35 }
 0x138   :  { %v146_v37 = vpop.eup %145 }
 0x139   :  { %v148_v38 = vpop.eup %147  ;;  %v66_v40 = vmul.f32 %v146_v37, %v38_v17  ;;  %v85_v45 = vadd.f32 %v114_v41, %v75_v39 }
 0x13a   :  { %v67_v42 = vmul.f32 %v148_v38, %v39_v11 }
 0x13b   :  { %v76_v43 = vmul.f32 %v113_v36, %v66_v40 }
 0x13c   :  { %v150_v44 = vpop.eup %149  ;;  %v77_v47 = vmul.f32 %v113_v36, %v67_v42 }
 0x13d   :  { %v86_v46 = vadd.f32 %v114_v41, %v76_v43  ;;  %v68_v48 = vmul.f32 %v150_v44, %v40_v18 }
 0x13e   :  { %v87_v51 = vadd.f32 %v114_v41, %v77_v47 }
 0x13f   :  { %v134_v49 = vpack.c.bf16 %v86_v46, %v85_v45  ;;  %v78_v50 = vmul.f32 %v113_v36, %v68_v48 }
 0x141   :  { %135 = vst [vmem:[%s192_s3] sm:$0xff] %v134_v49   ;;  %v88_v52 = vadd.f32 %v114_v41, %v78_v50 }
 0x143   :  { %v139_v53 = vpack.c.bf16 %v88_v52, %v87_v51 }
 0x145   :  { %142 = vst [vmem:[%s192_s3 + $0x8] sm:$0xff] %v139_v53  }

// kernel: seq2seq_transformer_forward.18
= control target key start
LH: loop header
LB: loop body
LE: loop exit
PB: predicated region body
PF: predicated region fallthrough
CT: control target
= control target key end

     0   :  { %v640_v1 = vmov 0   ;;  %v49_v35 = vlaneseq  ;;  %s811_s1 = inlined_call_operand.vmem [shape: bf16[128,256], index: 1, kind: input, shape index: {}]   ;;  %s812_s3 = inlined_call_operand.vmem [shape: bf16[256,128], index: 3, kind: input, shape index: {}]   ;;  %s813_s0 = inlined_call_operand.vmem [shape: bf16[32,128], index: 0, kind: input, shape index: {}]   ;;  %s814_s2 = inlined_call_operand.vmem [shape: f32[1,256], index: 2, kind: input, shape index: {}]   ;;  %s815_s4 = inlined_call_operand.vmem [shape: f32[1,128], index: 4, kind: input, shape index: {}]   ;;  %s816_s5 = inlined_call_operand.vmem [shape: f32[1,128], index: 5, kind: input, shape index: {}]   ;;  %s817_s6 = inlined_call_operand.vmem [shape: f32[1,128], index: 6, kind: input, shape index: {}]   ;;  %s818_s7 = inlined_call_operand.vmem [shape: bf16[32,128], index: 7, kind: output, shape index: {}]  }
   0x1   :  { %v588_v0 = vld [vmem:[%s811_s1 + $0x4] ss:$8 sps:$4 sm:$0xff]   ;;  %183 = vmatprep.mubr.bf16.mxu0 %v640_v1  ;;  %v590_v2 = vld [vmem:[%s811_s1] ss:$8 sps:$4 sm:$0xff]   ;;  %v591_v3 = vld [vmem:[%s811_s1 + $0x14] ss:$8 sps:$4 sm:$0xff]  }
   0x2   :  { %151 = vmatprep.subr.bf16.mxu0 %v588_v0  ;;  %v593_v4 = vld [vmem:[%s811_s1 + $0x10] ss:$8 sps:$4 sm:$0xff]   ;;  %v594_v5 = vld [vmem:[%s811_s1 + $0x24] ss:$8 sps:$4 sm:$0xff]   ;;  %v596_v6 = vld [vmem:[%s811_s1 + $0x20] ss:$8 sps:$4 sm:$0xff]  }
   0x3   :  { %152 = vmatpush1.bf16.msra.mxu0 %v590_v2  ;;  %v597_v7 = vld [vmem:[%s811_s1 + $0x34] ss:$8 sps:$4 sm:$0xff]   ;;  %v599_v8 = vld [vmem:[%s811_s1 + $0x30] ss:$8 sps:$4 sm:$0xff]   ;;  %v600_v9 = vld [vmem:[%s811_s1 + $0x44] ss:$8 sps:$4 sm:$0xff]  }
   0x4   :  { %153 = vmatprep.subr.bf16.mxu0 %v591_v3  ;;  %v614_v10 = vld [vmem:[%s812_s3 + $0x40] sm:$0xff]   ;;  %v603_v13 = vld [vmem:[%s811_s1 + $0x54] ss:$8 sps:$4 sm:$0xff]   ;;  %v616_v14 = vld [vmem:[%s812_s3 + $0x48] sm:$0xff]   ;;  %v50_v36 = vshrl.u32 %v49_v35, 7 }
   0x5   :  { %v602_v11 = vld [vmem:[%s811_s1 + $0x40] ss:$8 sps:$4 sm:$0xff]   ;;  %559 = vmatprep.subr.bf16.mxu1 %v614_v10  ;;  %v618_v16 = vld [vmem:[%s812_s3 + $0x50] sm:$0xff]   ;;  %v606_v18 = vld [vmem:[%s811_s1 + $0x64] ss:$8 sps:$4 sm:$0xff]  }
   0x6   :  { %v615_v12 = vld [vmem:[%s812_s3] sm:$0xff]   ;;  %v617_v15 = vld [vmem:[%s812_s3 + $0x8] sm:$0xff]   ;;  %v605_v17 = vld [vmem:[%s811_s1 + $0x50] ss:$8 sps:$4 sm:$0xff]   ;;  %v51_v37 = vsub.s32 0, %v50_v36  ;;  %v55_v39 = vsub.s32 1, %v50_v36 }
   0x7   :  { %154 = vmatpush1.bf16.msra.mxu0 %v593_v4  ;;  %560 = vmatpush3.bf16.msra.mxu1 %v615_v12  ;;  %v619_v19 = vld [vmem:[%s812_s3 + $0x10] sm:$0xff]   ;;  %v620_v20 = vld [vmem:[%s812_s3 + $0x58] sm:$0xff]   ;;  %v608_v21 = vld [vmem:[%s811_s1 + $0x60] ss:$8 sps:$4 sm:$0xff]  }
   0x8   :  { %155 = vmatprep.subr.bf16.mxu0 %v594_v5  ;;  %561 = vmatprep.subr.bf16.mxu1 %v616_v14  ;;  %v609_v22 = vld [vmem:[%s811_s1 + $0x74] ss:$8 sps:$4 sm:$0xff]   ;;  %v622_v24 = vld [vmem:[%s812_s3 + $0x60] sm:$0xff]   ;;  %v611_v25 = vld [vmem:[%s811_s1 + $0x70] ss:$8 sps:$4 sm:$0xff]  }
   0x9   :  { %v621_v23 = vld [vmem:[%s812_s3 + $0x18] sm:$0xff]   ;;  %v759_v26 = vld [vmem:[%s813_s0] sm:$0xff]   ;;  %v624_v28 = vld [vmem:[%s812_s3 + $0x68] sm:$0xff]  }
   0xa   :  { %v623_v27 = vld [vmem:[%s812_s3 + $0x20] sm:$0xff]   ;;  %v771_v29 = vld [vmem:[%s813_s0 + $0x8] sm:$0xff]   ;;  %v626_v31 = vld [vmem:[%s812_s3 + $0x70] sm:$0xff]  }
   0xb   :  { %156 = vmatpush1.bf16.msra.mxu0 %v596_v6  ;;  %562 = vmatpush3.bf16.msra.mxu1 %v617_v15  ;;  %v625_v30 = vld [vmem:[%s812_s3 + $0x28] sm:$0xff]   ;;  %v627_v32 = vld [vmem:[%s812_s3 + $0x30] sm:$0xff]   ;;  %v628_v33 = vld [vmem:[%s812_s3 + $0x78] sm:$0xff]  }
   0xc   :  { %157 = vmatprep.subr.bf16.mxu0 %v597_v7  ;;  %563 = vmatprep.subr.bf16.mxu1 %v618_v16  ;;  %v629_v34 = vld [vmem:[%s812_s3 + $0x38] sm:$0xff]   ;;  %v47_v38 = vld [vmem:[%s814_s2] sm:$0x3]  ;;  %v212_v7 = vunpack.c.l.bf16 %v759_v26 }
   0xd   :  { %v52_v40 = vrot.slane %v47_v38, %v51_v37  ;;  %v56_v41 = vrot.slane %v47_v38, %v55_v39 }
   0xf   :  { %158 = vmatpush1.bf16.msra.mxu0 %v599_v8  ;;  %564 = vmatpush3.bf16.msra.mxu1 %v619_v19  ;;  %v214_v19 = vunpack.c.l.bf16 %v771_v29 }
  0x10   :  { %159 = vmatprep.subr.bf16.mxu0 %v600_v9  ;;  %565 = vmatprep.subr.bf16.mxu1 %v620_v20 }
  0x13   :  { %160 = vmatpush1.bf16.msra.mxu0 %v602_v11  ;;  %566 = vmatpush3.bf16.msra.mxu1 %v621_v23  ;;  %v213_v11 = vunpack.c.h.bf16 %v759_v26  ;;  %v215_v23 = vunpack.c.h.bf16 %v771_v29 }
  0x14   :  { %161 = vmatprep.subr.bf16.mxu0 %v603_v13  ;;  %567 = vmatprep.subr.bf16.mxu1 %v622_v24  ;;  %v537_v13 = vld [vmem:[%s815_s4] ss:$0 sm:$0xff] }
  0x17   :  { %162 = vmatpush1.bf16.msra.mxu0 %v605_v17  ;;  %568 = vmatpush3.bf16.msra.mxu1 %v623_v27 }
  0x18   :  { %163 = vmatprep.subr.bf16.mxu0 %v606_v18  ;;  %569 = vmatprep.subr.bf16.mxu1 %v624_v28 }
  0x1b   :  { %164 = vmatpush1.bf16.msra.mxu0 %v608_v21  ;;  %570 = vmatpush3.bf16.msra.mxu1 %v625_v30 }
  0x1c   :  { %165 = vmatprep.subr.bf16.mxu0 %v609_v22  ;;  %571 = vmatprep.subr.bf16.mxu1 %v626_v31 }
  0x1f   :  { %166 = vmatpush1.bf16.msra.mxu0 %v611_v25  ;;  %572 = vmatpush3.bf16.msra.mxu1 %v627_v32 }
  0x20   :  { %573 = vmatprep.subr.bf16.mxu1 %v628_v33 }
  0x22   :  { %184 = vmatmul.mubr.bf16.vlgmr.msra.gmra.mrb[0].mxu0 %v759_v26 }
  0x23   :  { %193 = vmatprep.mubr.bf16.mxu0 %v640_v1  ;;  %574 = vmatpush3.bf16.msra.mxu1 %v629_v34 }
  0x2a   :  { %194 = vmatmul.mubr.bf16.gmra.mrb[4].mxu0 %v771_v29 }
  0xf5   :  { %v185_v42 = vpop.f32.mrb[0].mxu0 }
  0xf6   :  { %v186_v43 = vadd.f32 %v185_v42, %v52_v40  ;;  %v187_v44 = vpop.f32.mrb[1].mxu0 }
  0xf7   :  { %v188_v45 = vadd.f32 %v187_v44, %v56_v41  ;;  %v189_v46 = vpop.f32.mrb[2].mxu0 }
  0xf8   :  { %v190_v47 = vadd.f32 %v189_v46, %v52_v40  ;;  %v191_v48 = vpop.f32.mrb[3].mxu0  ;;  %v204_v50 = vmax.f32 %v186_v43, 0.0 }
  0xf9   :  { %v192_v49 = vadd.f32 %v191_v48, %v56_v41  ;;  %v205_v52 = vmax.f32 %v188_v45, 0.0 }
  0xfa   :  { %v206_v51 = vmax.f32 %v190_v47, 0.0 }
  0xfb   :  { %v207_v53 = vmax.f32 %v192_v49, 0.0 }
  0xfc   :  { %v216_v54 = vpack.c.bf16 %v206_v51, %v204_v50 }
  0xfd   :  { %v195_v55 = vpop.f32.mrb[4].mxu0  ;;  %v217_v56 = vpack.c.bf16 %v207_v53, %v205_v52 }
  0xfe   :  { %v196_v57 = vadd.f32 %v195_v55, %v52_v40  ;;  %v197_v58 = vpop.f32.mrb[5].mxu0 }
  0xff   :  { %v198_v59 = vadd.f32 %v197_v58, %v56_v41  ;;  %v199_v60 = vpop.f32.mrb[6].mxu0  ;;  %380 = vmatprep.mubr.bf16.mxu1 %v217_v56 }
 0x100   :  { %v200_v61 = vadd.f32 %v199_v60, %v52_v40  ;;  %v201_v62 = vpop.f32.mrb[7].mxu0  ;;  %381 = vmatmul.mubr.bf16.vlgmr.msra.gmra.mrb[0].mxu1 %v216_v54  ;;  %v208_v0 = vmax.f32 %v196_v57, 0.0 }
 0x101   :  { %v202_v63 = vadd.f32 %v201_v62, %v56_v41  ;;  %v209_v2 = vmax.f32 %v198_v59, 0.0 }
 0x102   :  { %v210_v1 = vmax.f32 %v200_v61, 0.0  ;;  %v538_v61 = vld [vmem:[%s816_s5] ss:$0 sm:$0xff] }
 0x103   :  { %v211_v3 = vmax.f32 %v202_v63, 0.0 }
 0x104   :  { %v218_v4 = vpack.c.bf16 %v210_v1, %v208_v0  ;;  %v539_v1 = vld [vmem:[%s817_s6] ss:$0 sm:$0xff] }
 0x105   :  { %v219_v5 = vpack.c.bf16 %v211_v3, %v209_v2 }
 0x107   :  { %388 = vmatprep.mubr.bf16.mxu1 %v219_v5 }
 0x108   :  { %389 = vmatmul.mubr.bf16.gmra.mrb[4].mxu1 %v218_v4 }
 0x1d3   :  { %v575_v6 = vpop.f32.mrb[0].mxu1 }
 0x1d4   :  { %v576_v8 = vpop.f32.mrb[1].mxu1 }
 0x1d5   :  { %v577_v9 = vadd.f32 %v576_v8, %v575_v6  ;;  %v578_v10 = vpop.f32.mrb[2].mxu1 }
 0x1d6   :  { %v579_v12 = vpop.f32.mrb[3].mxu1 }
 0x1d7   :  { %v397_v14 = vadd.f32 %v577_v9, %v212_v7  ;;  %v580_v15 = vadd.f32 %v579_v12, %v578_v10 }
 0x1d9   :  { %v398_v16 = vadd.f32 %v580_v15, %v213_v11  ;;  %v408_v17 = vadd.f32 %v537_v13, %v397_v14 }
 0x1db   :  { %v581_v18 = vpop.f32.mrb[4].mxu1  ;;  %414 = vadd.xlane.f32.xlu0 %v408_v17  ;;  %v409_v24 = vadd.f32 %v537_v13, %v398_v16 }
 0x1dc   :  { %v582_v20 = vpop.f32.mrb[5].mxu1 }
 0x1dd   :  { %v583_v21 = vadd.f32 %v582_v20, %v581_v18  ;;  %v584_v22 = vpop.f32.mrb[6].mxu1 }
 0x1de   :  { %v585_v25 = vpop.f32.mrb[7].mxu1 }
 0x1df   :  { %v399_v26 = vadd.f32 %v583_v21, %v214_v19  ;;  %v586_v27 = vadd.f32 %v585_v25, %v584_v22  ;;  %416 = vadd.xlane.f32.xlu0 %v409_v24 }
 0x1e1   :  { %v400_v28 = vadd.f32 %v586_v27, %v215_v23  ;;  %v410_v30 = vadd.f32 %v537_v13, %v399_v26 }
 0x1e3   :  { %418 = vadd.xlane.f32.xlu1 %v410_v30  ;;  %v411_v31 = vadd.f32 %v537_v13, %v400_v28 }
 0x1e7   :  { %420 = vadd.xlane.f32.xlu1 %v411_v31 }
 0x268   :  { %v415_v32 = vpop.xlane.xlu0 %414 }
 0x269   :  { %v423_v33 = vmul.f32 0.0078125, %v415_v32 }
 0x26b   :  { %v427_v34 = vsub.f32 %v408_v17, %v423_v33 }
 0x26c   :  { %v417_v35 = vpop.xlane.xlu0 %416 }
 0x26d   :  { %v424_v36 = vmul.f32 0.0078125, %v417_v35  ;;  %v431_v37 = vmul.f32 %v427_v34, %v427_v34 }
 0x26f   :  { %v428_v38 = vsub.f32 %v409_v24, %v424_v36  ;;  %435 = vadd.xlane.f32.xlu0 %v431_v37 }
 0x270   :  { %v419_v39 = vpop.xlane.xlu1 %418 }
 0x271   :  { %v425_v29 = vmul.f32 0.0078125, %v419_v39  ;;  %v432_v40 = vmul.f32 %v428_v38, %v428_v38 }
 0x273   :  { %v429_v41 = vsub.f32 %v410_v30, %v425_v29  ;;  %437 = vadd.xlane.f32.xlu1 %v432_v40 }
 0x274   :  { %v421_v42 = vpop.xlane.xlu1 %420 }
 0x275   :  { %v426_v43 = vmul.f32 0.0078125, %v421_v42  ;;  %v433_v44 = vmul.f32 %v429_v41, %v429_v41 }
 0x277   :  { %v430_v45 = vsub.f32 %v411_v31, %v426_v43  ;;  %439 = vadd.xlane.f32.xlu0 %v433_v44 }
 0x279   :  { %v434_v46 = vmul.f32 %v430_v45, %v430_v45 }
 0x27b   :  { %441 = vadd.xlane.f32.xlu1 %v434_v46 }
 0x2fc   :  { %v436_v47 = vpop.xlane.xlu0 %435 }
 0x2fd   :  { %v443_v48 = vmul.f32 0.0078125, %v436_v47 }
 0x2ff   :  { %v447_v49 = vadd.f32 1e-05, %v443_v48 }
 0x300   :  { %v438_v50 = vpop.xlane.xlu1 %437 }
 0x301   :  { %632 = vrsqrt.f32 %v447_v49  ;;  %v444_v51 = vmul.f32 0.0078125, %v438_v50 }
 0x303   :  { %v448_v52 = vadd.f32 1e-05, %v444_v51 }
 0x304   :  { %v440_v53 = vpop.xlane.xlu0 %439 }
 0x305   :  { %634 = vrsqrt.f32 %v448_v52  ;;  %v445_v54 = vmul.f32 0.0078125, %v440_v53 }
 0x307   :  { %v449_v55 = vadd.f32 1e-05, %v445_v54 }
 0x308   :  { %v442_v56 = vpop.xlane.xlu1 %441 }
 0x309   :  { %636 = vrsqrt.f32 %v449_v55  ;;  %v446_v57 = vmul.f32 0.0078125, %v442_v56 }
 0x30b   :  { %v633_v58 = vpop.eup %632  ;;  %v450_v59 = vadd.f32 1e-05, %v446_v57 }
 0x30c   :  { %v455_v60 = vmul.f32 %v633_v58, %v427_v34 }
 0x30d   :  { %638 = vrsqrt.f32 %v450_v59 }
 0x30e   :  { %v465_v63 = vmul.f32 %v538_v61, %v455_v60 }
 0x30f   :  { %v635_v62 = vpop.eup %634 }
 0x310   :  { %v456_v0 = vmul.f32 %v635_v62, %v428_v38  ;;  %v475_v4 = vadd.f32 %v539_v1, %v465_v63 }
 0x312   :  { %v466_v2 = vmul.f32 %v538_v61, %v456_v0 }
 0x313   :  { %v637_v3 = vpop.eup %636 }
 0x314   :  { %v476_v5 = vadd.f32 %v539_v1, %v466_v2  ;;  %v457_v6 = vmul.f32 %v637_v3, %v429_v41 }
 0x316   :  { %v551_v7 = vpack.c.bf16 %v476_v5, %v475_v4  ;;  %v467_v9 = vmul.f32 %v538_v61, %v457_v6 }
 0x317   :  { %v639_v8 = vpop.eup %638 }
 0x318   :  { %552 = vst [vmem:[%s818_s7] sm:$0xff] %v551_v7   ;;  %v458_v10 = vmul.f32 %v639_v8, %v430_v45  ;;  %v477_v12 = vadd.f32 %v539_v1, %v467_v9 }
 0x31a   :  { %v468_v11 = vmul.f32 %v538_v61, %v458_v10 }
 0x31c   :  { %v478_v13 = vadd.f32 %v539_v1, %v468_v11 }
 0x31e   :  { %v556_v14 = vpack.c.bf16 %v478_v13, %v477_v12 }
 0x320   :  { %558 = vst [vmem:[%s818_s7 + $0x8] sm:$0xff] %v556_v14  }

// kernel: seq2seq_transformer_forward.17
= control target key start
LH: loop header
LB: loop body
LE: loop exit
PB: predicated region body
PF: predicated region fallthrough
CT: control target
= control target key end

     0   :  { %s1633_s17 = smov 0   ;;  %s1635_s18 = smov 0   ;;  %s1854_s0 = inlined_call_operand.vmem [shape: bf16[2,16,128], index: 0, kind: input, shape index: {}, may-alias: {0,1}]   ;;  %s1855_s1 = inlined_call_operand.vmem [shape: bf16[2,16,128], index: 1, kind: input, shape index: {}, may-alias: {0,1}]   ;;  %s1856_s2 = inlined_call_operand.vmem [shape: bf16[128,128], index: 2, kind: input, shape index: {}]   ;;  %s1857_s3 = inlined_call_operand.vmem [shape: f32[1,128], index: 3, kind: input, shape index: {}]   ;;  %s1858_s4 = inlined_call_operand.vmem [shape: bf16[128,256], index: 4, kind: input, shape index: {}]   ;;  %s1859_s5 = inlined_call_operand.vmem [shape: f32[1,256], index: 5, kind: input, shape index: {}]   ;;  %s1860_s6 = inlined_call_operand.vmem [shape: bf16[128,128], index: 6, kind: input, shape index: {}]   ;;  %s1861_s7 = inlined_call_operand.vmem [shape: f32[1,128], index: 7, kind: input, shape index: {}]   ;;  %s1862_s8 = inlined_call_operand.vmem [shape: f32[1,128], index: 8, kind: input, shape index: {}]   ;;  %s1863_s9 = inlined_call_operand.vmem [shape: f32[1,128], index: 9, kind: input, shape index: {}]   ;;  %s1864_s10 = inlined_call_operand.vmem [shape: bf16[16,16], index: 10, kind: input, shape index: {}]   ;;  %s1865_s11 = inlined_call_operand.vmem [shape: bf16[2,16,128], index: 11, kind: output, shape index: {}]  }
   0x1   :  { %s1637_s19 = smov 0  }
   0x2 LB: > { %s33_s20 = sadd.s32 1, %s1563_s18  ;;  %p1297_p0 = scmp.ge.s32.totalorder %s1567_s19, 1  ;;  %s1567_s19 = sphi %s1637_s19, %s21_s19   ;;  %s1563_s18 = sphi %s1635_s18, %s1867_s18   ;;  %s1559_s17 = sphi %s1633_s17, %s1866_s17  }
   0x3   : > { %p35_p1 = scmp.ge.s32.totalorder %s33_s20, 2  ;;  %p379_p2 = scmp.lt.s32.totalorder %s1567_s19, 3 }
   0x5   : > { %s1869_s20 = smov (%p35_p1, %s33_s20), 0  ;;  %p380_p3 = pnand %p1297_p0, %p379_p2 }
   0x6   : > { %v1482_v0 = vld [vmem:[%s1858_s4 + $0x4] ss:$8 sps:$4 sm:$0xff] (!%p380_p3)   ;;  %v1484_v1 = vld [vmem:[%s1858_s4] ss:$8 sps:$4 sm:$0xff] (!%p380_p3)   ;;  %v1569_v2 = vmov (!%p380_p3), 0.0   ;;  %v1570_v3 = vmov (!%p380_p3), 0   ;;  %v609_v28 = vlaneseq (!%p380_p3) }
   0x7   : > { %383 = sbr.rel (%p380_p3) target bundleno = 1903 (0x76f), region = 64  ;;  %1390 = vmatprep.subr.bf16.mxu0 (!%p380_p3), %v1569_v2  ;;  %737 = vmatprep.mubr.bf16.mxu1 (!%p380_p3), %v1570_v3  ;;  %v1485_v4 = vld [vmem:[%s1858_s4 + $0x14] ss:$8 sps:$4 sm:$0xff] (!%p380_p3)   ;;  %vm1571_vm0 = vmmov (!%p380_p3), 0   ;;  %v1487_v5 = vld [vmem:[%s1856_s2] sm:$0xff] (!%p380_p3)   ;;  %v1491_v8 = vld [vmem:[%s1856_s2 + $0x8] sm:$0xff] (!%p380_p3)  }
   0x8   : > { %705 = vmatprep.subr.bf16.mxu1 (!%p380_p3), %v1482_v0  ;;  %1406 = vmatprep.mubr.msk.bf16.mxu0 (!%p380_p3), %vm1571_vm0, %v1569_v2  ;;  %v1488_v6 = vld [vmem:[%s1858_s4 + $0x10] ss:$8 sps:$4 sm:$0xff] (!%p380_p3)   ;;  %v1489_v7 = vld [vmem:[%s1858_s4 + $0x24] ss:$8 sps:$4 sm:$0xff] (!%p380_p3)   ;;  %p438_p4 = scmp.lt.s32.totalorder (!%p380_p3), %s1559_s17, 1  ;;  %v610_v29 = vshrl.u32 (!%p380_p3), %v609_v28, 7 }
   0x9   : > { %706 = vmatpush1.bf16.msra.mxu1 (!%p380_p3), %v1484_v1  ;;  %1391 = vmatpush3.bf16.msra.mxu0 (!%p380_p3), %v1487_v5  ;;  %v1492_v9 = vld [vmem:[%s1858_s4 + $0x20] ss:$8 sps:$4 sm:$0xff] (!%p380_p3)   ;;  %v1493_v10 = vld [vmem:[%s1858_s4 + $0x34] ss:$8 sps:$4 sm:$0xff] (!%p380_p3)   ;;  %v1496_v12 = vld [vmem:[%s1858_s4 + $0x30] ss:$8 sps:$4 sm:$0xff] (!%p380_p3)  }
   0xa   : > { %707 = vmatprep.subr.bf16.mxu1 (!%p380_p3), %v1485_v4  ;;  %1392 = vmatprep.subr.bf16.mxu0 (!%p380_p3), %v1569_v2  ;;  %v1495_v11 = vld [vmem:[%s1856_s2 + $0x10] sm:$0xff] (!%p380_p3)   ;;  %v1497_v13 = vld [vmem:[%s1858_s4 + $0x44] ss:$8 sps:$4 sm:$0xff] (!%p380_p3)   ;;  %v1499_v14 = vld [vmem:[%s1856_s2 + $0x18] sm:$0xff] (!%p380_p3)   ;;  %v611_v30 = vsub.s32 (!%p380_p3), 0, %v610_v29  ;;  %v615_v32 = vsub.s32 (!%p380_p3), 1, %v610_v29 }
   0xb   : > { %v1500_v15 = vld [vmem:[%s1858_s4 + $0x40] ss:$8 sps:$4 sm:$0xff] (!%p380_p3)   ;;  %v1501_v16 = vld [vmem:[%s1858_s4 + $0x54] ss:$8 sps:$4 sm:$0xff] (!%p380_p3)   ;;  %v1504_v18 = vld [vmem:[%s1858_s4 + $0x50] ss:$8 sps:$4 sm:$0xff] (!%p380_p3)  }
   0xc   : > { %v1503_v17 = vld [vmem:[%s1856_s2 + $0x20] sm:$0xff] (!%p380_p3)   ;;  %v1507_v20 = vld [vmem:[%s1856_s2 + $0x28] sm:$0xff] (!%p380_p3)   ;;  %v1509_v22 = vld [vmem:[%s1858_s4 + $0x74] ss:$8 sps:$4 sm:$0xff] (!%p380_p3)   ;;  %vm757_vm1 = vcmask (!%p380_p3), 523264   ;;  %s1572_s16 = smov (!%p380_p3), 64  }
   0xd   : > { %708 = vmatpush1.bf16.msra.mxu1 (!%p380_p3), %v1488_v6  ;;  %1393 = vmatpush3.bf16.msra.mxu0 (!%p380_p3), %v1491_v8  ;;  %v1505_v19 = vld [vmem:[%s1858_s4 + $0x64] ss:$8 sps:$4 sm:$0xff] (!%p380_p3)   ;;  %v1508_v21 = vld [vmem:[%s1858_s4 + $0x60] ss:$8 sps:$4 sm:$0xff] (!%p380_p3)   ;;  %v1511_v23 = vld [vmem:[%s1856_s2 + $0x30] sm:$0xff] (!%p380_p3)   ;;  %vm805_vm2 = vcmask (!%p380_p3), 130048  }
   0xe   : > { %709 = vmatprep.subr.bf16.mxu1 %v1489_v7  ;;  %s1871_s17 = smov (!%p438_p4, %s1559_s17), 1  ;;  %1394 = vmatprep.subr.bf16.mxu0 %v1569_v2  ;;  %v1512_v24 = vld [vmem:[%s1858_s4 + $0x70] ss:$8 sps:$4 sm:$0xff]   ;;  %v607_v31 = vld [vmem:[%s1859_s5] sm:$0x3]  ;;  %vm1008_vm3 = vcmask 1048064  }
   0xf   : > { %s1699_s13 = sshll.u32 %s1871_s17, 3  ;;  %v1514_v25 = vld [vmem:[%s1856_s2 + $0x38] sm:$0xff]   ;;  %v612_v33 = vrot.slane %v607_v31, %v611_v30  ;;  %v616_v35 = vrot.slane %v607_v31, %v615_v32  ;;  %v1304_v36 = vld [vmem:[%s1857_s3] ss:$0 sm:$0xff] }
  0x10   : > { %s451_s24 = scalar_lea.vmem %s1855_s1, %s1699_s13  ;;  %s445_s26 = scalar_lea.vmem %s1854_s0, %s1699_s13  ;;  %v1356_v56 = vld [vmem:[%s1864_s10] sm:$0xff]  }
  0x11   : > { %710 = vmatpush1.bf16.msra.mxu1 %v1492_v9  ;;  %1395 = vmatpush3.bf16.msra.mxu0 %v1495_v11  ;;  %v1746_v26 = vld [vmem:[%s445_s26] sm:$0xff]   ;;  %v1357_v57 = vunpack.c.l.bf16 %v1356_v56  ;;  %v1358_v58 = vunpack.c.h.bf16 %v1356_v56 }
  0x12   : > { %711 = vmatprep.subr.bf16.mxu1 %v1493_v10  ;;  %1396 = vmatprep.subr.bf16.mxu0 %v1569_v2  ;;  %v1513_v27 = vld [vmem:[%s451_s24] sm:$0xff]   ;;  %s466_s24 = scalar_lea.vmem %s1865_s11, %s1699_s13 }
  0x15   : > { %712 = vmatpush1.bf16.msra.mxu1 %v1496_v12  ;;  %1397 = vmatpush3.bf16.msra.mxu0 %v1499_v14 }
  0x16   : > { %713 = vmatprep.subr.bf16.mxu1 %v1497_v13  ;;  %1398 = vmatprep.subr.bf16.mxu0 %v1569_v2 }
  0x19   : > { %714 = vmatpush1.bf16.msra.mxu1 %v1500_v15  ;;  %1399 = vmatpush3.bf16.msra.mxu0 %v1503_v17 }
  0x1a   : > { %715 = vmatprep.subr.bf16.mxu1 %v1501_v16  ;;  %1400 = vmatprep.subr.bf16.mxu0 %v1569_v2 }
  0x1d   : > { %716 = vmatpush1.bf16.msra.mxu1 %v1504_v18  ;;  %1401 = vmatpush3.bf16.msra.mxu0 %v1507_v20 }
  0x1e   : > { %717 = vmatprep.subr.bf16.mxu1 %v1505_v19  ;;  %1402 = vmatprep.subr.bf16.mxu0 %v1569_v2 }
  0x21   : > { %718 = vmatpush1.bf16.msra.mxu1 %v1508_v21  ;;  %1403 = vmatpush3.bf16.msra.mxu0 %v1511_v23 }
  0x22   : > { %719 = vmatprep.subr.bf16.mxu1 %v1509_v22  ;;  %1404 = vmatprep.subr.bf16.mxu0 %v1569_v2 }
  0x25   : > { %720 = vmatpush1.bf16.msra.mxu1 %v1512_v24  ;;  %1405 = vmatpush3.bf16.msra.mxu0 %v1514_v25 }
  0x26   : > { %1410 = vmatprep.subr.bf16.mxu1 %v1569_v2  ;;  %1434 = vmatprep.subr.bf16.mxu0 %v1569_v2 }
  0x28   : > { %738 = vmatmul.mubr.bf16.vlgmr.msra.gmra.mrb[0].mxu1 %v1513_v27  ;;  %1407 = vmatmul.mubr.bf16.vlgmr.msra.gmra.mrb[0].mxu0 %v1746_v26 }
  0x29   : > { %1412 = vmatprep.mubr.msk.bf16.mxu1 %vm1571_vm0, %v1569_v2  ;;  %1450 = vmatprep.mubr.msk.bf16.mxu0 %vm1571_vm0, %v1569_v2 }
  0xfb   : > { %v739_v34 = vpop.f32.mrb[0].mxu1  ;;  %v584_v39 = vpop.f32.mrb[0].mxu0 }
  0xfc   : > { %v741_v37 = vpop.f32.mrb[1].mxu1  ;;  %v740_v40 = vadd.f32 %v739_v34, %v612_v33  ;;  %v585_v43 = vadd.f32 %v1304_v36, %v584_v39  ;;  %v1408_v44 = vpop.f32.mrb[1].mxu0 }
  0xfd   : > { %v743_v38 = vpop.f32.mrb[2].mxu1  ;;  %v742_v45 = vadd.f32 %v741_v37, %v616_v35  ;;  %v587_v47 = vpop.f32.mrb[2].mxu0  ;;  %v1517_v44 = vld [vmem:[%s1860_s6 + $0x8] sm:$0xff]  }
  0xfe   : > { %v744_v41 = vadd.f32 %v743_v38, %v612_v33  ;;  %v745_v42 = vpop.f32.mrb[3].mxu1  ;;  %v748_v48 = vmul.f32 0.125, %v585_v43  ;;  %v588_v49 = vadd.f32 %v1304_v36, %v587_v47  ;;  %v1409_v51 = vpop.f32.mrb[3].mxu0  ;;  %v1516_v43 = vld [vmem:[%s1860_s6] sm:$0xff]  }
  0xff   : > { %v746_v46 = vadd.f32 %v745_v42, %v616_v35  ;;  %1435 = vmatpush3.bf16.msra.mxu0 %v1516_v43  ;;  %v1520_v47 = vld [vmem:[%s1860_s6 + $0x20] sm:$0xff]  }
 0x100   : > { %v751_v50 = vpack.c.bf16 %v744_v41, %v740_v40  ;;  %v749_v53 = vmul.f32 0.125, %v588_v49  ;;  %1436 = vmatprep.subr.bf16.mxu0 %v1569_v2 }
 0x101   : > { %v752_v52 = vpack.c.bf16 %v746_v46, %v742_v45  ;;  %v1518_v45 = vld [vmem:[%s1860_s6 + $0x10] sm:$0xff]   ;;  %v1519_v46 = vld [vmem:[%s1860_s6 + $0x18] sm:$0xff]  }
 0x102   : > { %881 = vrot.lane.b32.xlu1 %v751_v50, %s1572_s16  ;;  %v762_v54 = vsel %vm757_vm1, %v751_v50, 0  ;;  %v750_v55 = vpack.c.bf16 %v749_v53, %v748_v48  ;;  %v1521_v48 = vld [vmem:[%s1860_s6 + $0x28] sm:$0xff]  }
 0x103   : > { %1411 = vmatpush3.bf16.xpose.msra.mxu1 %v762_v54  ;;  %1437 = vmatpush3.bf16.msra.mxu0 %v1517_v44 }
 0x104   : > { %1416 = vmatprep.subr.bf16.mxu1 %v1569_v2  ;;  %1438 = vmatprep.subr.bf16.mxu0 %v1569_v2 }
 0x106   : > { %878 = vrot.lane.b32.xlu1 %v750_v55, %s1572_s16 }
 0x107   : > { %1439 = vmatpush3.bf16.msra.mxu0 %v1518_v45 }
 0x108   : > { %1440 = vmatprep.subr.bf16.mxu0 %v1569_v2 }
 0x10a   : > { %1413 = vmatmul.mubr.msk.bf16.vlgmr.msra.gmra.mrb[4].mxu1 %vm757_vm1, %v750_v55 }
 0x10b   : > { %1417 = vmatpush3.bf16.msra.mxu1 %v752_v52  ;;  %1418 = vmatprep.mubr.msk.bf16.mxu1 %vm1571_vm0, %v1569_v2 }
 0x10c   : > { %1422 = vmatprep.subr.bf16.mxu1 %v1569_v2  ;;  %1441 = vmatpush3.bf16.msra.mxu0 %v1519_v46 }
 0x10d   : > { %1442 = vmatprep.subr.bf16.mxu0 %v1569_v2 }
 0x110   : > { %1443 = vmatpush3.bf16.msra.mxu0 %v1520_v47 }
 0x111   : > { %1444 = vmatprep.subr.bf16.mxu0 %v1569_v2 }
 0x114   : > { %1445 = vmatpush3.bf16.msra.mxu0 %v1521_v48 }
 0x115   : > { %1446 = vmatprep.subr.bf16.mxu0 %v1569_v2 }
 0x174   : > { %v882_v12 = vpop.permute.xlu1 %881 }
 0x175   : > { %v887_v14 = vsel %vm757_vm1, %v882_v12, 0  ;;  %v1123_v12 = vunpack.c.l.bf16 %v1746_v26 }
 0x178   : > { %v879_v15 = vpop.permute.xlu1 %878 }
 0x1dd   : > { %v798_v59 = vpop.f32.mrb[4].mxu1 }
 0x1de   : > { %v799_v60 = vadd.f32 %v1357_v57, %v798_v59  ;;  %v1414_v61 = vpop.f32.mrb[5].mxu1 }
 0x1df   : > { %v801_v62 = vpop.f32.mrb[6].mxu1 }
 0x1e0   : > { %v802_v63 = vadd.f32 %v1358_v58, %v801_v62  ;;  %v1415_v0 = vpop.f32.mrb[7].mxu1  ;;  %v806_v1 = vsel %vm805_vm2, %v799_v60, -inf  ;;  %v1522_v62 = vld [vmem:[%s1860_s6 + $0x30] sm:$0xff]  }
 0x1e1   : > { %807 = vmax.xlane.f32.xlu0 %v806_v1  ;;  %1447 = vmatpush3.bf16.msra.mxu0 %v1522_v62 }
 0x1e2   : > { %v809_v3 = vsel %vm805_vm2, %v802_v63, -inf  ;;  %1448 = vmatprep.subr.bf16.mxu0 %v1569_v2 }
 0x1e5   : > { %810 = vmax.xlane.f32.xlu0 %v809_v3 }
 0x26e   : > { %v808_v4 = vpop.xlane.xlu0 %807 }
 0x26f   : > { %v812_v5 = vsub.f32 %v799_v60, %v808_v4 }
 0x271   : > { %v814_v6 = vmul.f32 1.442695, %v812_v5 }
 0x272   : > { %v811_v7 = vpop.xlane.xlu0 %810 }
 0x273   : > { %v813_v8 = vsub.f32 %v802_v63, %v811_v7  ;;  %1525 = vpow2.f32 %v814_v6  ;;  %v1523_v63 = vld [vmem:[%s1860_s6 + $0x38] sm:$0xff]  }
 0x274   : > { %1449 = vmatpush3.bf16.msra.mxu0 %v1523_v63 }
 0x275   : > { %v816_v9 = vmul.f32 1.442695, %v813_v8 }
 0x277   : > { %1527 = vpow2.f32 %v816_v9 }
 0x27d   : > { %v1526_v10 = vpop.eup %1525 }
 0x27e   : > { %v818_v41 = vsel %vm805_vm2, %v1526_v10, 0.0 }
 0x281   : > { %v1528_v11 = vpop.eup %1527 }
 0x282   : > { %v826_v13 = vpack.c.bf16 %v1528_v11, %v1526_v10  ;;  %v821_v42 = vsel %vm805_vm2, %v1528_v11, 0.0 }
 0x284   : > { %1419 = vmatmul.mubr.msk.bf16.vlgmr.msra.gmra.mrb[8].mxu1 %vm805_vm2, %v826_v13 }
 0x285   : > { %1423 = vmatpush3.bf16.xpose.msra.mxu1 %v887_v14  ;;  %1424 = vmatprep.mubr.msk.bf16.mxu1 %vm1571_vm0, %v1569_v2 }
 0x286   : > { %1428 = vmatprep.subr.bf16.mxu1 %v1569_v2 }
 0x28c   : > { %1425 = vmatmul.mubr.msk.bf16.vlgmr.msra.gmra.mrb[12].mxu1 %vm757_vm1, %v879_v15 }
 0x28d   : > { %1430 = vmatprep.mubr.msk.bf16.mxu1 %vm1571_vm0, %v1569_v2  ;;  %v1335_v2 = vld [vmem:[%s1861_s7] ss:$0 sm:$0xff] }
 0x357   : > { %v1783_v16 = vpop.f32.mrb[8].mxu1 }
 0x358   : > { %v1420_v17 = vpop.f32.mrb[9].mxu1 }
 0x359   : > { %v1785_v18 = vpop.f32.mrb[10].mxu1 }
 0x35a   : > { %v1421_v19 = vpop.f32.mrb[11].mxu1 }
 0x35f   : > { %v923_v20 = vpop.f32.mrb[12].mxu1 }
 0x360   : > { %v924_v21 = vadd.f32 %v1357_v57, %v923_v20  ;;  %v1426_v22 = vpop.f32.mrb[13].mxu1  ;;  %v1124_v20 = vunpack.c.h.bf16 %v1746_v26 }
 0x361   : > { %v926_v23 = vpop.f32.mrb[14].mxu1 }
 0x362   : > { %v927_v24 = vadd.f32 %v1358_v58, %v926_v23  ;;  %v1427_v25 = vpop.f32.mrb[15].mxu1  ;;  %v930_v27 = vsel %vm805_vm2, %v924_v21, -inf }
 0x363   : > { %931 = vmax.xlane.f32.xlu0 %v930_v27 }
 0x364   : > { %v933_v28 = vsel %vm805_vm2, %v927_v24, -inf }
 0x365   : > { %934 = vmax.xlane.f32.xlu1 %v933_v28 }
 0x379   : > { %952 = vrot.lane.b32.xlu0 %v752_v52, %s1572_s16 }
 0x3f0   : > { %v932_v29 = vpop.xlane.xlu0 %931 }
 0x3f1   : > { %v936_v30 = vsub.f32 %v924_v21, %v932_v29 }
 0x3f2   : > { %v935_v31 = vpop.xlane.xlu1 %934 }
 0x3f3   : > { %v938_v32 = vmul.f32 1.442695, %v936_v30  ;;  %v937_v33 = vsub.f32 %v927_v24, %v935_v31 }
 0x3f4   : > { %v953_v34 = vpop.permute.xlu0 %952 }
 0x3f5   : > { %1529 = vpow2.f32 %v938_v32  ;;  %v940_v35 = vmul.f32 1.442695, %v937_v33  ;;  %1429 = vmatpush3.bf16.msra.mxu1 %v953_v34 }
 0x3f7   : > { %1531 = vpow2.f32 %v940_v35 }
 0x3ff   : > { %v1530_v36 = vpop.eup %1529 }
 0x400   : > { %v942_v37 = vsel %vm805_vm2, %v1530_v36, 0.0 }
 0x401   : > { %v1532_v38 = vpop.eup %1531  ;;  %943 = vadd.xlane.f32.xlu0 %v942_v37 }
 0x402   : > { %v945_v39 = vsel %vm805_vm2, %v1532_v38, 0.0  ;;  %v950_v40 = vpack.c.bf16 %v1532_v38, %v1530_v36  ;;  %v1344_v38 = vld [vmem:[%s1862_s8] ss:$0 sm:$0xff] }
 0x403   : > { %946 = vadd.xlane.f32.xlu1 %v945_v39 }
 0x404   : > { %1431 = vmatmul.mubr.msk.bf16.vlgmr.msra.gmra.mrb[16].mxu1 %vm805_vm2, %v950_v40 }
 0x407   : > { %819 = vadd.xlane.f32.xlu1 %v818_v41 }
 0x40b   : > { %822 = vadd.xlane.f32.xlu1 %v821_v42  ;;  %v1345_v42 = vld [vmem:[%s1863_s9] ss:$0 sm:$0xff] }
 0x48e   : > { %v944_v59 = vpop.xlane.xlu0 %943 }
 0x48f   : > { %v948_v60 = vmax.f32 %v944_v59, 1e-20 }
 0x490   : > { %v947_v49 = vpop.xlane.xlu1 %946 }
 0x491   : > { %v949_v61 = vmax.f32 %v947_v49, 1e-20 }
 0x494   : > { %v820_v50 = vpop.xlane.xlu1 %819 }
 0x495   : > { %v824_v51 = vmax.f32 %v820_v50, 1e-20 }
 0x497   : > { %1533 = vrcp.f32 %v824_v51 }
 0x498   : > { %v823_v52 = vpop.xlane.xlu1 %822 }
 0x499   : > { %v825_v53 = vmax.f32 %v823_v52, 1e-20 }
 0x49b   : > { %1535 = vrcp.f32 %v825_v53 }
 0x49c   : > { %1537 = vrcp.f32 %v948_v60 }
 0x49d   : > { %1539 = vrcp.f32 %v949_v61 }
 0x4a1   : > { %v1534_v54 = vpop.eup %1533 }
 0x4a2   : > { %v873_v56 = vmul.f32 %v1534_v54, %v1783_v16 }
 0x4a5   : > { %v1536_v55 = vpop.eup %1535 }
 0x4a6   : > { %v874_v57 = vmul.f32 %v1536_v55, %v1785_v18  ;;  %v1538_v1 = vpop.eup %1537 }
 0x4a7   : > { %v1540_v4 = vpop.eup %1539 }
 0x4a8   : > { %v875_v58 = vpack.c.bf16 %v874_v57, %v873_v56 }
 0x4aa   : > { %876 = vst.msk [vmem:[#allocation2] sm:$0xff] %vm757_vm1, %v875_v58 }
 0x4d7   : > { %v992_v0 = vpop.f32.mrb[16].mxu1 }
 0x4d8   : > { %v1432_v3 = vpop.f32.mrb[17].mxu1  ;;  %v1001_v6 = vmul.f32 %v1538_v1, %v992_v0 }
 0x4d9   : > { %v995_v5 = vpop.f32.mrb[18].mxu1 }
 0x4da   : > { %v1002_v7 = vmul.f32 %v1540_v4, %v995_v5  ;;  %v1433_v8 = vpop.f32.mrb[19].mxu1 }
 0x4dc   : > { %v1003_v9 = vpack.c.bf16 %v1002_v7, %v1001_v6 }
 0x4de   : > { %1005 = vrot.lane.b32.xlu1 %v1003_v9, %s1572_s16 }
 0x550   : > { %v1006_v10 = vpop.permute.xlu1 %1005 }
 0x551   : > { %1009 = vst.msk [vmem:[#allocation2] sm:$0xff] %vm1008_vm3, %v1006_v10 }
 0x558   : > { %v1010_v11 = vld [vmem:[#allocation2] sm:$0xff] }
 0x559   : > { %1451 = vmatmul.mubr.bf16.vlgmr.msra.gmra.mrb[4].mxu0 %v1010_v11 }
 0x62c   : > { %v1116_v13 = vpop.f32.mrb[4].mxu0 }
 0x62d   : > { %v1117_v14 = vadd.f32 %v1335_v2, %v1116_v13  ;;  %v1452_v15 = vpop.f32.mrb[5].mxu0 }
 0x62e   : > { %v1119_v16 = vpop.f32.mrb[6].mxu0 }
 0x62f   : > { %v1120_v17 = vadd.f32 %v1335_v2, %v1119_v16  ;;  %v1453_v18 = vpop.f32.mrb[7].mxu0  ;;  %v1125_v19 = vadd.f32 %v1123_v12, %v1117_v14 }
 0x631   : > { %1129 = vadd.xlane.f32.xlu0 %v1125_v19  ;;  %v1126_v21 = vadd.f32 %v1124_v20, %v1120_v17 }
 0x635   : > { %1131 = vadd.xlane.f32.xlu0 %v1126_v21 }
 0x6be   : > { %v1130_v22 = vpop.xlane.xlu0 %1129 }
 0x6bf   : > { %v1134_v23 = vmul.f32 0.0078125, %v1130_v22 }
 0x6c1   : > { %v1136_v24 = vsub.f32 %v1125_v19, %v1134_v23 }
 0x6c2   : > { %v1132_v25 = vpop.xlane.xlu0 %1131 }
 0x6c3   : > { %v1135_v27 = vmul.f32 0.0078125, %v1132_v25  ;;  %v1138_v28 = vmul.f32 %v1136_v24, %v1136_v24 }
 0x6c5   : > { %v1137_v29 = vsub.f32 %v1126_v21, %v1135_v27  ;;  %1140 = vadd.xlane.f32.xlu0 %v1138_v28 }
 0x6c7   : > { %v1139_v30 = vmul.f32 %v1137_v29, %v1137_v29 }
 0x6c9   : > { %1142 = vadd.xlane.f32.xlu1 %v1139_v30 }
 0x752   : > { %v1141_v31 = vpop.xlane.xlu0 %1140 }
 0x753   : > { %v1144_v32 = vmul.f32 0.0078125, %v1141_v31 }
 0x755   : > { %v1146_v33 = vadd.f32 1e-05, %v1144_v32 }
 0x756   : > { %v1143_v34 = vpop.xlane.xlu1 %1142 }
 0x757   : > { %1541 = vrsqrt.f32 %v1146_v33  ;;  %v1145_v26 = vmul.f32 0.0078125, %v1143_v34 }
 0x759   : > { %v1147_v35 = vadd.f32 1e-05, %v1145_v26 }
 0x75b   : > { %1543 = vrsqrt.f32 %v1147_v35 }
 0x761   : > { %v1542_v36 = vpop.eup %1541 }
 0x762   : > { %v1150_v37 = vmul.f32 %v1542_v36, %v1136_v24 }
 0x764   : > { %v1158_v40 = vmul.f32 %v1344_v38, %v1150_v37 }
 0x765   : > { %v1544_v39 = vpop.eup %1543 }
 0x766   : > { %v1151_v41 = vmul.f32 %v1544_v39, %v1137_v29  ;;  %v1166_v44 = vadd.f32 %v1345_v42, %v1158_v40 }
 0x768   : > { %v1159_v43 = vmul.f32 %v1344_v38, %v1151_v41 }
 0x76a   : > { %v1167_v45 = vadd.f32 %v1345_v42, %v1159_v43 }
 0x76c   : > { %v1362_v46 = vpack.c.bf16 %v1167_v45, %v1166_v44 }
 0x76e   : > { %1363 = vst [vmem:[%s466_s24] sm:$0xff] %v1362_v46  }
 0x76f PF: > { %s21_s19 = sadd.s32 1, %s1567_s19   ;;  %s1866_s17 = smov %s1563_s18 }
 0x770   : > { %p18_p5 = scmp.ge.s32.totalorder %s21_s19, 4   ;;  %s1867_s18 = smov %s1869_s20 }
 0x772   :  { %20 = sbr.rel (!%p18_p5) target bundleno = 2 (0x2), region = 100 }

// kernel: seq2seq_transformer_forward.16
= control target key start
LH: loop header
LB: loop body
LE: loop exit
PB: predicated region body
PF: predicated region fallthrough
CT: control target
= control target key end

     0   :  { %s410_s15 = smov 0   ;;  %s439_s0 = inlined_call_operand.vmem [shape: f32[2,16,5], index: 0, kind: input, shape index: {}]   ;;  %s440_s1 = inlined_call_operand.vmem [shape: bf16[5,128], index: 1, kind: input, shape index: {}]   ;;  %s441_s2 = inlined_call_operand.vmem [shape: f32[1,128], index: 2, kind: input, shape index: {}]   ;;  %s442_s3 = inlined_call_operand.vmem [shape: f32[16,128], index: 3, kind: input, shape index: {}]   ;;  %s443_s4 = inlined_call_operand.vmem [shape: bf16[2,16,128], index: 4, kind: output, shape index: {}]  }
   0x1 LB: > { %s331_s16 = sadd.s32 4294967295, %s380_s15   ;;  %p335_p0 = scmp.ge.s32.totalorder %s380_s15, 1  ;;  %s380_s15 = sphi %s410_s15, %s14_s15  }
   0x2   : > { %p162_p1 = scmp.lt.s32.totalorder %s380_s15, 3 }
   0x4   : > { %p163_p2 = pnand %p335_p0, %p162_p1 }
   0x5   : > { %v202_v0 = vld [vmem:[%s440_s1] sm:$0x7] (!%p163_p2)  ;;  %vm214_vm0 = vcmask (!%p163_p2), 1041408   ;;  %vm215_vm1 = vcmask (!%p163_p2), 1042432   ;;  %v382_v1 = vmov (!%p163_p2), 0.0   ;;  %v383_v2 = vmov (!%p163_p2), 65535  }
   0x6   : > { %166 = sbr.rel (%p163_p2) target bundleno = 240 (0xf0), region = 36  ;;  %357 = vmatprep.subr.bf16.mxu0 (!%p163_p2), %v382_v1  ;;  %v216_v3 = vsel (!%p163_p2), %vm214_vm0, 4294967295, %v383_v2  ;;  %p188_p3 = scmp.lt.s32.totalorder (!%p163_p2), %s331_s16, 1  ;;  %vm384_vm2 = vmmov (!%p163_p2), 0   ;;  %vm210_vm3 = vcmask (!%p163_p2), 39936   ;;  %v262_v13 = vld [vmem:[%s442_s3] sm:$0xff] (!%p163_p2) }
   0x7   : > { %v217_v4 = vsel (!%p163_p2), %vm215_vm1, %v216_v3, 0  ;;  %359 = vmatprep.mubr.msk.bf16.mxu0 (!%p163_p2), %vm384_vm2, %v382_v1  ;;  %v340_v9 = vld [vmem:[%s441_s2] ss:$0 sm:$0xff] (!%p163_p2)  ;;  %v263_v15 = vld [vmem:[%s442_s3 + $0x8] sm:$0xff] (!%p163_p2) }
   0x8   : > { %v219_v5 = vand.u32 (!%p163_p2), %v217_v4, %v202_v0 }
   0xa   : > { %358 = vmatpush3.bf16.msra.mxu0 (!%p163_p2), %v219_v5 }
   0xd   : > { %s445_s16 = smov (!%p188_p3, %s331_s16), 1 }
   0xe   : > { %s346_s19 = sshll.u32 %s445_s16, 4  ;;  %s347_s29 = sshll.u32 %s445_s16, 3 }
   0xf   : > { %s192_s22 = scalar_lea.vmem %s439_s0, %s346_s19  ;;  %s197_s6 = scalar_lea.vmem %s443_s4, %s347_s29 }
  0x10   : > { %v199_v6 = vld [vmem:[%s192_s22] sm:$0xff]  ;;  %v200_v7 = vld [vmem:[%s192_s22 + $0x8] sm:$0xff] }
  0x11   : > { %v201_v8 = vpack.c.bf16 %v200_v7, %v199_v6 }
  0x13   : > { %360 = vmatmul.mubr.msk.bf16.vlgmr.msra.gmra.mrb[0].mxu0 %vm210_vm3, %v201_v8 }
  0xe6   : > { %v255_v10 = vpop.f32.mrb[0].mxu0 }
  0xe7   : > { %v256_v11 = vadd.f32 %v340_v9, %v255_v10  ;;  %v361_v12 = vpop.f32.mrb[1].mxu0 }
  0xe8   : > { %v258_v14 = vpop.f32.mrb[2].mxu0 }
  0xe9   : > { %v259_v16 = vadd.f32 %v340_v9, %v258_v14  ;;  %v362_v17 = vpop.f32.mrb[3].mxu0  ;;  %v264_v18 = vadd.f32 %v262_v13, %v256_v11 }
  0xeb   : > { %v265_v19 = vadd.f32 %v263_v15, %v259_v16 }
  0xed   : > { %v353_v20 = vpack.c.bf16 %v265_v19, %v264_v18 }
  0xef   : > { %354 = vst [vmem:[%s197_s6] sm:$0xff] %v353_v20  }
  0xf0 PF: > { %s14_s15 = sadd.s32 1, %s380_s15  }
  0xf1   : > { %p11_p4 = scmp.ge.s32.totalorder %s14_s15, 4  }
  0xf3   :  { %13 = sbr.rel (!%p11_p4) target bundleno = 1 (0x1), region = 66 }

// kernel: seq2seq_transformer_forward.23
= control target key start
LH: loop header
LB: loop body
LE: loop exit
PB: predicated region body
PF: predicated region fallthrough
CT: control target
= control target key end

     0   :  { %s1555_s13 = smov 0   ;;  %s1557_s14 = smov 0   ;;  %s1767_s0 = inlined_call_operand.vmem [shape: bf16[2,16,128], index: 0, kind: input, shape index: {}]   ;;  %s1768_s1 = inlined_call_operand.vmem [shape: bf16[2,16,128], index: 1, kind: input, shape index: {}]   ;;  %s1769_s2 = inlined_call_operand.vmem [shape: bf16[128,128], index: 2, kind: input, shape index: {}]   ;;  %s1770_s3 = inlined_call_operand.vmem [shape: f32[1,128], index: 3, kind: input, shape index: {}]   ;;  %s1771_s4 = inlined_call_operand.vmem [shape: bf16[128,256], index: 4, kind: input, shape index: {}]   ;;  %s1772_s5 = inlined_call_operand.vmem [shape: f32[1,256], index: 5, kind: input, shape index: {}]   ;;  %s1773_s6 = inlined_call_operand.vmem [shape: bf16[128,128], index: 6, kind: input, shape index: {}]   ;;  %s1774_s7 = inlined_call_operand.vmem [shape: f32[1,128], index: 7, kind: input, shape index: {}]   ;;  %s1775_s8 = inlined_call_operand.vmem [shape: f32[1,128], index: 8, kind: input, shape index: {}]   ;;  %s1776_s9 = inlined_call_operand.vmem [shape: f32[1,128], index: 9, kind: input, shape index: {}]   ;;  %s1777_s10 = inlined_call_operand.vmem [shape: bf16[2,16,128], index: 10, kind: output, shape index: {}]  }
   0x1   :  { %s1559_s15 = smov 0  }
   0x2 LB: > { %s32_s16 = sadd.s32 1, %s1490_s14  ;;  %p1228_p0 = scmp.ge.s32.totalorder %s1494_s15, 1  ;;  %s1494_s15 = sphi %s1559_s15, %s20_s15   ;;  %s1490_s14 = sphi %s1557_s14, %s1779_s14   ;;  %s1486_s13 = sphi %s1555_s13, %s1778_s13  }
   0x3   : > { %p34_p1 = scmp.ge.s32.totalorder %s32_s16, 2  ;;  %p343_p2 = scmp.lt.s32.totalorder %s1494_s15, 3 }
   0x5   : > { %s1781_s16 = smov (%p34_p1, %s32_s16), 0  ;;  %p344_p3 = pnand %p1228_p0, %p343_p2 }
   0x6   : > { %v1409_v0 = vld [vmem:[%s1771_s4 + $0x4] ss:$8 sps:$4 sm:$0xff] (!%p344_p3)   ;;  %v1411_v1 = vld [vmem:[%s1771_s4] ss:$8 sps:$4 sm:$0xff] (!%p344_p3)   ;;  %v1496_v2 = vmov (!%p344_p3), 0.0   ;;  %v1497_v3 = vmov (!%p344_p3), 0   ;;  %v560_v28 = vlaneseq (!%p344_p3) }
   0x7   : > { %347 = sbr.rel (%p344_p3) target bundleno = 1899 (0x76b), region = 60  ;;  %1317 = vmatprep.subr.bf16.mxu0 (!%p344_p3), %v1496_v2  ;;  %688 = vmatprep.mubr.bf16.mxu1 (!%p344_p3), %v1497_v3  ;;  %v1412_v4 = vld [vmem:[%s1771_s4 + $0x14] ss:$8 sps:$4 sm:$0xff] (!%p344_p3)   ;;  %vm1498_vm0 = vmmov (!%p344_p3), 0   ;;  %v1414_v5 = vld [vmem:[%s1769_s2] sm:$0xff] (!%p344_p3)   ;;  %v1418_v8 = vld [vmem:[%s1769_s2 + $0x8] sm:$0xff] (!%p344_p3)  }
   0x8   : > { %656 = vmatprep.subr.bf16.mxu1 (!%p344_p3), %v1409_v0  ;;  %1333 = vmatprep.mubr.msk.bf16.mxu0 (!%p344_p3), %vm1498_vm0, %v1496_v2  ;;  %v1415_v6 = vld [vmem:[%s1771_s4 + $0x10] ss:$8 sps:$4 sm:$0xff] (!%p344_p3)   ;;  %v1416_v7 = vld [vmem:[%s1771_s4 + $0x24] ss:$8 sps:$4 sm:$0xff] (!%p344_p3)   ;;  %p395_p4 = scmp.lt.s32.totalorder (!%p344_p3), %s1486_s13, 1  ;;  %v561_v29 = vshrl.u32 (!%p344_p3), %v560_v28, 7 }
   0x9   : > { %657 = vmatpush1.bf16.msra.mxu1 (!%p344_p3), %v1411_v1  ;;  %1318 = vmatpush3.bf16.msra.mxu0 (!%p344_p3), %v1414_v5  ;;  %v1419_v9 = vld [vmem:[%s1771_s4 + $0x20] ss:$8 sps:$4 sm:$0xff] (!%p344_p3)   ;;  %v1420_v10 = vld [vmem:[%s1771_s4 + $0x34] ss:$8 sps:$4 sm:$0xff] (!%p344_p3)   ;;  %v1423_v12 = vld [vmem:[%s1771_s4 + $0x30] ss:$8 sps:$4 sm:$0xff] (!%p344_p3)  }
   0xa   : > { %658 = vmatprep.subr.bf16.mxu1 (!%p344_p3), %v1412_v4  ;;  %1319 = vmatprep.subr.bf16.mxu0 (!%p344_p3), %v1496_v2  ;;  %v1422_v11 = vld [vmem:[%s1769_s2 + $0x10] sm:$0xff] (!%p344_p3)   ;;  %v1424_v13 = vld [vmem:[%s1771_s4 + $0x44] ss:$8 sps:$4 sm:$0xff] (!%p344_p3)   ;;  %v1426_v14 = vld [vmem:[%s1769_s2 + $0x18] sm:$0xff] (!%p344_p3)   ;;  %v562_v30 = vsub.s32 (!%p344_p3), 0, %v561_v29  ;;  %v566_v32 = vsub.s32 (!%p344_p3), 1, %v561_v29 }
   0xb   : > { %v1427_v15 = vld [vmem:[%s1771_s4 + $0x40] ss:$8 sps:$4 sm:$0xff] (!%p344_p3)   ;;  %v1428_v16 = vld [vmem:[%s1771_s4 + $0x54] ss:$8 sps:$4 sm:$0xff] (!%p344_p3)   ;;  %v1431_v18 = vld [vmem:[%s1771_s4 + $0x50] ss:$8 sps:$4 sm:$0xff] (!%p344_p3)  }
   0xc   : > { %v1430_v17 = vld [vmem:[%s1769_s2 + $0x20] sm:$0xff] (!%p344_p3)   ;;  %v1434_v20 = vld [vmem:[%s1769_s2 + $0x28] sm:$0xff] (!%p344_p3)   ;;  %v1436_v22 = vld [vmem:[%s1771_s4 + $0x74] ss:$8 sps:$4 sm:$0xff] (!%p344_p3)   ;;  %vm704_vm1 = vcmask (!%p344_p3), 523264   ;;  %s1499_s28 = smov (!%p344_p3), 64  }
   0xd   : > { %659 = vmatpush1.bf16.msra.mxu1 (!%p344_p3), %v1415_v6  ;;  %1320 = vmatpush3.bf16.msra.mxu0 (!%p344_p3), %v1418_v8  ;;  %v1432_v19 = vld [vmem:[%s1771_s4 + $0x64] ss:$8 sps:$4 sm:$0xff] (!%p344_p3)   ;;  %v1435_v21 = vld [vmem:[%s1771_s4 + $0x60] ss:$8 sps:$4 sm:$0xff] (!%p344_p3)   ;;  %v1438_v23 = vld [vmem:[%s1769_s2 + $0x30] sm:$0xff] (!%p344_p3)   ;;  %vm752_vm2 = vcmask (!%p344_p3), 130048  }
   0xe   : > { %660 = vmatprep.subr.bf16.mxu1 %v1416_v7  ;;  %s1783_s13 = smov (!%p395_p4, %s1486_s13), 1  ;;  %1321 = vmatprep.subr.bf16.mxu0 %v1496_v2  ;;  %v1439_v24 = vld [vmem:[%s1771_s4 + $0x70] ss:$8 sps:$4 sm:$0xff]   ;;  %v558_v31 = vld [vmem:[%s1772_s5] sm:$0x3]  ;;  %vm955_vm3 = vcmask 1048064  }
   0xf   : > { %s1621_s27 = sshll.u32 %s1783_s13, 3  ;;  %v1441_v25 = vld [vmem:[%s1769_s2 + $0x38] sm:$0xff]   ;;  %v563_v33 = vrot.slane %v558_v31, %v562_v30  ;;  %v567_v35 = vrot.slane %v558_v31, %v566_v32  ;;  %v1235_v36 = vld [vmem:[%s1770_s3] ss:$0 sm:$0xff] }
  0x10   : > { %s408_s18 = scalar_lea.vmem %s1768_s1, %s1621_s27  ;;  %s402_s19 = scalar_lea.vmem %s1767_s0, %s1621_s27 }
  0x11   : > { %661 = vmatpush1.bf16.msra.mxu1 %v1419_v9  ;;  %1322 = vmatpush3.bf16.msra.mxu0 %v1422_v11  ;;  %v1668_v26 = vld [vmem:[%s402_s19] sm:$0xff]   ;;  %s417_s21 = scalar_lea.vmem %s1777_s10, %s1621_s27 }
  0x12   : > { %662 = vmatprep.subr.bf16.mxu1 %v1420_v10  ;;  %1323 = vmatprep.subr.bf16.mxu0 %v1496_v2  ;;  %v1440_v27 = vld [vmem:[%s408_s18] sm:$0xff]  }
  0x15   : > { %663 = vmatpush1.bf16.msra.mxu1 %v1423_v12  ;;  %1324 = vmatpush3.bf16.msra.mxu0 %v1426_v14 }
  0x16   : > { %664 = vmatprep.subr.bf16.mxu1 %v1424_v13  ;;  %1325 = vmatprep.subr.bf16.mxu0 %v1496_v2 }
  0x19   : > { %665 = vmatpush1.bf16.msra.mxu1 %v1427_v15  ;;  %1326 = vmatpush3.bf16.msra.mxu0 %v1430_v17 }
  0x1a   : > { %666 = vmatprep.subr.bf16.mxu1 %v1428_v16  ;;  %1327 = vmatprep.subr.bf16.mxu0 %v1496_v2 }
  0x1d   : > { %667 = vmatpush1.bf16.msra.mxu1 %v1431_v18  ;;  %1328 = vmatpush3.bf16.msra.mxu0 %v1434_v20 }
  0x1e   : > { %668 = vmatprep.subr.bf16.mxu1 %v1432_v19  ;;  %1329 = vmatprep.subr.bf16.mxu0 %v1496_v2 }
  0x21   : > { %669 = vmatpush1.bf16.msra.mxu1 %v1435_v21  ;;  %1330 = vmatpush3.bf16.msra.mxu0 %v1438_v23 }
  0x22   : > { %670 = vmatprep.subr.bf16.mxu1 %v1436_v22  ;;  %1331 = vmatprep.subr.bf16.mxu0 %v1496_v2 }
  0x25   : > { %671 = vmatpush1.bf16.msra.mxu1 %v1439_v24  ;;  %1332 = vmatpush3.bf16.msra.mxu0 %v1441_v25 }
  0x26   : > { %1337 = vmatprep.subr.bf16.mxu1 %v1496_v2  ;;  %1361 = vmatprep.subr.bf16.mxu0 %v1496_v2 }
  0x28   : > { %689 = vmatmul.mubr.bf16.vlgmr.msra.gmra.mrb[0].mxu1 %v1440_v27  ;;  %1334 = vmatmul.mubr.bf16.vlgmr.msra.gmra.mrb[0].mxu0 %v1668_v26 }
  0x29   : > { %1339 = vmatprep.mubr.msk.bf16.mxu1 %vm1498_vm0, %v1496_v2  ;;  %1377 = vmatprep.mubr.msk.bf16.mxu0 %vm1498_vm0, %v1496_v2 }
  0xfb   : > { %v690_v34 = vpop.f32.mrb[0].mxu1  ;;  %v535_v39 = vpop.f32.mrb[0].mxu0 }
  0xfc   : > { %v692_v37 = vpop.f32.mrb[1].mxu1  ;;  %v691_v40 = vadd.f32 %v690_v34, %v563_v33  ;;  %v536_v43 = vadd.f32 %v1235_v36, %v535_v39  ;;  %v1335_v44 = vpop.f32.mrb[1].mxu0  ;;  %v1446_v39 = vld [vmem:[%s1773_s6 + $0x18] sm:$0xff]  }
  0xfd   : > { %v694_v38 = vpop.f32.mrb[2].mxu1  ;;  %v693_v45 = vadd.f32 %v692_v37, %v567_v35  ;;  %v538_v47 = vpop.f32.mrb[2].mxu0  ;;  %v1444_v37 = vld [vmem:[%s1773_s6 + $0x8] sm:$0xff]  }
  0xfe   : > { %v695_v41 = vadd.f32 %v694_v38, %v563_v33  ;;  %v696_v42 = vpop.f32.mrb[3].mxu1  ;;  %v699_v48 = vmul.f32 0.125, %v536_v43  ;;  %v539_v49 = vadd.f32 %v1235_v36, %v538_v47  ;;  %v1336_v51 = vpop.f32.mrb[3].mxu0  ;;  %v1443_v36 = vld [vmem:[%s1773_s6] sm:$0xff]   ;;  %v1445_v38 = vld [vmem:[%s1773_s6 + $0x10] sm:$0xff]  }
  0xff   : > { %v697_v46 = vadd.f32 %v696_v42, %v567_v35  ;;  %1362 = vmatpush3.bf16.msra.mxu0 %v1443_v36 }
 0x100   : > { %v702_v50 = vpack.c.bf16 %v695_v41, %v691_v40  ;;  %v700_v53 = vmul.f32 0.125, %v539_v49  ;;  %1363 = vmatprep.subr.bf16.mxu0 %v1496_v2  ;;  %v1447_v40 = vld [vmem:[%s1773_s6 + $0x20] sm:$0xff]   ;;  %v1448_v41 = vld [vmem:[%s1773_s6 + $0x28] sm:$0xff]  }
 0x101   : > { %v703_v52 = vpack.c.bf16 %v697_v46, %v693_v45 }
 0x102   : > { %828 = vrot.lane.b32.xlu1 %v702_v50, %s1499_s28  ;;  %v709_v54 = vsel %vm704_vm1, %v702_v50, 0  ;;  %v701_v55 = vpack.c.bf16 %v700_v53, %v699_v48 }
 0x103   : > { %1338 = vmatpush3.bf16.xpose.msra.mxu1 %v709_v54  ;;  %1364 = vmatpush3.bf16.msra.mxu0 %v1444_v37 }
 0x104   : > { %1343 = vmatprep.subr.bf16.mxu1 %v1496_v2  ;;  %1365 = vmatprep.subr.bf16.mxu0 %v1496_v2 }
 0x106   : > { %825 = vrot.lane.b32.xlu1 %v701_v55, %s1499_s28 }
 0x107   : > { %1366 = vmatpush3.bf16.msra.mxu0 %v1445_v38 }
 0x108   : > { %1367 = vmatprep.subr.bf16.mxu0 %v1496_v2 }
 0x10a   : > { %1340 = vmatmul.mubr.msk.bf16.vlgmr.msra.gmra.mrb[4].mxu1 %vm704_vm1, %v701_v55  ;;  %v1449_v55 = vld [vmem:[%s1773_s6 + $0x30] sm:$0xff]  }
 0x10b   : > { %1344 = vmatpush3.bf16.msra.mxu1 %v703_v52  ;;  %1345 = vmatprep.mubr.msk.bf16.mxu1 %vm1498_vm0, %v1496_v2 }
 0x10c   : > { %1349 = vmatprep.subr.bf16.mxu1 %v1496_v2  ;;  %1368 = vmatpush3.bf16.msra.mxu0 %v1446_v39 }
 0x10d   : > { %1369 = vmatprep.subr.bf16.mxu0 %v1496_v2 }
 0x110   : > { %1370 = vmatpush3.bf16.msra.mxu0 %v1447_v40 }
 0x111   : > { %1371 = vmatprep.subr.bf16.mxu0 %v1496_v2 }
 0x114   : > { %1372 = vmatpush3.bf16.msra.mxu0 %v1448_v41 }
 0x115   : > { %1373 = vmatprep.subr.bf16.mxu0 %v1496_v2 }
 0x118   : > { %1374 = vmatpush3.bf16.msra.mxu0 %v1449_v55 }
 0x119   : > { %1375 = vmatprep.subr.bf16.mxu0 %v1496_v2 }
 0x174   : > { %v829_v7 = vpop.permute.xlu1 %828 }
 0x175   : > { %v834_v9 = vsel %vm704_vm1, %v829_v7, 0 }
 0x178   : > { %v826_v10 = vpop.permute.xlu1 %825 }
 0x1dd   : > { %v745_v56 = vpop.f32.mrb[4].mxu1 }
 0x1de   : > { %v1341_v57 = vpop.f32.mrb[5].mxu1  ;;  %v753_v58 = vsel %vm752_vm2, %v745_v56, -inf }
 0x1df   : > { %754 = vmax.xlane.f32.xlu0 %v753_v58  ;;  %v748_v59 = vpop.f32.mrb[6].mxu1 }
 0x1e0   : > { %v1342_v60 = vpop.f32.mrb[7].mxu1  ;;  %v756_v61 = vsel %vm752_vm2, %v748_v59, -inf }
 0x1e3   : > { %757 = vmax.xlane.f32.xlu0 %v756_v61 }
 0x26c   : > { %v755_v62 = vpop.xlane.xlu0 %754 }
 0x26d   : > { %v759_v63 = vsub.f32 %v745_v56, %v755_v62  ;;  %v1450_v56 = vld [vmem:[%s1773_s6 + $0x38] sm:$0xff]  }
 0x26e   : > { %1376 = vmatpush3.bf16.msra.mxu0 %v1450_v56 }
 0x26f   : > { %v761_v0 = vmul.f32 1.442695, %v759_v63 }
 0x270   : > { %v758_v1 = vpop.xlane.xlu0 %757 }
 0x271   : > { %v760_v3 = vsub.f32 %v748_v59, %v758_v1  ;;  %1452 = vpow2.f32 %v761_v0 }
 0x273   : > { %v763_v4 = vmul.f32 1.442695, %v760_v3 }
 0x275   : > { %1454 = vpow2.f32 %v763_v4 }
 0x27b   : > { %v1453_v5 = vpop.eup %1452 }
 0x27c   : > { %v765_v34 = vsel %vm752_vm2, %v1453_v5, 0.0 }
 0x27f   : > { %v1455_v6 = vpop.eup %1454 }
 0x280   : > { %v773_v8 = vpack.c.bf16 %v1455_v6, %v1453_v5  ;;  %v768_v35 = vsel %vm752_vm2, %v1455_v6, 0.0  ;;  %v1070_v5 = vunpack.c.l.bf16 %v1668_v26 }
 0x282   : > { %1346 = vmatmul.mubr.msk.bf16.vlgmr.msra.gmra.mrb[8].mxu1 %vm752_vm2, %v773_v8 }
 0x283   : > { %1350 = vmatpush3.bf16.xpose.msra.mxu1 %v834_v9  ;;  %1351 = vmatprep.mubr.msk.bf16.mxu1 %vm1498_vm0, %v1496_v2 }
 0x284   : > { %1355 = vmatprep.subr.bf16.mxu1 %v1496_v2 }
 0x28a   : > { %1352 = vmatmul.mubr.msk.bf16.vlgmr.msra.gmra.mrb[12].mxu1 %vm704_vm1, %v826_v10 }
 0x28b   : > { %1357 = vmatprep.mubr.msk.bf16.mxu1 %vm1498_vm0, %v1496_v2  ;;  %v1266_v2 = vld [vmem:[%s1774_s7] ss:$0 sm:$0xff] }
 0x355   : > { %v811_v11 = vpop.f32.mrb[8].mxu1 }
 0x356   : > { %v1347_v12 = vpop.f32.mrb[9].mxu1 }
 0x357   : > { %v814_v13 = vpop.f32.mrb[10].mxu1 }
 0x358   : > { %v1348_v14 = vpop.f32.mrb[11].mxu1 }
 0x35d   : > { %v870_v15 = vpop.f32.mrb[12].mxu1 }
 0x35e   : > { %v1353_v16 = vpop.f32.mrb[13].mxu1  ;;  %v877_v17 = vsel %vm752_vm2, %v870_v15, -inf }
 0x35f   : > { %878 = vmax.xlane.f32.xlu0 %v877_v17  ;;  %v873_v18 = vpop.f32.mrb[14].mxu1 }
 0x360   : > { %v1354_v19 = vpop.f32.mrb[15].mxu1  ;;  %v880_v20 = vsel %vm752_vm2, %v873_v18, -inf }
 0x361   : > { %881 = vmax.xlane.f32.xlu1 %v880_v20 }
 0x375   : > { %899 = vrot.lane.b32.xlu0 %v703_v52, %s1499_s28 }
 0x3ec   : > { %v879_v21 = vpop.xlane.xlu0 %878 }
 0x3ed   : > { %v883_v22 = vsub.f32 %v870_v15, %v879_v21 }
 0x3ee   : > { %v882_v23 = vpop.xlane.xlu1 %881 }
 0x3ef   : > { %v885_v24 = vmul.f32 1.442695, %v883_v22  ;;  %v884_v25 = vsub.f32 %v873_v18, %v882_v23 }
 0x3f0   : > { %v900_v27 = vpop.permute.xlu0 %899 }
 0x3f1   : > { %1456 = vpow2.f32 %v885_v24  ;;  %v887_v28 = vmul.f32 1.442695, %v884_v25  ;;  %1356 = vmatpush3.bf16.msra.mxu1 %v900_v27 }
 0x3f3   : > { %1458 = vpow2.f32 %v887_v28 }
 0x3fb   : > { %v1457_v29 = vpop.eup %1456 }
 0x3fc   : > { %v889_v30 = vsel %vm752_vm2, %v1457_v29, 0.0 }
 0x3fd   : > { %v1459_v31 = vpop.eup %1458  ;;  %890 = vadd.xlane.f32.xlu0 %v889_v30 }
 0x3fe   : > { %v892_v32 = vsel %vm752_vm2, %v1459_v31, 0.0  ;;  %v897_v33 = vpack.c.bf16 %v1459_v31, %v1457_v29  ;;  %v1275_v31 = vld [vmem:[%s1775_s8] ss:$0 sm:$0xff] }
 0x3ff   : > { %893 = vadd.xlane.f32.xlu1 %v892_v32 }
 0x400   : > { %1358 = vmatmul.mubr.msk.bf16.vlgmr.msra.gmra.mrb[16].mxu1 %vm752_vm2, %v897_v33 }
 0x403   : > { %766 = vadd.xlane.f32.xlu1 %v765_v34 }
 0x407   : > { %769 = vadd.xlane.f32.xlu1 %v768_v35  ;;  %v1276_v35 = vld [vmem:[%s1776_s9] ss:$0 sm:$0xff] }
 0x48a   : > { %v891_v52 = vpop.xlane.xlu0 %890 }
 0x48b   : > { %v895_v53 = vmax.f32 %v891_v52, 1e-20 }
 0x48c   : > { %v894_v42 = vpop.xlane.xlu1 %893 }
 0x48d   : > { %v896_v54 = vmax.f32 %v894_v42, 1e-20 }
 0x490   : > { %v767_v43 = vpop.xlane.xlu1 %766 }
 0x491   : > { %v771_v44 = vmax.f32 %v767_v43, 1e-20 }
 0x493   : > { %1460 = vrcp.f32 %v771_v44 }
 0x494   : > { %v770_v45 = vpop.xlane.xlu1 %769 }
 0x495   : > { %v772_v46 = vmax.f32 %v770_v45, 1e-20 }
 0x497   : > { %1462 = vrcp.f32 %v772_v46 }
 0x498   : > { %1464 = vrcp.f32 %v895_v53 }
 0x499   : > { %1466 = vrcp.f32 %v896_v54 }
 0x49d   : > { %v1461_v47 = vpop.eup %1460 }
 0x49e   : > { %v820_v49 = vmul.f32 %v1461_v47, %v811_v11 }
 0x4a1   : > { %v1463_v48 = vpop.eup %1462 }
 0x4a2   : > { %v821_v50 = vmul.f32 %v1463_v48, %v814_v13  ;;  %v1465_v58 = vpop.eup %1464  ;;  %v1071_v13 = vunpack.c.h.bf16 %v1668_v26 }
 0x4a3   : > { %v1467_v60 = vpop.eup %1466 }
 0x4a4   : > { %v822_v51 = vpack.c.bf16 %v821_v50, %v820_v49 }
 0x4a6   : > { %823 = vst.msk [vmem:[#allocation2] sm:$0xff] %vm704_vm1, %v822_v51 }
 0x4d3   : > { %v939_v57 = vpop.f32.mrb[16].mxu1 }
 0x4d4   : > { %v1359_v59 = vpop.f32.mrb[17].mxu1  ;;  %v948_v62 = vmul.f32 %v1465_v58, %v939_v57 }
 0x4d5   : > { %v942_v61 = vpop.f32.mrb[18].mxu1 }
 0x4d6   : > { %v949_v63 = vmul.f32 %v1467_v60, %v942_v61  ;;  %v1360_v0 = vpop.f32.mrb[19].mxu1 }
 0x4d8   : > { %v950_v1 = vpack.c.bf16 %v949_v63, %v948_v62 }
 0x4da   : > { %952 = vrot.lane.b32.xlu1 %v950_v1, %s1499_s28 }
 0x54c   : > { %v953_v3 = vpop.permute.xlu1 %952 }
 0x54d   : > { %956 = vst.msk [vmem:[#allocation2] sm:$0xff] %vm955_vm3, %v953_v3 }
 0x554   : > { %v957_v4 = vld [vmem:[#allocation2] sm:$0xff] }
 0x555   : > { %1378 = vmatmul.mubr.bf16.vlgmr.msra.gmra.mrb[4].mxu0 %v957_v4 }
 0x628   : > { %v1063_v6 = vpop.f32.mrb[4].mxu0 }
 0x629   : > { %v1064_v7 = vadd.f32 %v1266_v2, %v1063_v6  ;;  %v1379_v8 = vpop.f32.mrb[5].mxu0 }
 0x62a   : > { %v1066_v9 = vpop.f32.mrb[6].mxu0 }
 0x62b   : > { %v1067_v10 = vadd.f32 %v1266_v2, %v1066_v9  ;;  %v1380_v11 = vpop.f32.mrb[7].mxu0  ;;  %v1072_v12 = vadd.f32 %v1070_v5, %v1064_v7 }
 0x62d   : > { %1076 = vadd.xlane.f32.xlu0 %v1072_v12  ;;  %v1073_v14 = vadd.f32 %v1071_v13, %v1067_v10 }
 0x631   : > { %1078 = vadd.xlane.f32.xlu0 %v1073_v14 }
 0x6ba   : > { %v1077_v15 = vpop.xlane.xlu0 %1076 }
 0x6bb   : > { %v1081_v16 = vmul.f32 0.0078125, %v1077_v15 }
 0x6bd   : > { %v1083_v17 = vsub.f32 %v1072_v12, %v1081_v16 }
 0x6be   : > { %v1079_v18 = vpop.xlane.xlu0 %1078 }
 0x6bf   : > { %v1082_v19 = vmul.f32 0.0078125, %v1079_v18  ;;  %v1085_v20 = vmul.f32 %v1083_v17, %v1083_v17 }
 0x6c1   : > { %v1084_v21 = vsub.f32 %v1073_v14, %v1082_v19  ;;  %1087 = vadd.xlane.f32.xlu0 %v1085_v20 }
 0x6c3   : > { %v1086_v22 = vmul.f32 %v1084_v21, %v1084_v21 }
 0x6c5   : > { %1089 = vadd.xlane.f32.xlu1 %v1086_v22 }
 0x74e   : > { %v1088_v23 = vpop.xlane.xlu0 %1087 }
 0x74f   : > { %v1091_v24 = vmul.f32 0.0078125, %v1088_v23 }
 0x751   : > { %v1093_v25 = vadd.f32 1e-05, %v1091_v24 }
 0x752   : > { %v1090_v27 = vpop.xlane.xlu1 %1089 }
 0x753   : > { %1468 = vrsqrt.f32 %v1093_v25  ;;  %v1092_v26 = vmul.f32 0.0078125, %v1090_v27 }
 0x755   : > { %v1094_v28 = vadd.f32 1e-05, %v1092_v26 }
 0x757   : > { %1470 = vrsqrt.f32 %v1094_v28 }
 0x75d   : > { %v1469_v29 = vpop.eup %1468 }
 0x75e   : > { %v1097_v30 = vmul.f32 %v1469_v29, %v1083_v17 }
 0x760   : > { %v1105_v33 = vmul.f32 %v1275_v31, %v1097_v30 }
 0x761   : > { %v1471_v32 = vpop.eup %1470 }
 0x762   : > { %v1098_v34 = vmul.f32 %v1471_v32, %v1084_v21  ;;  %v1113_v37 = vadd.f32 %v1276_v35, %v1105_v33 }
 0x764   : > { %v1106_v36 = vmul.f32 %v1275_v31, %v1098_v34 }
 0x766   : > { %v1114_v38 = vadd.f32 %v1276_v35, %v1106_v36 }
 0x768   : > { %v1289_v39 = vpack.c.bf16 %v1114_v38, %v1113_v37 }
 0x76a   : > { %1290 = vst [vmem:[%s417_s21] sm:$0xff] %v1289_v39  }
 0x76b PF: > { %s20_s15 = sadd.s32 1, %s1494_s15   ;;  %s1778_s13 = smov %s1490_s14 }
 0x76c   : > { %p17_p5 = scmp.ge.s32.totalorder %s20_s15, 4   ;;  %s1779_s14 = smov %s1781_s16 }
 0x76e   :  { %19 = sbr.rel (!%p17_p5) target bundleno = 2 (0x2), region = 93 }

// kernel: seq2seq_transformer_forward.29
= control target key start
LH: loop header
LB: loop body
LE: loop exit
PB: predicated region body
PF: predicated region fallthrough
CT: control target
= control target key end

     0   :  { %v508_v1 = vmov 0   ;;  %v43_v35 = vlaneseq  ;;  %s659_s1 = inlined_call_operand.vmem [shape: bf16[128,256], index: 1, kind: input, shape index: {}]   ;;  %s660_s0 = inlined_call_operand.vmem [shape: bf16[32,128], index: 0, kind: input, shape index: {}]   ;;  %s661_s3 = inlined_call_operand.vmem [shape: bf16[256,128], index: 3, kind: input, shape index: {}]   ;;  %s662_s2 = inlined_call_operand.vmem [shape: f32[1,256], index: 2, kind: input, shape index: {}]   ;;  %s663_s4 = inlined_call_operand.vmem [shape: f32[1,128], index: 4, kind: input, shape index: {}]   ;;  %s664_s5 = inlined_call_operand.vmem [shape: f32[32,128], index: 5, kind: output, shape index: {}]  }
   0x1   :  { %v466_v0 = vld [vmem:[%s659_s1 + $0x4] ss:$8 sps:$4 sm:$0xff]   ;;  %177 = vmatprep.mubr.bf16.mxu0 %v508_v1  ;;  %v468_v2 = vld [vmem:[%s659_s1] ss:$8 sps:$4 sm:$0xff]   ;;  %v469_v3 = vld [vmem:[%s659_s1 + $0x14] ss:$8 sps:$4 sm:$0xff]  }
   0x2   :  { %145 = vmatprep.subr.bf16.mxu0 %v466_v0  ;;  %v471_v4 = vld [vmem:[%s659_s1 + $0x10] ss:$8 sps:$4 sm:$0xff]   ;;  %v472_v5 = vld [vmem:[%s659_s1 + $0x24] ss:$8 sps:$4 sm:$0xff]   ;;  %v474_v6 = vld [vmem:[%s659_s1 + $0x20] ss:$8 sps:$4 sm:$0xff]  }
   0x3   :  { %146 = vmatpush1.bf16.msra.mxu0 %v468_v2  ;;  %v475_v7 = vld [vmem:[%s659_s1 + $0x34] ss:$8 sps:$4 sm:$0xff]   ;;  %v477_v8 = vld [vmem:[%s659_s1 + $0x30] ss:$8 sps:$4 sm:$0xff]   ;;  %v478_v9 = vld [vmem:[%s659_s1 + $0x44] ss:$8 sps:$4 sm:$0xff]  }
   0x4   :  { %147 = vmatprep.subr.bf16.mxu0 %v469_v3  ;;  %v480_v10 = vld [vmem:[%s659_s1 + $0x40] ss:$8 sps:$4 sm:$0xff]   ;;  %v481_v12 = vld [vmem:[%s659_s1 + $0x54] ss:$8 sps:$4 sm:$0xff]   ;;  %v483_v17 = vld [vmem:[%s659_s1 + $0x50] ss:$8 sps:$4 sm:$0xff]  }
   0x5   :  { %v492_v11 = vld [vmem:[%s661_s3 + $0x40] sm:$0xff]   ;;  %v494_v14 = vld [vmem:[%s661_s3 + $0x48] sm:$0xff]   ;;  %v496_v16 = vld [vmem:[%s661_s3 + $0x50] sm:$0xff]   ;;  %v44_v36 = vshrl.u32 %v43_v35, 7 }
   0x6   :  { %v493_v13 = vld [vmem:[%s661_s3] sm:$0xff]   ;;  %437 = vmatprep.subr.bf16.mxu1 %v492_v11  ;;  %v495_v15 = vld [vmem:[%s661_s3 + $0x8] sm:$0xff]   ;;  %v497_v19 = vld [vmem:[%s661_s3 + $0x10] sm:$0xff]  }
   0x7   :  { %148 = vmatpush1.bf16.msra.mxu0 %v471_v4  ;;  %438 = vmatpush3.bf16.msra.mxu1 %v493_v13  ;;  %v484_v18 = vld [vmem:[%s659_s1 + $0x64] ss:$8 sps:$4 sm:$0xff]   ;;  %v486_v20 = vld [vmem:[%s659_s1 + $0x60] ss:$8 sps:$4 sm:$0xff]   ;;  %v498_v21 = vld [vmem:[%s661_s3 + $0x58] sm:$0xff]   ;;  %v45_v37 = vsub.s32 0, %v44_v36 }
   0x8   :  { %149 = vmatprep.subr.bf16.mxu0 %v472_v5  ;;  %439 = vmatprep.subr.bf16.mxu1 %v494_v14  ;;  %v487_v22 = vld [vmem:[%s659_s1 + $0x74] ss:$8 sps:$4 sm:$0xff]   ;;  %v500_v24 = vld [vmem:[%s661_s3 + $0x60] sm:$0xff]   ;;  %v489_v25 = vld [vmem:[%s659_s1 + $0x70] ss:$8 sps:$4 sm:$0xff]   ;;  %v49_v39 = vsub.s32 1, %v44_v36 }
   0x9   :  { %v499_v23 = vld [vmem:[%s661_s3 + $0x18] sm:$0xff]   ;;  %v501_v26 = vld [vmem:[%s661_s3 + $0x20] sm:$0xff]   ;;  %v502_v27 = vld [vmem:[%s661_s3 + $0x68] sm:$0xff]  }
   0xa   :  { %v490_v28 = vld [vmem:[%s660_s0] sm:$0xff]   ;;  %v491_v29 = vld [vmem:[%s660_s0 + $0x8] sm:$0xff]   ;;  %v504_v31 = vld [vmem:[%s661_s3 + $0x70] sm:$0xff]  }
   0xb   :  { %150 = vmatpush1.bf16.msra.mxu0 %v474_v6  ;;  %440 = vmatpush3.bf16.msra.mxu1 %v495_v15  ;;  %v503_v30 = vld [vmem:[%s661_s3 + $0x28] sm:$0xff]   ;;  %v505_v32 = vld [vmem:[%s661_s3 + $0x30] sm:$0xff]   ;;  %v506_v33 = vld [vmem:[%s661_s3 + $0x78] sm:$0xff]  }
   0xc   :  { %151 = vmatprep.subr.bf16.mxu0 %v475_v7  ;;  %441 = vmatprep.subr.bf16.mxu1 %v496_v16  ;;  %v507_v34 = vld [vmem:[%s661_s3 + $0x38] sm:$0xff]   ;;  %v41_v38 = vld [vmem:[%s662_s2] sm:$0x3] }
   0xd   :  { %v46_v40 = vrot.slane %v41_v38, %v45_v37  ;;  %v50_v41 = vrot.slane %v41_v38, %v49_v39  ;;  %v420_v7 = vld [vmem:[%s663_s4] ss:$0 sm:$0xff] }
   0xf   :  { %152 = vmatpush1.bf16.msra.mxu0 %v477_v8  ;;  %442 = vmatpush3.bf16.msra.mxu1 %v497_v19 }
  0x10   :  { %153 = vmatprep.subr.bf16.mxu0 %v478_v9  ;;  %443 = vmatprep.subr.bf16.mxu1 %v498_v21 }
  0x13   :  { %154 = vmatpush1.bf16.msra.mxu0 %v480_v10  ;;  %444 = vmatpush3.bf16.msra.mxu1 %v499_v23 }
  0x14   :  { %155 = vmatprep.subr.bf16.mxu0 %v481_v12  ;;  %445 = vmatprep.subr.bf16.mxu1 %v500_v24 }
  0x17   :  { %156 = vmatpush1.bf16.msra.mxu0 %v483_v17  ;;  %446 = vmatpush3.bf16.msra.mxu1 %v501_v26 }
  0x18   :  { %157 = vmatprep.subr.bf16.mxu0 %v484_v18  ;;  %447 = vmatprep.subr.bf16.mxu1 %v502_v27 }
  0x1b   :  { %158 = vmatpush1.bf16.msra.mxu0 %v486_v20  ;;  %448 = vmatpush3.bf16.msra.mxu1 %v503_v30 }
  0x1c   :  { %159 = vmatprep.subr.bf16.mxu0 %v487_v22  ;;  %449 = vmatprep.subr.bf16.mxu1 %v504_v31 }
  0x1f   :  { %160 = vmatpush1.bf16.msra.mxu0 %v489_v25  ;;  %450 = vmatpush3.bf16.msra.mxu1 %v505_v32 }
  0x20   :  { %451 = vmatprep.subr.bf16.mxu1 %v506_v33 }
  0x22   :  { %178 = vmatmul.mubr.bf16.vlgmr.msra.gmra.mrb[0].mxu0 %v490_v28 }
  0x23   :  { %187 = vmatprep.mubr.bf16.mxu0 %v508_v1  ;;  %452 = vmatpush3.bf16.msra.mxu1 %v507_v34 }
  0x2a   :  { %188 = vmatmul.mubr.bf16.gmra.mrb[4].mxu0 %v491_v29 }
  0xf5   :  { %v179_v42 = vpop.f32.mrb[0].mxu0 }
  0xf6   :  { %v180_v43 = vadd.f32 %v179_v42, %v46_v40  ;;  %v181_v44 = vpop.f32.mrb[1].mxu0 }
  0xf7   :  { %v182_v45 = vadd.f32 %v181_v44, %v50_v41  ;;  %v183_v46 = vpop.f32.mrb[2].mxu0 }
  0xf8   :  { %v184_v47 = vadd.f32 %v183_v46, %v46_v40  ;;  %v185_v48 = vpop.f32.mrb[3].mxu0  ;;  %v198_v50 = vmax.f32 %v180_v43, 0.0 }
  0xf9   :  { %v186_v49 = vadd.f32 %v185_v48, %v50_v41  ;;  %v199_v52 = vmax.f32 %v182_v45, 0.0 }
  0xfa   :  { %v200_v51 = vmax.f32 %v184_v47, 0.0 }
  0xfb   :  { %v201_v53 = vmax.f32 %v186_v49, 0.0 }
  0xfc   :  { %v206_v54 = vpack.c.bf16 %v200_v51, %v198_v50 }
  0xfd   :  { %v189_v55 = vpop.f32.mrb[4].mxu0  ;;  %v207_v56 = vpack.c.bf16 %v201_v53, %v199_v52 }
  0xfe   :  { %v190_v57 = vadd.f32 %v189_v55, %v46_v40  ;;  %v191_v58 = vpop.f32.mrb[5].mxu0 }
  0xff   :  { %v192_v59 = vadd.f32 %v191_v58, %v50_v41  ;;  %v193_v60 = vpop.f32.mrb[6].mxu0  ;;  %377 = vmatprep.mubr.bf16.mxu1 %v207_v56 }
 0x100   :  { %v194_v61 = vadd.f32 %v193_v60, %v46_v40  ;;  %v195_v62 = vpop.f32.mrb[7].mxu0  ;;  %378 = vmatmul.mubr.bf16.vlgmr.msra.gmra.mrb[0].mxu1 %v206_v54  ;;  %v202_v0 = vmax.f32 %v190_v57, 0.0 }
 0x101   :  { %v196_v63 = vadd.f32 %v195_v62, %v50_v41  ;;  %v203_v2 = vmax.f32 %v192_v59, 0.0 }
 0x102   :  { %v204_v1 = vmax.f32 %v194_v61, 0.0 }
 0x103   :  { %v205_v3 = vmax.f32 %v196_v63, 0.0 }
 0x104   :  { %v208_v4 = vpack.c.bf16 %v204_v1, %v202_v0 }
 0x105   :  { %v209_v5 = vpack.c.bf16 %v205_v3, %v203_v2 }
 0x107   :  { %385 = vmatprep.mubr.bf16.mxu1 %v209_v5 }
 0x108   :  { %386 = vmatmul.mubr.bf16.gmra.mrb[4].mxu1 %v208_v4 }
 0x1d3   :  { %v453_v6 = vpop.f32.mrb[0].mxu1 }
 0x1d4   :  { %v454_v8 = vpop.f32.mrb[1].mxu1 }
 0x1d5   :  { %v455_v9 = vadd.f32 %v454_v8, %v453_v6  ;;  %v456_v10 = vpop.f32.mrb[2].mxu1 }
 0x1d6   :  { %v457_v11 = vpop.f32.mrb[3].mxu1 }
 0x1d7   :  { %v380_v12 = vadd.f32 %v455_v9, %v420_v7  ;;  %v458_v13 = vadd.f32 %v457_v11, %v456_v10 }
 0x1d9   :  { %394 = vst [vmem:[%s664_s5] sm:$0xff] %v380_v12  ;;  %v383_v14 = vadd.f32 %v458_v13, %v420_v7 }
 0x1db   :  { %395 = vst [vmem:[%s664_s5 + $0x8] sm:$0xff] %v383_v14  ;;  %v459_v15 = vpop.f32.mrb[4].mxu1 }
 0x1dc   :  { %v460_v16 = vpop.f32.mrb[5].mxu1 }
 0x1dd   :  { %v461_v17 = vadd.f32 %v460_v16, %v459_v15  ;;  %v462_v18 = vpop.f32.mrb[6].mxu1 }
 0x1de   :  { %v463_v19 = vpop.f32.mrb[7].mxu1 }
 0x1df   :  { %v388_v20 = vadd.f32 %v461_v17, %v420_v7  ;;  %v464_v21 = vadd.f32 %v463_v19, %v462_v18 }
 0x1e1   :  { %396 = vst [vmem:[%s664_s5 + $0x10] sm:$0xff] %v388_v20  ;;  %v391_v22 = vadd.f32 %v464_v21, %v420_v7 }
 0x1e3   :  { %397 = vst [vmem:[%s664_s5 + $0x18] sm:$0xff] %v391_v22 }

</bundles_post_ra>
